<compile_context>
chip_gen: v5e
topology: v5e:2x2
jax: 0.10.0
libtpu: 0.0.40
codegen_flags: <defaults>
</compile_context>

<pallas_src>
import jax
import jax.numpy as jnp
from jax.experimental import pallas as pl
from jax.experimental.pallas import tpu as pltpu

IN_DIM = 3 * 32 * 32            # 3072
H1, H2, H3, OUT = 256, 128, 64, 10
H3P, OUTP = 128, 128            # lane-padded fc3 / class dims
NEG = -1e30                     # "minus infinity" for padded class logits
MAX_TB = 512                    # batch-tile cap (f32 x tile = 6 MiB, v7x-safe)
SMALL_B = 128                   # single-tile cutoff


def _round_up(x, m):
    return ((x + m - 1) // m) * m


def _cdiv(a, b):
    return -(-a // b)


def _mlp_kernel(x_ref, w1_ref, b1_ref, w2_ref, b2_ref,
                w3_ref, b3_ref, w4_ref, b4_ref, o_ref):
    # Whole 4-layer MLP for one batch tile. Matmuls hit the MXU in bf16 with
    # f32 accumulation; elementwise math stays f32 on the VPU/EUP.
    # x arrives in its HBM dtype (f32) and is converted on-chip -> no
    # materialized bf16 copy of x in HBM.
    x = x_ref[...].astype(jnp.bfloat16)

    h = jnp.dot(x, w1_ref[...], preferred_element_type=jnp.float32) + b1_ref[...]
    h = jnp.maximum(h, 0.0)

    h = jnp.dot(h.astype(jnp.bfloat16), w2_ref[...],
                preferred_element_type=jnp.float32) + b2_ref[...]
    h = jnp.maximum(h, 0.0)

    h = jnp.dot(h.astype(jnp.bfloat16), w3_ref[...],
                preferred_element_type=jnp.float32) + b3_ref[...]
    h = jnp.maximum(h, 0.0)

    # Padded class lanes carry a -1e30 bias -> exp() underflows to exactly 0,
    # so the real-class log_softmax is unaffected.
    logits = jnp.dot(h.astype(jnp.bfloat16), w4_ref[...],
                     preferred_element_type=jnp.float32) + b4_ref[...]

    m = jnp.max(logits, axis=-1, keepdims=True)
    z = logits - m
    lse = jnp.log(jnp.sum(jnp.exp(z), axis=-1, keepdims=True))
    o_ref[...] = (z - lse).astype(o_ref.dtype)


def pack_params(params):
    """Pad the narrow fc3/fc4 dims up to 128 lanes; weights -> bf16, biases -> f32.
    Call ONCE (outside jit / per-step code) and reuse the result."""
    w1, b1, w2, b2, w3, b3, w4, b4 = params
    w3p = jnp.pad(w3, ((0, 0), (0, H3P - H3)))
    b3p = jnp.pad(b3, ((0, 0), (0, H3P - H3)))
    w4p = jnp.pad(w4, ((0, H3P - H3), (0, OUTP - OUT)))
    b4p = jnp.pad(b4, ((0, 0), (0, OUTP - OUT)), constant_values=NEG)
    w1, w2, w3p, w4p = (w.astype(jnp.bfloat16) for w in (w1, w2, w3p, w4p))
    b1, b2, b3p, b4p = (b.astype(jnp.float32) for b in (b1, b2, b3p, b4p))
    return (w1, b1, w2, b2, w3p, b3p, w4p, b4p)


@jax.jit
def classifier_forward(x, packed):
    """Reproduces Classifier.forward. x: (B,3,32,32) or any other rank -> (1,-1).
    `packed` is the tuple returned by pack_params()."""
    if x.ndim == 4:
        xf = x.reshape(x.shape[0], -1)
    else:
        xf = x.reshape(1, -1)
    B = xf.shape[0]

    # ---- batch-tile selection (static shape math) --------------------------
    if B <= SMALL_B:
        # Tiny batch: one 16-row-aligned tile; pad only the few tail rows.
        tb = _round_up(B, 16)
        if tb != B:
            xf = jnp.pad(xf, ((0, tb - B), (0, 0)))
        rows = tb
    elif B <= 2 * MAX_TB:
        # Medium batch: exactly 2 tiles so the "parallel" grid axis can shard
        # across both v7x TensorCores.  Last block may be partial (masked).
        tb = _round_up(_cdiv(B, 2), 16)
        rows = B
    else:
        # Large batch: 512-row tiles, partial last block handled by Pallas.
        tb = MAX_TB
        rows = B
    n_tiles = _cdiv(rows, tb)

    w1, b1, w2, b2, w3, b3, w4, b4 = packed

    flops = 2 * rows * (IN_DIM * H1 + H1 * H2 + H2 * H3P + H3P * OUTP)
    bytes_accessed = (
        rows * IN_DIM * xf.dtype.itemsize                          # x (f32 read)
        + (IN_DIM * H1 + H1 * H2 + H2 * H3P + H3P * OUTP) * 2      # weights (bf16)
        + (H1 + H2 + H3P + OUTP) * 4                               # biases (f32)
        + rows * OUTP * 4                                          # output (f32)
    )

    out = pl.pallas_call(
        _mlp_kernel,
        out_shape=jax.ShapeDtypeStruct((rows, OUTP), jnp.float32),
        grid_spec=pltpu.PrefetchScalarGridSpec(
            num_scalar_prefetch=0,
            grid=(n_tiles,),
            in_specs=[
                pl.BlockSpec((tb, IN_DIM), lambda i: (i, 0)),   # x tile (f32)
                pl.BlockSpec((IN_DIM, H1), lambda i: (0, 0)),   # W1^T
                pl.BlockSpec((1, H1),      lambda i: (0, 0)),   # b1
                pl.BlockSpec((H1, H2),     lambda i: (0, 0)),   # W2^T
                pl.BlockSpec((1, H2),      lambda i: (0, 0)),   # b2
                pl.BlockSpec((H2, H3P),    lambda i: (0, 0)),   # W3^T (lane-padded)
                pl.BlockSpec((1, H3P),     lambda i: (0, 0)),   # b3   (lane-padded)
                pl.BlockSpec((H3P, OUTP),  lambda i: (0, 0)),   # W4^T (lane-padded)
                pl.BlockSpec((1, OUTP),    lambda i: (0, 0)),   # b4   (lane-padded, -1e30 pads)
            ],
            out_specs=pl.BlockSpec((tb, OUTP), lambda i: (i, 0)),
        ),
        compiler_params=pltpu.CompilerParams(
            dimension_semantics=("parallel",),
            vmem_limit_bytes=48 * 1024 * 1024,
        ),
        cost_estimate=pl.CostEstimate(
            flops=flops,
            transcendentals=rows * OUTP,
            bytes_accessed=bytes_accessed,
        ),
    )(xf, w1, b1, w2, b2, w3, b3, w4, b4)

    return out[:B, :OUT]


def init_params(key):
    """Matches PyTorch nn.Linear default init: U(-1/sqrt(fan_in), 1/sqrt(fan_in)).
    Weights stored already transposed: (in_features, out_features), f32."""
    dims = [(IN_DIM, H1), (H1, H2), (H2, H3), (H3, OUT)]
    params = []
    for (fan_in, fan_out) in dims:
        key, kw, kb = jax.random.split(key, 3)
        bound = 1.0 / jnp.sqrt(jnp.float32(fan_in))
        w = jax.random.uniform(kw, (fan_in, fan_out), jnp.float32, -bound, bound)
        b = jax.random.uniform(kb, (1, fan_out), jnp.float32, -bound, bound)
        params += [w, b]
    return tuple(params)


def _reference_forward_f32(x, params):
    # Pure f32 JAX reference (exact PyTorch semantics).
    xf = x.reshape(x.shape[0], -1) if x.ndim == 4 else x.reshape(1, -1)
    w1, b1, w2, b2, w3, b3, w4, b4 = params
    h = jax.nn.relu(xf @ w1 + b1)
    h = jax.nn.relu(h @ w2 + b2)
    h = jax.nn.relu(h @ w3 + b3)
    return jax.nn.log_softmax(h @ w4 + b4, axis=1)


def _reference_forward_bf16(x, params):
    # Reference mirroring the kernel's bf16-inputs / f32-accumulate matmuls.
    xf = x.reshape(x.shape[0], -1) if x.ndim == 4 else x.reshape(1, -1)
    w1, b1, w2, b2, w3, b3, w4, b4 = params

    def lin(h, w, b):
        return jnp.dot(h.astype(jnp.bfloat16), w.astype(jnp.bfloat16),
                       preferred_element_type=jnp.float32) + b

    h = jax.nn.relu(lin(xf.astype(jnp.float32), w1, b1))
    h = jax.nn.relu(lin(h, w2, b2))
    h = jax.nn.relu(lin(h, w3, b3))
    return jax.nn.log_softmax(lin(h, w4, b4), axis=1)


if __name__ == "__main__":
    key = jax.random.PRNGKey(0)
    key, kx = jax.random.split(key)

    params = init_params(key)
    packed = pack_params(params)          # packed ONCE, outside the jitted forward

    # Small batch of CIFAR-shaped inputs (NCHW), as the module's forward implies.
    x = jax.random.normal(kx, (2, 3, 32, 32), jnp.float32)

    out = jax.block_until_ready(classifier_forward(x, packed))
    assert out.shape == (2, 10)

    # Tight check vs. a reference using the same bf16-matmul / f32-accumulate recipe.
    ref_bf16 = _reference_forward_bf16(x, params)
    assert jnp.allclose(out, ref_bf16, atol=1e-3, rtol=1e-3)

    # Loose check vs. the exact f32 PyTorch-equivalent reference (bf16 rounding slack).
    ref_f32 = _reference_forward_f32(x, params)
    assert jnp.allclose(out, ref_f32, atol=5e-2, rtol=5e-2)

    print("KERNEL_OK")
</pallas_src>

<mosaic_0001>
module attributes {stable_mosaic.version = 11 : i64} {
  func.func @_mlp_kernel(%arg0: i32, %arg1: memref<16x3072xf32, #tpu.memory_space<vmem>>, %arg2: memref<3072x256xbf16, #tpu.memory_space<vmem>>, %arg3: memref<1x256xf32, #tpu.memory_space<vmem>>, %arg4: memref<256x128xbf16, #tpu.memory_space<vmem>>, %arg5: memref<1x128xf32, #tpu.memory_space<vmem>>, %arg6: memref<128x128xbf16, #tpu.memory_space<vmem>>, %arg7: memref<1x128xf32, #tpu.memory_space<vmem>>, %arg8: memref<128x128xbf16, #tpu.memory_space<vmem>>, %arg9: memref<1x128xf32, #tpu.memory_space<vmem>>, %arg10: memref<16x128xf32, #tpu.memory_space<vmem>>) attributes {dimension_semantics = [#tpu.dimension_semantics<parallel>], iteration_bounds = array<i64: 1>, scalar_prefetch = 0 : i64, scratch_operands = 0 : i64, tpu.core_type = #tpu.core_type<tc>, window_params = [{transform_indices = @transform_0, window_bounds = array<i64: 16, 3072>}, {pipeline_mode = #tpu.pipeline_mode<synchronous>, transform_indices = @transform_1, window_bounds = array<i64: 3072, 256>}, {pipeline_mode = #tpu.pipeline_mode<synchronous>, transform_indices = @transform_2, window_bounds = array<i64: 1, 256>}, {pipeline_mode = #tpu.pipeline_mode<synchronous>, transform_indices = @transform_3, window_bounds = array<i64: 256, 128>}, {pipeline_mode = #tpu.pipeline_mode<synchronous>, transform_indices = @transform_4, window_bounds = array<i64: 1, 128>}, {pipeline_mode = #tpu.pipeline_mode<synchronous>, transform_indices = @transform_5, window_bounds = array<i64: 128, 128>}, {pipeline_mode = #tpu.pipeline_mode<synchronous>, transform_indices = @transform_6, window_bounds = array<i64: 1, 128>}, {pipeline_mode = #tpu.pipeline_mode<synchronous>, transform_indices = @transform_7, window_bounds = array<i64: 128, 128>}, {pipeline_mode = #tpu.pipeline_mode<synchronous>, transform_indices = @transform_8, window_bounds = array<i64: 1, 128>}, {transform_indices = @transform_9, window_bounds = array<i64: 16, 128>}]} {
    %c0 = arith.constant 0 : index
    %c0_0 = arith.constant 0 : index
    %0 = vector.load %arg1[%c0, %c0_0] : memref<16x3072xf32, #tpu.memory_space<vmem>>, vector<16x3072xf32>
    %1 = arith.truncf %0 : vector<16x3072xf32> to vector<16x3072xbf16>
    %c0_1 = arith.constant 0 : index
    %c0_2 = arith.constant 0 : index
    %2 = vector.load %arg2[%c0_1, %c0_2] : memref<3072x256xbf16, #tpu.memory_space<vmem>>, vector<3072x256xbf16>
    %cst = arith.constant dense<0.000000e+00> : vector<16x256xf32>
    %3 = tpu.matmul %1, %2, %cst {dimension_numbers = #tpu.dot_dimension_numbers<[1], [0], [0], [1], [0, 0, 1, 1], [], []>} : vector<16x3072xbf16>, vector<3072x256xbf16>, vector<16x256xf32> -> vector<16x256xf32>
    %c0_3 = arith.constant 0 : index
    %c0_4 = arith.constant 0 : index
    %4 = vector.load %arg3[%c0_3, %c0_4] : memref<1x256xf32, #tpu.memory_space<vmem>>, vector<1x256xf32>
    %5 = vector.broadcast %4 : vector<1x256xf32> to vector<16x256xf32>
    %6 = arith.addf %3, %5 : vector<16x256xf32>
    %cst_5 = arith.constant 0.000000e+00 : f32
    %7 = vector.broadcast %cst_5 : f32 to vector<16x256xf32>
    %8 = arith.maximumf %6, %7 : vector<16x256xf32>
    %9 = arith.truncf %8 : vector<16x256xf32> to vector<16x256xbf16>
    %c0_6 = arith.constant 0 : index
    %c0_7 = arith.constant 0 : index
    %10 = vector.load %arg4[%c0_6, %c0_7] : memref<256x128xbf16, #tpu.memory_space<vmem>>, vector<256x128xbf16>
    %cst_8 = arith.constant dense<0.000000e+00> : vector<16x128xf32>
    %11 = tpu.matmul %9, %10, %cst_8 {dimension_numbers = #tpu.dot_dimension_numbers<[1], [0], [0], [1], [0, 0, 1, 1], [], []>} : vector<16x256xbf16>, vector<256x128xbf16>, vector<16x128xf32> -> vector<16x128xf32>
    %c0_9 = arith.constant 0 : index
    %c0_10 = arith.constant 0 : index
    %12 = vector.load %arg5[%c0_9, %c0_10] : memref<1x128xf32, #tpu.memory_space<vmem>>, vector<1x128xf32>
    %13 = vector.broadcast %12 : vector<1x128xf32> to vector<16x128xf32>
    %14 = arith.addf %11, %13 : vector<16x128xf32>
    %cst_11 = arith.constant 0.000000e+00 : f32
    %15 = vector.broadcast %cst_11 : f32 to vector<16x128xf32>
    %16 = arith.maximumf %14, %15 : vector<16x128xf32>
    %17 = arith.truncf %16 : vector<16x128xf32> to vector<16x128xbf16>
    %c0_12 = arith.constant 0 : index
    %c0_13 = arith.constant 0 : index
    %18 = vector.load %arg6[%c0_12, %c0_13] : memref<128x128xbf16, #tpu.memory_space<vmem>>, vector<128x128xbf16>
    %cst_14 = arith.constant dense<0.000000e+00> : vector<16x128xf32>
    %19 = tpu.matmul %17, %18, %cst_14 {dimension_numbers = #tpu.dot_dimension_numbers<[1], [0], [0], [1], [0, 0, 1, 1], [], []>} : vector<16x128xbf16>, vector<128x128xbf16>, vector<16x128xf32> -> vector<16x128xf32>
    %c0_15 = arith.constant 0 : index
    %c0_16 = arith.constant 0 : index
    %20 = vector.load %arg7[%c0_15, %c0_16] : memref<1x128xf32, #tpu.memory_space<vmem>>, vector<1x128xf32>
    %21 = vector.broadcast %20 : vector<1x128xf32> to vector<16x128xf32>
    %22 = arith.addf %19, %21 : vector<16x128xf32>
    %cst_17 = arith.constant 0.000000e+00 : f32
    %23 = vector.broadcast %cst_17 : f32 to vector<16x128xf32>
    %24 = arith.maximumf %22, %23 : vector<16x128xf32>
    %25 = arith.truncf %24 : vector<16x128xf32> to vector<16x128xbf16>
    %c0_18 = arith.constant 0 : index
    %c0_19 = arith.constant 0 : index
    %26 = vector.load %arg8[%c0_18, %c0_19] : memref<128x128xbf16, #tpu.memory_space<vmem>>, vector<128x128xbf16>
    %cst_20 = arith.constant dense<0.000000e+00> : vector<16x128xf32>
    %27 = tpu.matmul %25, %26, %cst_20 {dimension_numbers = #tpu.dot_dimension_numbers<[1], [0], [0], [1], [0, 0, 1, 1], [], []>} : vector<16x128xbf16>, vector<128x128xbf16>, vector<16x128xf32> -> vector<16x128xf32>
    %c0_21 = arith.constant 0 : index
    %c0_22 = arith.constant 0 : index
    %28 = vector.load %arg9[%c0_21, %c0_22] : memref<1x128xf32, #tpu.memory_space<vmem>>, vector<1x128xf32>
    %29 = vector.broadcast %28 : vector<1x128xf32> to vector<16x128xf32>
    %30 = arith.addf %27, %29 : vector<16x128xf32>
    %cst_23 = arith.constant dense<0xFF800000> : vector<16xf32>
    %31 = vector.multi_reduction <maximumf>, %30, %cst_23 [1] : vector<16x128xf32> to vector<16xf32>
    %32 = vector.shape_cast %31 : vector<16xf32> to vector<16x1xf32>
    %33 = vector.broadcast %32 : vector<16x1xf32> to vector<16x128xf32>
    %34 = arith.subf %30, %33 : vector<16x128xf32>
    %35 = math.exp %34 : vector<16x128xf32>
    %cst_24 = arith.constant dense<0.000000e+00> : vector<16xf32>
    %36 = vector.multi_reduction <add>, %35, %cst_24 [1] : vector<16x128xf32> to vector<16xf32>
    %37 = vector.shape_cast %36 : vector<16xf32> to vector<16x1xf32>
    %38 = math.log %37 : vector<16x1xf32>
    %39 = vector.broadcast %38 : vector<16x1xf32> to vector<16x128xf32>
    %40 = arith.subf %34, %39 : vector<16x128xf32>
    %c0_25 = arith.constant 0 : index
    %c0_26 = arith.constant 0 : index
    %41 = vector.load %arg10[%c0_25, %c0_26] : memref<16x128xf32, #tpu.memory_space<vmem>>, vector<16x128xf32>
    tpu.vector_store %arg10[%c0_25, %c0_26], %40 {strides = array<i32>} : memref<16x128xf32, #tpu.memory_space<vmem>>, vector<16x128xf32>,
    return
  }
  func.func @transform_0(%arg0: i32) -> (i32, i32) {
    %c0_i32 = arith.constant 0 : i32
    %c0_i32_0 = arith.constant 0 : i32
    return %arg0, %c0_i32 : i32, i32
  }
  func.func @transform_1(%arg0: i32) -> (i32, i32) {
    %c0_i32 = arith.constant 0 : i32
    %c0_i32_0 = arith.constant 0 : i32
    %c0_i32_1 = arith.constant 0 : i32
    return %c0_i32, %c0_i32_0 : i32, i32
  }
  func.func @transform_2(%arg0: i32) -> (i32, i32) {
    %c0_i32 = arith.constant 0 : i32
    %c0_i32_0 = arith.constant 0 : i32
    %c0_i32_1 = arith.constant 0 : i32
    return %c0_i32, %c0_i32_0 : i32, i32
  }
  func.func @transform_3(%arg0: i32) -> (i32, i32) {
    %c0_i32 = arith.constant 0 : i32
    %c0_i32_0 = arith.constant 0 : i32
    %c0_i32_1 = arith.constant 0 : i32
    return %c0_i32, %c0_i32_0 : i32, i32
  }
  func.func @transform_4(%arg0: i32) -> (i32, i32) {
    %c0_i32 = arith.constant 0 : i32
    %c0_i32_0 = arith.constant 0 : i32
    %c0_i32_1 = arith.constant 0 : i32
    return %c0_i32, %c0_i32_0 : i32, i32
  }
  func.func @transform_5(%arg0: i32) -> (i32, i32) {
    %c0_i32 = arith.constant 0 : i32
    %c0_i32_0 = arith.constant 0 : i32
    %c0_i32_1 = arith.constant 0 : i32
    return %c0_i32, %c0_i32_0 : i32, i32
  }
  func.func @transform_6(%arg0: i32) -> (i32, i32) {
    %c0_i32 = arith.constant 0 : i32
    %c0_i32_0 = arith.constant 0 : i32
    %c0_i32_1 = arith.constant 0 : i32
    return %c0_i32, %c0_i32_0 : i32, i32
  }
  func.func @transform_7(%arg0: i32) -> (i32, i32) {
    %c0_i32 = arith.constant 0 : i32
    %c0_i32_0 = arith.constant 0 : i32
    %c0_i32_1 = arith.constant 0 : i32
    return %c0_i32, %c0_i32_0 : i32, i32
  }
  func.func @transform_8(%arg0: i32) -> (i32, i32) {
    %c0_i32 = arith.constant 0 : i32
    %c0_i32_0 = arith.constant 0 : i32
    %c0_i32_1 = arith.constant 0 : i32
    return %c0_i32, %c0_i32_0 : i32, i32
  }
  func.func @transform_9(%arg0: i32) -> (i32, i32) {
    %c0_i32 = arith.constant 0 : i32
    %c0_i32_0 = arith.constant 0 : i32
    return %arg0, %c0_i32 : i32, i32
  }
}

</mosaic_0001>

<bundles_post_ra>
// kernel: classifier_forward.1
= control target key start
LH: loop header
LB: loop body
LE: loop exit
PB: predicated region body
PF: predicated region fallthrough
CT: control target
= control target key end

     0   :  { %14 = vsyncpa [#allocation3], 0  ;;  %s6316_s0 = inlined_call_operand.vmem [shape: f32[16,3072], index: 0, kind: input, shape index: {}]   ;;  %s6317_s1 = inlined_call_operand.hbm [shape: bf16[3072,256], index: 1, kind: input, shape index: {}]   ;;  %s6318_s2 = inlined_call_operand.hbm [shape: f32[1,256], index: 2, kind: input, shape index: {}]   ;;  %s6319_s3 = inlined_call_operand.hbm [shape: bf16[256,128], index: 3, kind: input, shape index: {}]   ;;  %s6320_s4 = inlined_call_operand.hbm [shape: f32[1,128], index: 4, kind: input, shape index: {}]   ;;  %s6321_s5 = inlined_call_operand.hbm [shape: bf16[128,128], index: 5, kind: input, shape index: {}]   ;;  %s6322_s6 = inlined_call_operand.hbm [shape: f32[1,128], index: 6, kind: input, shape index: {}]   ;;  %s6323_s7 = inlined_call_operand.hbm [shape: bf16[128,128], index: 7, kind: input, shape index: {}]   ;;  %s6324_s8 = inlined_call_operand.hbm [shape: f32[1,128], index: 8, kind: input, shape index: {}]   ;;  %s6325_s9 = inlined_call_operand.vmem [shape: f32[16,128], index: 9, kind: output, shape index: {}]  }
   0x1   :  { %15 = vsyncpa [#allocation5], 0 }
   0x2   :  { %16 = vsyncpa [#allocation8], 0 }
   0x3   :  { %17 = vsyncpa [#allocation11], 0  ;;  %s39_s11 = sshll.u32 %s6318_s2, 4  ;;  %s40_s11 = int_to_ptr.hbm [resolvable:$true] %s39_s11 }
   0x4   :  { %18 = vsyncpa [#allocation14], 0  ;;  %s5875_s12 = smov [#allocation4]   ;;  %s63_s16 = sshll.u32 %s6320_s4, 4  ;;  %s64_s16 = int_to_ptr.hbm [resolvable:$true] %s63_s16 }
   0x5   :  { %s41_s13 = sshll.u32 %s5875_s12, 4  ;;  %s5876_s17 = smov [#allocation7]   ;;  %s42_s13 = int_to_ptr.vmem [resolvable:$true] %s41_s13 }
   0x6   :  { %44 = dma.hbm_to_vmem [thread:$0]  %s40_s11, 32, %s42_s13, [#allocation5]  }
   0x7   :  { %s65_s18 = sshll.u32 %s5876_s17, 4  ;;  %s87_s21 = sshll.u32 %s6322_s6, 4  ;;  %s66_s18 = int_to_ptr.vmem [resolvable:$true] %s65_s18  ;;  %s88_s21 = int_to_ptr.hbm [resolvable:$true] %s87_s21 }
   0x8   :  { %68 = dma.hbm_to_vmem [thread:$0]  %s64_s16, 16, %s66_s18, [#allocation8]  }
   0x9   :  { %s25_s23 = sshll.u32 %s6317_s1, 4  ;;  %s5877_s24 = smov [#allocation10]   ;;  %s26_s23 = int_to_ptr.hbm [resolvable:$true] %s25_s23 }
   0xa   :  { %s89_s25 = sshll.u32 %s5877_s24, 4  ;;  %s5878_s4 = smov [#allocation2]   ;;  %s90_s25 = int_to_ptr.vmem [resolvable:$true] %s89_s25 }
   0xb   :  { %92 = dma.hbm_to_vmem [thread:$0]  %s88_s21, 16, %s90_s25, [#allocation11]  }
   0xc   :  { %s27_s26 = sshll.u32 %s5878_s4, 4  ;;  %s5879_s27 = smov 128   ;;  %s28_s26 = int_to_ptr.vmem [resolvable:$true] %s27_s26 }
   0xd   :  { %s5880_s28 = smov 8   ;;  %s49_s30 = sshll.u32 %s6319_s3, 4  ;;  %s50_s30 = int_to_ptr.hbm [resolvable:$true] %s49_s30 }
   0xe   :  { %33 = dma.hbm_to_vmem [thread:$0]  %s26_s23, 49152, %s28_s26, [#allocation3], %s5879_s27, %s5879_s27, %s5880_s28  }
   0xf   :  { %s5881_s10 = smov [#allocation6]   ;;  %s73_s13 = sshll.u32 %s6321_s5, 4  ;;  %s74_s13 = int_to_ptr.hbm [resolvable:$true] %s73_s13 }
  0x10   :  { %s51_s11 = sshll.u32 %s5881_s10, 4  ;;  %s5882_s14 = smov 64   ;;  %s52_s11 = int_to_ptr.vmem [resolvable:$true] %s51_s11 }
  0x11   :  { %s5883_s15 = smov 4   ;;  %s5884_s16 = smov [#allocation9]  }
  0x12   :  { %57 = dma.hbm_to_vmem [thread:$0]  %s50_s30, 2048, %s52_s11, [#allocation5], %s5882_s14, %s5882_s14, %s5883_s15  }
  0x13   :  { %s75_s17 = sshll.u32 %s5884_s16, 4  ;;  %s97_s20 = sshll.u32 %s6323_s7, 4  ;;  %s76_s17 = int_to_ptr.vmem [resolvable:$true] %s75_s17  ;;  %s98_s20 = int_to_ptr.hbm [resolvable:$true] %s97_s20 }
  0x14   :  { %81 = dma.hbm_to_vmem [thread:$0]  %s74_s13, 1024, %s76_s17, [#allocation8], %s5882_s14, %s5882_s14, %s5883_s15  }
  0x15   :  { %s111_s2 = sshll.u32 %s6324_s8, 4  ;;  %s5885_s22 = smov [#allocation12]   ;;  %s112_s2 = int_to_ptr.hbm [resolvable:$true] %s111_s2 }
  0x16   :  { %s99_s23 = sshll.u32 %s5885_s22, 4  ;;  %s5886_s5 = smov [#allocation13]   ;;  %s100_s23 = int_to_ptr.vmem [resolvable:$true] %s99_s23 }
  0x17   :  { %105 = dma.hbm_to_vmem [thread:$0]  %s98_s20, 1024, %s100_s23, [#allocation11], %s5882_s14, %s5882_s14, %s5883_s15  }
  0x18   :  { %s113_s24 = sshll.u32 %s5886_s5, 4  ;;  %s114_s24 = int_to_ptr.vmem [resolvable:$true] %s113_s24 }
  0x19   :  { %116 = dma.hbm_to_vmem [thread:$0]  %s112_s2, 16, %s114_s24, [#allocation14]  }
  0x1a   :  { %5865 = dma.done.wait [#allocation3], 49152  }
  0x1b   :  { %5866 = vsyncadd [#allocation3], 4294918144 }
  0x1c   :  { %5867 = dma.done.wait [#allocation5], 2080  }
  0x1d   :  { %5868 = vsyncadd [#allocation5], 4294965216 }
  0x1e   :  { %5869 = dma.done.wait [#allocation8], 1040  }
  0x1f   :  { %5870 = vsyncadd [#allocation8], 4294966256 }
  0x20   :  { %5871 = dma.done.wait [#allocation11], 1040  }
  0x21   :  { %5872 = vsyncadd [#allocation11], 4294966256 }
  0x22   :  { %5873 = dma.done.wait [#allocation14], 16  }
  0x23   :  { %5874 = vsyncadd [#allocation14], 4294967280  ;;  %v3628_v0 = vld [vmem:[#allocation2 + $0x70] sm:$0xf]  ;;  %v5249_v1 = vld [vmem:[#allocation2 + $0x74] sm:$0xf0] }
  0x24   :  { %v3692_v2 = vld [vmem:[#allocation2 + $0xf0] sm:$0xf]  ;;  %v3629_v3 = vor.u32 %v5249_v1, %v3628_v0  ;;  %v5265_v4 = vld [vmem:[#allocation2 + $0xf4] sm:$0xf0]  ;;  %v3620_v11 = vld [vmem:[#allocation2 + $0x60] sm:$0xf] }
  0x25   :  { %v3756_v5 = vld [vmem:[#allocation2 + $0x170] sm:$0xf]  ;;  %v5281_v6 = vld [vmem:[#allocation2 + $0x174] sm:$0xf0]  ;;  %v3693_v7 = vor.u32 %v5265_v4, %v3692_v2  ;;  %v5247_v13 = vld [vmem:[#allocation2 + $0x64] sm:$0xf0] }
  0x26   :  { %v3757_v8 = vor.u32 %v5281_v6, %v3756_v5  ;;  %v3820_v9 = vld [vmem:[#allocation2 + $0x1f0] sm:$0xf]  ;;  %v5297_v10 = vld [vmem:[#allocation2 + $0x1f4] sm:$0xf0]  ;;  %2531 = vmatpush.bf16.msra.mxu0 %v3629_v3  ;;  %v3684_v14 = vld [vmem:[#allocation2 + $0xe0] sm:$0xf]  ;;  %v3621_v16 = vor.u32 %v5247_v13, %v3620_v11 }
  0x27   :  { %v3821_v12 = vor.u32 %v5297_v10, %v3820_v9  ;;  %v5263_v15 = vld [vmem:[#allocation2 + $0xe4] sm:$0xf0]  ;;  %2545 = vmatpush.bf16.msra.mxu1 %v3693_v7  ;;  %v3748_v18 = vld [vmem:[#allocation2 + $0x160] sm:$0xf]  ;;  %v3612_v23 = vld [vmem:[#allocation2 + $0x50] sm:$0xf] }
  0x28   :  { %2559 = vmatpush.bf16.msra.mxu2 %v3757_v8  ;;  %v3685_v17 = vor.u32 %v5263_v15, %v3684_v14  ;;  %v5279_v19 = vld [vmem:[#allocation2 + $0x164] sm:$0xf0]  ;;  %v3812_v20 = vld [vmem:[#allocation2 + $0x1e0] sm:$0xf]  ;;  %v5245_v24 = vld [vmem:[#allocation2 + $0x54] sm:$0xf0] }
  0x29   :  { %2573 = vmatpush.bf16.msra.mxu3 %v3821_v12  ;;  %v3749_v21 = vor.u32 %v5279_v19, %v3748_v18  ;;  %v5295_v22 = vld [vmem:[#allocation2 + $0x1e4] sm:$0xf0]  ;;  %v3676_v26 = vld [vmem:[#allocation2 + $0xd0] sm:$0xf]  ;;  %v5261_v27 = vld [vmem:[#allocation2 + $0xd4] sm:$0xf0]  ;;  %v3613_v29 = vor.u32 %v5245_v24, %v3612_v23 }
  0x2a   :  { %v3813_v25 = vor.u32 %v5295_v22, %v3812_v20  ;;  %v3740_v28 = vld [vmem:[#allocation2 + $0x150] sm:$0xf]  ;;  %2532 = vmatpush.bf16.msra.mxu0 %v3621_v16  ;;  %v5277_v30 = vld [vmem:[#allocation2 + $0x154] sm:$0xf0]  ;;  %v3677_v33 = vor.u32 %v5261_v27, %v3676_v26  ;;  %v3604_v35 = vld [vmem:[#allocation2 + $0x40] sm:$0xf] }
  0x2b   :  { %v3804_v31 = vld [vmem:[#allocation2 + $0x1d0] sm:$0xf]  ;;  %v5293_v32 = vld [vmem:[#allocation2 + $0x1d4] sm:$0xf0]  ;;  %2546 = vmatpush.bf16.msra.mxu1 %v3685_v17  ;;  %v3741_v34 = vor.u32 %v5277_v30, %v3740_v28  ;;  %v5243_v36 = vld [vmem:[#allocation2 + $0x44] sm:$0xf0] }
  0x2c   :  { %2560 = vmatpush.bf16.msra.mxu2 %v3749_v21  ;;  %v3668_v37 = vld [vmem:[#allocation2 + $0xc0] sm:$0xf]  ;;  %v3805_v38 = vor.u32 %v5293_v32, %v3804_v31  ;;  %v5259_v39 = vld [vmem:[#allocation2 + $0xc4] sm:$0xf0]  ;;  %v3605_v44 = vor.u32 %v5243_v36, %v3604_v35  ;;  %v3596_v47 = vld [vmem:[#allocation2 + $0x30] sm:$0xf] }
  0x2d   :  { %2574 = vmatpush.bf16.msra.mxu3 %v3813_v25  ;;  %v3732_v40 = vld [vmem:[#allocation2 + $0x140] sm:$0xf]  ;;  %v5275_v41 = vld [vmem:[#allocation2 + $0x144] sm:$0xf0]  ;;  %v3669_v45 = vor.u32 %v5259_v39, %v3668_v37  ;;  %v5241_v48 = vld [vmem:[#allocation2 + $0x34] sm:$0xf0] }
  0x2e   :  { %v3796_v42 = vld [vmem:[#allocation2 + $0x1c0] sm:$0xf]  ;;  %v5291_v43 = vld [vmem:[#allocation2 + $0x1c4] sm:$0xf0]  ;;  %2533 = vmatpush.bf16.msra.mxu0 %v3613_v29  ;;  %v3733_v46 = vor.u32 %v5275_v41, %v3732_v40  ;;  %v3660_v49 = vld [vmem:[#allocation2 + $0xb0] sm:$0xf]  ;;  %v3597_v56 = vor.u32 %v5241_v48, %v3596_v47 }
  0x2f   :  { %2547 = vmatpush.bf16.msra.mxu1 %v3677_v33  ;;  %v3797_v50 = vor.u32 %v5291_v43, %v3796_v42  ;;  %v5257_v51 = vld [vmem:[#allocation2 + $0xb4] sm:$0xf0]  ;;  %v3724_v52 = vld [vmem:[#allocation2 + $0x130] sm:$0xf]  ;;  %v3588_v59 = vld [vmem:[#allocation2 + $0x20] sm:$0xf] }
  0x30   :  { %2561 = vmatpush.bf16.msra.mxu2 %v3741_v34  ;;  %v5273_v53 = vld [vmem:[#allocation2 + $0x134] sm:$0xf0]  ;;  %v3788_v54 = vld [vmem:[#allocation2 + $0x1b0] sm:$0xf]  ;;  %v3661_v57 = vor.u32 %v5257_v51, %v3660_v49  ;;  %v5239_v60 = vld [vmem:[#allocation2 + $0x24] sm:$0xf0] }
  0x31   :  { %2575 = vmatpush.bf16.msra.mxu3 %v3805_v38  ;;  %v5289_v55 = vld [vmem:[#allocation2 + $0x1b4] sm:$0xf0]  ;;  %v3725_v58 = vor.u32 %v5273_v53, %v3724_v52  ;;  %v3652_v61 = vld [vmem:[#allocation2 + $0xa0] sm:$0xf]  ;;  %v5255_v63 = vld [vmem:[#allocation2 + $0xa4] sm:$0xf0]  ;;  %v3589_v4 = vor.u32 %v5239_v60, %v3588_v59 }
  0x32   :  { %2534 = vmatpush.bf16.msra.mxu0 %v3605_v44  ;;  %v3789_v62 = vor.u32 %v5289_v55, %v3788_v54  ;;  %v3716_v0 = vld [vmem:[#allocation2 + $0x120] sm:$0xf]  ;;  %v5271_v1 = vld [vmem:[#allocation2 + $0x124] sm:$0xf0]  ;;  %v3653_v5 = vor.u32 %v5255_v63, %v3652_v61  ;;  %v3580_v7 = vld [vmem:[#allocation2 + $0x10] sm:$0xf] }
  0x33   :  { %2548 = vmatpush.bf16.msra.mxu1 %v3669_v45  ;;  %v3780_v2 = vld [vmem:[#allocation2 + $0x1a0] sm:$0xf]  ;;  %v5287_v3 = vld [vmem:[#allocation2 + $0x1a4] sm:$0xf0]  ;;  %v3717_v6 = vor.u32 %v5271_v1, %v3716_v0  ;;  %v5237_v8 = vld [vmem:[#allocation2 + $0x14] sm:$0xf0] }
  0x34   :  { %2562 = vmatpush.bf16.msra.mxu2 %v3733_v46  ;;  %v3644_v9 = vld [vmem:[#allocation2 + $0x90] sm:$0xf]  ;;  %v3781_v10 = vor.u32 %v5287_v3, %v3780_v2  ;;  %v5253_v11 = vld [vmem:[#allocation2 + $0x94] sm:$0xf0]  ;;  %v3581_v16 = vor.u32 %v5237_v8, %v3580_v7  ;;  %v3572_v17 = vld [vmem:[#allocation2] sm:$0xf] }
  0x35   :  { %2576 = vmatpush.bf16.msra.mxu3 %v3797_v50  ;;  %v3708_v12 = vld [vmem:[#allocation2 + $0x110] sm:$0xf]  ;;  %v5269_v13 = vld [vmem:[#allocation2 + $0x114] sm:$0xf0]  ;;  %v5235_v18 = vld [vmem:[#allocation2 + $0x4] sm:$0xf0]  ;;  %v3645_v19 = vor.u32 %v5253_v11, %v3644_v9 }
  0x36   :  { %2535 = vmatpush.bf16.msra.mxu0 %v3597_v56  ;;  %v3772_v14 = vld [vmem:[#allocation2 + $0x190] sm:$0xf]  ;;  %v5285_v15 = vld [vmem:[#allocation2 + $0x194] sm:$0xf0]  ;;  %v3709_v20 = vor.u32 %v5269_v13, %v3708_v12  ;;  %v3636_v21 = vld [vmem:[#allocation2 + $0x80] sm:$0xf]  ;;  %v3573_v31 = vor.u32 %v5235_v18, %v3572_v17 }
  0x37   :  { %2549 = vmatpush.bf16.msra.mxu1 %v3661_v57  ;;  %v5251_v22 = vld [vmem:[#allocation2 + $0x84] sm:$0xf0]  ;;  %v3700_v23 = vld [vmem:[#allocation2 + $0x100] sm:$0xf]  ;;  %v3773_v24 = vor.u32 %v5285_v15, %v3772_v14  ;;  %v3884_v28 = vld [vmem:[#allocation2 + $0x270] sm:$0xf] }
  0x38   :  { %2563 = vmatpush.bf16.msra.mxu2 %v3725_v58  ;;  %v5267_v25 = vld [vmem:[#allocation2 + $0x104] sm:$0xf0]  ;;  %v3764_v26 = vld [vmem:[#allocation2 + $0x180] sm:$0xf]  ;;  %v5313_v29 = vld [vmem:[#allocation2 + $0x274] sm:$0xf0]  ;;  %v3637_v35 = vor.u32 %v5251_v22, %v3636_v21 }
  0x39   :  { %2577 = vmatpush.bf16.msra.mxu3 %v3789_v62  ;;  %v5283_v27 = vld [vmem:[#allocation2 + $0x184] sm:$0xf0]  ;;  %v3948_v30 = vld [vmem:[#allocation2 + $0x2f0] sm:$0xf]  ;;  %v5329_v32 = vld [vmem:[#allocation2 + $0x2f4] sm:$0xf0]  ;;  %v3701_v36 = vor.u32 %v5267_v25, %v3700_v23  ;;  %v3885_v40 = vor.u32 %v5313_v29, %v3884_v28 }
  0x3a   :  { %2536 = vmatpush.bf16.msra.mxu0 %v3589_v4  ;;  %v4012_v33 = vld [vmem:[#allocation2 + $0x370] sm:$0xf]  ;;  %v5345_v34 = vld [vmem:[#allocation2 + $0x374] sm:$0xf0]  ;;  %v3765_v39 = vor.u32 %v5283_v27, %v3764_v26  ;;  %v3876_v41 = vld [vmem:[#allocation2 + $0x260] sm:$0xf]  ;;  %v3949_v43 = vor.u32 %v5329_v32, %v3948_v30 }
  0x3b   :  { %2550 = vmatpush.bf16.msra.mxu1 %v3653_v5  ;;  %v4076_v37 = vld [vmem:[#allocation2 + $0x3f0] sm:$0xf]  ;;  %v5361_v38 = vld [vmem:[#allocation2 + $0x3f4] sm:$0xf0]  ;;  %v5311_v42 = vld [vmem:[#allocation2 + $0x264] sm:$0xf0]  ;;  %v4013_v44 = vor.u32 %v5345_v34, %v4012_v33 }
  0x3c   :  { %2564 = vmatpush.bf16.msra.mxu2 %v3717_v6  ;;  %v3940_v45 = vld [vmem:[#allocation2 + $0x2e0] sm:$0xf]  ;;  %v5327_v46 = vld [vmem:[#allocation2 + $0x2e4] sm:$0xf0]  ;;  %v4077_v48 = vor.u32 %v5361_v38, %v4076_v37  ;;  %v151_v54 = vld [vmem:[%s6316_s0 + $0x10] sm:$0xff]  ;;  %v3877_v55 = vor.u32 %v5311_v42, %v3876_v41 }
  0x3d   :  { %2578 = vmatpush.bf16.msra.mxu3 %v3781_v10  ;;  %v4004_v47 = vld [vmem:[#allocation2 + $0x360] sm:$0xf]  ;;  %v5343_v49 = vld [vmem:[#allocation2 + $0x364] sm:$0xf0]  ;;  %v3868_v56 = vld [vmem:[#allocation2 + $0x250] sm:$0xf]  ;;  %v3941_v60 = vor.u32 %v5327_v46, %v3940_v45 }
  0x3e   :  { %2537 = vmatpush.bf16.msra.mxu0 %v3581_v16  ;;  %v4068_v50 = vld [vmem:[#allocation2 + $0x3e0] sm:$0xf]  ;;  %v5359_v51 = vld [vmem:[#allocation2 + $0x3e4] sm:$0xf0]  ;;  %v5309_v57 = vld [vmem:[#allocation2 + $0x254] sm:$0xf0]  ;;  %v4005_v61 = vor.u32 %v5343_v49, %v4004_v47 }
  0x3f   :  { %2551 = vmatpush.bf16.msra.mxu1 %v3645_v19  ;;  %v149_v52 = vld [vmem:[%s6316_s0] sm:$0xff]  ;;  %v175_v59 = vld [vmem:[%s6316_s0 + $0xd0] sm:$0xff]  ;;  %v5325_v63 = vld [vmem:[#allocation2 + $0x2d4] sm:$0xf0]  ;;  %v4069_v2 = vor.u32 %v5359_v51, %v4068_v50  ;;  %v3869_v9 = vor.u32 %v5309_v57, %v3868_v56 }
  0x40   :  { %2565 = vmatpush.bf16.msra.mxu2 %v3709_v20  ;;  %v173_v53 = vld [vmem:[%s6316_s0 + $0xc0] sm:$0xff]  ;;  %v3932_v62 = vld [vmem:[#allocation2 + $0x2d0] sm:$0xf]  ;;  %v5975_v1 = vpack.c.bf16 %v175_v59, %v151_v54  ;;  %v5341_v3 = vld [vmem:[#allocation2 + $0x354] sm:$0xf0] }
  0x41   :  { %2579 = vmatpush.bf16.msra.mxu3 %v3773_v24  ;;  %v5970_v58 = vpack.c.bf16 %v173_v53, %v149_v52  ;;  %v3996_v0 = vld [vmem:[#allocation2 + $0x350] sm:$0xf]  ;;  %v5357_v5 = vld [vmem:[#allocation2 + $0x3d4] sm:$0xf0]  ;;  %v150_v6 = vld [vmem:[%s6316_s0 + $0x8] sm:$0xff]  ;;  %v3933_v12 = vor.u32 %v5325_v63, %v3932_v62 }
  0x42   :  { %2538 = vmatpush.bf16.msra.mxu0 %v3573_v31  ;;  %v4060_v4 = vld [vmem:[#allocation2 + $0x3d0] sm:$0xf]  ;;  %v174_v7 = vld [vmem:[%s6316_s0 + $0xc8] sm:$0xff]  ;;  %v152_v8 = vld [vmem:[%s6316_s0 + $0x18] sm:$0xff]  ;;  %v3997_v13 = vor.u32 %v5341_v3, %v3996_v0 }
  0x43   :  { %2552 = vmatpush.bf16.msra.mxu1 %v3637_v35  ;;  %v5988_v10 = vpack.c.bf16 %v174_v7, %v150_v6  ;;  %v176_v11 = vld [vmem:[%s6316_s0 + $0xd8] sm:$0xff]  ;;  %v3860_v14 = vld [vmem:[#allocation2 + $0x240] sm:$0xf]  ;;  %v5307_v15 = vld [vmem:[#allocation2 + $0x244] sm:$0xf0]  ;;  %v4061_v18 = vor.u32 %v5357_v5, %v4060_v4 }
  0x44   :  { %2566 = vmatpush.bf16.msra.mxu2 %v3701_v36  ;;  %v3924_v16 = vld [vmem:[#allocation2 + $0x2c0] sm:$0xf]  ;;  %v5993_v17 = vpack.c.bf16 %v176_v11, %v152_v8  ;;  %v5323_v19 = vld [vmem:[#allocation2 + $0x2c4] sm:$0xf0]  ;;  %v3861_v24 = vor.u32 %v5307_v15, %v3860_v14  ;;  %v3852_v27 = vld [vmem:[#allocation2 + $0x230] sm:$0xf] }
  0x45   :  { %2580 = vmatpush.bf16.msra.mxu3 %v3765_v39  ;;  %2539 = vmatmul.bf16.vlgmr.msra.gmra.mxu0 %v5970_v58  ;;  %v3988_v20 = vld [vmem:[#allocation2 + $0x340] sm:$0xf]  ;;  %v5339_v21 = vld [vmem:[#allocation2 + $0x344] sm:$0xf0]  ;;  %v3925_v25 = vor.u32 %v5323_v19, %v3924_v16  ;;  %v5305_v28 = vld [vmem:[#allocation2 + $0x234] sm:$0xf0] }
  0x46   :  { %2587 = vmatpush.bf16.msrb.mxu0 %v3885_v40  ;;  %2553 = vmatmul.bf16.vlgmr.msra.gmra.mxu1 %v5988_v10  ;;  %v4052_v22 = vld [vmem:[#allocation2 + $0x3c0] sm:$0xf]  ;;  %v5355_v23 = vld [vmem:[#allocation2 + $0x3c4] sm:$0xf0]  ;;  %v3989_v26 = vor.u32 %v5339_v21, %v3988_v20  ;;  %v3916_v29 = vld [vmem:[#allocation2 + $0x2b0] sm:$0xf]  ;;  %v3853_v36 = vor.u32 %v5305_v28, %v3852_v27 }
  0x47   :  { %2601 = vmatpush.bf16.msrb.mxu1 %v3949_v43  ;;  %2567 = vmatmul.bf16.vlgmr.msra.gmra.mxu2 %v5975_v1  ;;  %v4053_v30 = vor.u32 %v5355_v23, %v4052_v22  ;;  %v5321_v31 = vld [vmem:[#allocation2 + $0x2b4] sm:$0xf0]  ;;  %v3980_v32 = vld [vmem:[#allocation2 + $0x330] sm:$0xf]  ;;  %v3844_v39 = vld [vmem:[#allocation2 + $0x220] sm:$0xf] }
  0x48   :  { %2615 = vmatpush.bf16.msrb.mxu2 %v4013_v44  ;;  %2581 = vmatmul.bf16.vlgmr.msra.gmra.mxu3 %v5993_v17  ;;  %v5337_v33 = vld [vmem:[#allocation2 + $0x334] sm:$0xf0]  ;;  %v4044_v34 = vld [vmem:[#allocation2 + $0x3b0] sm:$0xf]  ;;  %v3917_v37 = vor.u32 %v5321_v31, %v3916_v29  ;;  %v5303_v40 = vld [vmem:[#allocation2 + $0x224] sm:$0xf0] }
  0x49   :  { %2629 = vmatpush.bf16.msrb.mxu3 %v4077_v48  ;;  %v5353_v35 = vld [vmem:[#allocation2 + $0x3b4] sm:$0xf0]  ;;  %v3981_v38 = vor.u32 %v5337_v33, %v3980_v32  ;;  %v3908_v41 = vld [vmem:[#allocation2 + $0x2a0] sm:$0xf]  ;;  %v5319_v43 = vld [vmem:[#allocation2 + $0x2a4] sm:$0xf0]  ;;  %v3845_v48 = vor.u32 %v5303_v40, %v3844_v39 }
  0x4a   :  { %2588 = vmatpush.bf16.msrb.mxu0 %v3877_v55  ;;  %v4045_v42 = vor.u32 %v5353_v35, %v4044_v34  ;;  %v3972_v44 = vld [vmem:[#allocation2 + $0x320] sm:$0xf]  ;;  %v5335_v45 = vld [vmem:[#allocation2 + $0x324] sm:$0xf0]  ;;  %v3836_v49 = vld [vmem:[#allocation2 + $0x210] sm:$0xf]  ;;  %v3909_v50 = vor.u32 %v5319_v43, %v3908_v41 }
  0x4b   :  { %2602 = vmatpush.bf16.msrb.mxu1 %v3941_v60  ;;  %v4036_v46 = vld [vmem:[#allocation2 + $0x3a0] sm:$0xf]  ;;  %v5351_v47 = vld [vmem:[#allocation2 + $0x3a4] sm:$0xf0]  ;;  %v3973_v51 = vor.u32 %v5335_v45, %v3972_v44  ;;  %v5301_v52 = vld [vmem:[#allocation2 + $0x214] sm:$0xf0] }
  0x4c   :  { %2616 = vmatpush.bf16.msrb.mxu2 %v4005_v61  ;;  %v3900_v53 = vld [vmem:[#allocation2 + $0x290] sm:$0xf]  ;;  %v5317_v54 = vld [vmem:[#allocation2 + $0x294] sm:$0xf0]  ;;  %v4037_v55 = vor.u32 %v5351_v47, %v4036_v46  ;;  %v3828_v61 = vld [vmem:[#allocation2 + $0x200] sm:$0xf]  ;;  %v3837_v63 = vor.u32 %v5301_v52, %v3836_v49 }
  0x4d   :  { %2630 = vmatpush.bf16.msrb.mxu3 %v4069_v2  ;;  %v3964_v56 = vld [vmem:[#allocation2 + $0x310] sm:$0xf]  ;;  %v5333_v57 = vld [vmem:[#allocation2 + $0x314] sm:$0xf0]  ;;  %v5299_v62 = vld [vmem:[#allocation2 + $0x204] sm:$0xf0]  ;;  %v3901_v5 = vor.u32 %v5317_v54, %v3900_v53 }
  0x4e   :  { %2589 = vmatpush.bf16.msrb.mxu0 %v3869_v9  ;;  %v4028_v59 = vld [vmem:[#allocation2 + $0x390] sm:$0xf]  ;;  %v5349_v60 = vld [vmem:[#allocation2 + $0x394] sm:$0xf0]  ;;  %v3892_v0 = vld [vmem:[#allocation2 + $0x280] sm:$0xf]  ;;  %v3965_v6 = vor.u32 %v5333_v57, %v3964_v56  ;;  %v3829_v19 = vor.u32 %v5299_v62, %v3828_v61 }
  0x4f   :  { %2603 = vmatpush.bf16.msrb.mxu1 %v3933_v12  ;;  %v5315_v2 = vld [vmem:[#allocation2 + $0x284] sm:$0xf0]  ;;  %v3956_v3 = vld [vmem:[#allocation2 + $0x300] sm:$0xf]  ;;  %v4140_v9 = vld [vmem:[#allocation2 + $0x470] sm:$0xf]  ;;  %v4029_v11 = vor.u32 %v5349_v60, %v4028_v59 }
  0x50   :  { %2617 = vmatpush.bf16.msrb.mxu2 %v3997_v13  ;;  %v5331_v4 = vld [vmem:[#allocation2 + $0x304] sm:$0xf0]  ;;  %v4020_v7 = vld [vmem:[#allocation2 + $0x380] sm:$0xf]  ;;  %v5377_v12 = vld [vmem:[#allocation2 + $0x474] sm:$0xf0]  ;;  %v3893_v23 = vor.u32 %v5315_v2, %v3892_v0 }
  0x51   :  { %2631 = vmatpush.bf16.msrb.mxu3 %v4061_v18  ;;  %v5347_v8 = vld [vmem:[#allocation2 + $0x384] sm:$0xf0]  ;;  %v4204_v13 = vld [vmem:[#allocation2 + $0x4f0] sm:$0xf]  ;;  %v5393_v14 = vld [vmem:[#allocation2 + $0x4f4] sm:$0xf0]  ;;  %v4141_v29 = vor.u32 %v5377_v12, %v4140_v9 }
  0x52   :  { %2590 = vmatpush.bf16.msrb.mxu0 %v3861_v24  ;;  %v4268_v15 = vld [vmem:[#allocation2 + $0x570] sm:$0xf]  ;;  %v5409_v16 = vld [vmem:[#allocation2 + $0x574] sm:$0xf0]  ;;  %v153_v21 = vld [vmem:[%s6316_s0 + $0x20] sm:$0xff]  ;;  %v3957_v24 = vor.u32 %v5331_v4, %v3956_v3  ;;  %v4021_v28 = vor.u32 %v5347_v8, %v4020_v7  ;;  %v4205_v33 = vor.u32 %v5393_v14, %v4204_v13 }
  0x53   :  { %2604 = vmatpush.bf16.msrb.mxu1 %v3925_v25  ;;  %v4332_v18 = vld [vmem:[#allocation2 + $0x5f0] sm:$0xf]  ;;  %v5425_v20 = vld [vmem:[#allocation2 + $0x5f4] sm:$0xf0]  ;;  %v177_v22 = vld [vmem:[%s6316_s0 + $0xe0] sm:$0xff]  ;;  %v4269_v34 = vor.u32 %v5409_v16, %v4268_v15 }
  0x54   :  { %2618 = vmatpush.bf16.msrb.mxu2 %v3989_v26  ;;  %v155_v25 = vld [vmem:[%s6316_s0 + $0x30] sm:$0xff]  ;;  %v154_v27 = vld [vmem:[%s6316_s0 + $0x28] sm:$0xff]  ;;  %v156_v31 = vld [vmem:[%s6316_s0 + $0x38] sm:$0xff]  ;;  %v6021_v39 = vpack.c.bf16 %v177_v22, %v153_v21 }
  0x55   :  { %2632 = vmatpush.bf16.msrb.mxu3 %v4053_v30  ;;  %v179_v26 = vld [vmem:[%s6316_s0 + $0xf0] sm:$0xff]  ;;  %v178_v30 = vld [vmem:[%s6316_s0 + $0xe8] sm:$0xff]  ;;  %v180_v32 = vld [vmem:[%s6316_s0 + $0xf8] sm:$0xff] }
  0x56   :  { %2591 = vmatpush.bf16.msrb.mxu0 %v3853_v36  ;;  %v4132_v35 = vld [vmem:[#allocation2 + $0x460] sm:$0xf]  ;;  %v5375_v36 = vld [vmem:[#allocation2 + $0x464] sm:$0xf0]  ;;  %v6023_v43 = vpack.c.bf16 %v179_v26, %v155_v25  ;;  %v6025_v44 = vpack.c.bf16 %v178_v30, %v154_v27  ;;  %v6027_v47 = vpack.c.bf16 %v180_v32, %v156_v31  ;;  %v5373_v52 = vld [vmem:[#allocation2 + $0x454] sm:$0xf0] }
  0x57   :  { %2605 = vmatpush.bf16.msrb.mxu1 %v3917_v37  ;;  %v4196_v37 = vld [vmem:[#allocation2 + $0x4e0] sm:$0xf]  ;;  %v5391_v40 = vld [vmem:[#allocation2 + $0x4e4] sm:$0xf0]  ;;  %v4188_v53 = vld [vmem:[#allocation2 + $0x4d0] sm:$0xf] }
  0x58   :  { %2619 = vmatpush.bf16.msrb.mxu2 %v3981_v38  ;;  %v4333_v38 = vor.u32 %v5425_v20, %v4332_v18  ;;  %v4260_v41 = vld [vmem:[#allocation2 + $0x560] sm:$0xf]  ;;  %v5423_v46 = vld [vmem:[#allocation2 + $0x5e4] sm:$0xf0]  ;;  %v4197_v49 = vor.u32 %v5391_v40, %v4196_v37  ;;  %v4252_v56 = vld [vmem:[#allocation2 + $0x550] sm:$0xf] }
  0x59   :  { %2633 = vmatpush.bf16.msrb.mxu3 %v4045_v42  ;;  %v5407_v42 = vld [vmem:[#allocation2 + $0x564] sm:$0xf0]  ;;  %v4324_v45 = vld [vmem:[#allocation2 + $0x5e0] sm:$0xf]  ;;  %v5405_v57 = vld [vmem:[#allocation2 + $0x554] sm:$0xf0] }
  0x5a   :  { %2592 = vmatpush.bf16.msrb.mxu0 %v3845_v48  ;;  %v4133_v48 = vor.u32 %v5375_v36, %v4132_v35  ;;  %v4325_v54 = vor.u32 %v5423_v46, %v4324_v45  ;;  %v4316_v59 = vld [vmem:[#allocation2 + $0x5d0] sm:$0xf]  ;;  %v5421_v60 = vld [vmem:[#allocation2 + $0x5d4] sm:$0xf0]  ;;  %v4116_v0 = vld [vmem:[#allocation2 + $0x440] sm:$0xf] }
  0x5b   :  { %2606 = vmatpush.bf16.msrb.mxu1 %v3909_v50  ;;  %v4261_v50 = vor.u32 %v5407_v42, %v4260_v41  ;;  %v5371_v2 = vld [vmem:[#allocation2 + $0x444] sm:$0xf0]  ;;  %v4180_v3 = vld [vmem:[#allocation2 + $0x4c0] sm:$0xf]  ;;  %v4317_v4 = vor.u32 %v5421_v60, %v4316_v59  ;;  %v4108_v14 = vld [vmem:[#allocation2 + $0x430] sm:$0xf] }
  0x5c   :  { %2620 = vmatpush.bf16.msrb.mxu2 %v3973_v51  ;;  %v4124_v51 = vld [vmem:[#allocation2 + $0x450] sm:$0xf]  ;;  %v5403_v7 = vld [vmem:[#allocation2 + $0x544] sm:$0xf0]  ;;  %v4308_v8 = vld [vmem:[#allocation2 + $0x5c0] sm:$0xf] }
  0x5d   :  { %2634 = vmatpush.bf16.msrb.mxu3 %v4037_v55  ;;  %v5389_v55 = vld [vmem:[#allocation2 + $0x4d4] sm:$0xf0]  ;;  %v4125_v61 = vor.u32 %v5373_v52, %v4124_v51  ;;  %v5419_v9 = vld [vmem:[#allocation2 + $0x5c4] sm:$0xf0]  ;;  %v4172_v16 = vld [vmem:[#allocation2 + $0x4b0] sm:$0xf] }
  0x5e   :  { %2593 = vmatpush.bf16.msrb.mxu0 %v3837_v63  ;;  %v4189_v62 = vor.u32 %v5389_v55, %v4188_v53  ;;  %v4253_v63 = vor.u32 %v5405_v57, %v4252_v56  ;;  %v5369_v15 = vld [vmem:[#allocation2 + $0x434] sm:$0xf0]  ;;  %v4309_v18 = vor.u32 %v5419_v9, %v4308_v8  ;;  %v4236_v20 = vld [vmem:[#allocation2 + $0x530] sm:$0xf]  ;;  %v4100_v27 = vld [vmem:[#allocation2 + $0x420] sm:$0xf] }
  0x5f   :  { %2607 = vmatpush.bf16.msrb.mxu1 %v3901_v5  ;;  %v5387_v5 = vld [vmem:[#allocation2 + $0x4c4] sm:$0xf0]  ;;  %v5401_v21 = vld [vmem:[#allocation2 + $0x534] sm:$0xf0]  ;;  %v4300_v22 = vld [vmem:[#allocation2 + $0x5b0] sm:$0xf] }
  0x60   :  { %2621 = vmatpush.bf16.msrb.mxu2 %v3965_v6  ;;  %v4244_v6 = vld [vmem:[#allocation2 + $0x540] sm:$0xf]  ;;  %v4181_v12 = vor.u32 %v5387_v5, %v4180_v3  ;;  %v4237_v26 = vor.u32 %v5401_v21, %v4236_v20  ;;  %v5383_v31 = vld [vmem:[#allocation2 + $0x4a4] sm:$0xf0]  ;;  %v4092_v37 = vld [vmem:[#allocation2 + $0x410] sm:$0xf] }
  0x61   :  { %2635 = vmatpush.bf16.msrb.mxu3 %v4029_v11  ;;  %v4117_v11 = vor.u32 %v5371_v2, %v4116_v0  ;;  %v4245_v13 = vor.u32 %v5403_v7, %v4244_v6  ;;  %v4228_v32 = vld [vmem:[#allocation2 + $0x520] sm:$0xf]  ;;  %v5415_v35 = vld [vmem:[#allocation2 + $0x5a4] sm:$0xf0]  ;;  %v5365_v41 = vld [vmem:[#allocation2 + $0x414] sm:$0xf0] }
  0x62   :  { %2594 = vmatpush.bf16.msrb.mxu0 %v3829_v19  ;;  %v5385_v19 = vld [vmem:[#allocation2 + $0x4b4] sm:$0xf0]  ;;  %v4156_v42 = vld [vmem:[#allocation2 + $0x490] sm:$0xf]  ;;  %v4084_v52 = vld [vmem:[#allocation2 + $0x400] sm:$0xf] }
  0x63   :  { %2608 = vmatpush.bf16.msrb.mxu1 %v3893_v23  ;;  %v5417_v23 = vld [vmem:[#allocation2 + $0x5b4] sm:$0xf0]  ;;  %v4173_v25 = vor.u32 %v5385_v19, %v4172_v16  ;;  %v5363_v53 = vld [vmem:[#allocation2 + $0x404] sm:$0xf0]  ;;  %v4148_v55 = vld [vmem:[#allocation2 + $0x480] sm:$0xf] }
  0x64   :  { %2622 = vmatpush.bf16.msrb.mxu2 %v3957_v24  ;;  %v4109_v24 = vor.u32 %v5369_v15, %v4108_v14  ;;  %v4301_v30 = vor.u32 %v5417_v23, %v4300_v22  ;;  %v5381_v45 = vld [vmem:[#allocation2 + $0x494] sm:$0xf0]  ;;  %v5379_v56 = vld [vmem:[#allocation2 + $0x484] sm:$0xf0]  ;;  %v4212_v57 = vld [vmem:[#allocation2 + $0x500] sm:$0xf]  ;;  %v4085_v9 = vor.u32 %v5363_v53, %v4084_v52 }
  0x65   :  { %2636 = vmatpush.bf16.msrb.mxu3 %v4021_v28  ;;  %2595 = vmatmul.bf16.vlgmr.msrb.gmra.mxu0 %v6021_v39  ;;  %v5367_v28 = vld [vmem:[#allocation2 + $0x424] sm:$0xf0]  ;;  %v5413_v51 = vld [vmem:[#allocation2 + $0x594] sm:$0xf0]  ;;  %v4157_v60 = vor.u32 %v5381_v45, %v4156_v42  ;;  %v4396_v0 = vld [vmem:[#allocation2 + $0x670] sm:$0xf]  ;;  %v4149_v14 = vor.u32 %v5379_v56, %v4148_v55 }
  0x66   :  { %2643 = vmatpush.bf16.msra.mxu0 %v4141_v29  ;;  %2609 = vmatmul.bf16.vlgmr.msrb.gmra.mxu1 %v6025_v44  ;;  %v4164_v29 = vld [vmem:[#allocation2 + $0x4a0] sm:$0xf]  ;;  %v4101_v36 = vor.u32 %v5367_v28, %v4100_v27  ;;  %v5395_v59 = vld [vmem:[#allocation2 + $0x504] sm:$0xf0]  ;;  %v5441_v3 = vld [vmem:[#allocation2 + $0x674] sm:$0xf0] }
  0x67   :  { %2657 = vmatpush.bf16.msra.mxu1 %v4205_v33  ;;  %2623 = vmatmul.bf16.vlgmr.msrb.gmra.mxu2 %v6023_v43  ;;  %v5399_v33 = vld [vmem:[#allocation2 + $0x524] sm:$0xf0]  ;;  %v5457_v5 = vld [vmem:[#allocation2 + $0x6f4] sm:$0xf0]  ;;  %v4524_v6 = vld [vmem:[#allocation2 + $0x770] sm:$0xf]  ;;  %v4213_v15 = vor.u32 %v5395_v59, %v4212_v57  ;;  %v4397_v21 = vor.u32 %v5441_v3, %v4396_v0 }
  0x68   :  { %2671 = vmatpush.bf16.msra.mxu2 %v4269_v34  ;;  %2637 = vmatmul.bf16.vlgmr.msrb.gmra.mxu3 %v6027_v47  ;;  %v4292_v34 = vld [vmem:[#allocation2 + $0x5a0] sm:$0xf]  ;;  %v4229_v40 = vor.u32 %v5399_v33, %v4228_v32  ;;  %v5473_v7 = vld [vmem:[#allocation2 + $0x774] sm:$0xf0]  ;;  %v4588_v8 = vld [vmem:[#allocation2 + $0x7f0] sm:$0xf] }
  0x69   :  { %2685 = vmatpush.bf16.msra.mxu3 %v4333_v38  ;;  %v4165_v38 = vor.u32 %v5383_v31, %v4164_v29  ;;  %v4293_v46 = vor.u32 %v5415_v35, %v4292_v34  ;;  %v159_v16 = vld [vmem:[%s6316_s0 + $0x50] sm:$0xff]  ;;  %v158_v19 = vld [vmem:[%s6316_s0 + $0x48] sm:$0xff]  ;;  %v160_v23 = vld [vmem:[%s6316_s0 + $0x58] sm:$0xff] }
  0x6a   :  { %2644 = vmatpush.bf16.msra.mxu0 %v4133_v48  ;;  %v4220_v48 = vld [vmem:[#allocation2 + $0x510] sm:$0xf]  ;;  %v182_v22 = vld [vmem:[%s6316_s0 + $0x108] sm:$0xff]  ;;  %v4388_v27 = vld [vmem:[#allocation2 + $0x660] sm:$0xf] }
  0x6b   :  { %2658 = vmatpush.bf16.msra.mxu1 %v4197_v49  ;;  %v5397_v49 = vld [vmem:[#allocation2 + $0x514] sm:$0xf0]  ;;  %v5439_v28 = vld [vmem:[#allocation2 + $0x664] sm:$0xf0]  ;;  %v4452_v29 = vld [vmem:[#allocation2 + $0x6e0] sm:$0xf] }
  0x6c   :  { %2672 = vmatpush.bf16.msra.mxu2 %v4261_v50  ;;  %v4284_v50 = vld [vmem:[#allocation2 + $0x590] sm:$0xf]  ;;  %v5455_v32 = vld [vmem:[#allocation2 + $0x6e4] sm:$0xf0]  ;;  %v4516_v33 = vld [vmem:[#allocation2 + $0x760] sm:$0xf] }
  0x6d   :  { %2686 = vmatpush.bf16.msra.mxu3 %v4325_v54  ;;  %v4093_v54 = vor.u32 %v5365_v41, %v4092_v37  ;;  %v4285_v2 = vor.u32 %v5413_v51, %v4284_v50  ;;  %v5471_v34 = vld [vmem:[#allocation2 + $0x764] sm:$0xf0]  ;;  %v4580_v37 = vld [vmem:[#allocation2 + $0x7e0] sm:$0xf]  ;;  %v4389_v41 = vor.u32 %v5439_v28, %v4388_v27  ;;  %v4453_v42 = vor.u32 %v5455_v32, %v4452_v29  ;;  %v5453_v51 = vld [vmem:[#allocation2 + $0x6d4] sm:$0xf0] }
  0x6e   :  { %2645 = vmatpush.bf16.msra.mxu0 %v4125_v61  ;;  %v4221_v61 = vor.u32 %v5397_v49, %v4220_v48  ;;  %v4517_v45 = vor.u32 %v5471_v34, %v4516_v33  ;;  %v5437_v48 = vld [vmem:[#allocation2 + $0x654] sm:$0xf0]  ;;  %v4444_v49 = vld [vmem:[#allocation2 + $0x6d0] sm:$0xf]  ;;  %v5451_v0 = vld [vmem:[#allocation2 + $0x6c4] sm:$0xf0] }
  0x6f   :  { %2659 = vmatpush.bf16.msra.mxu1 %v4189_v62  ;;  %v4276_v62 = vld [vmem:[#allocation2 + $0x580] sm:$0xf]  ;;  %v4508_v52 = vld [vmem:[#allocation2 + $0x750] sm:$0xf]  ;;  %v5469_v53 = vld [vmem:[#allocation2 + $0x754] sm:$0xf0]  ;;  %v4445_v57 = vor.u32 %v5453_v51, %v4444_v49 }
  0x70   :  { %2673 = vmatpush.bf16.msra.mxu2 %v4253_v63  ;;  %v5411_v63 = vld [vmem:[#allocation2 + $0x584] sm:$0xf0]  ;;  %v5485_v55 = vld [vmem:[#allocation2 + $0x7d4] sm:$0xf0]  ;;  %v4509_v59 = vor.u32 %v5469_v53, %v4508_v52  ;;  %v4484_v28 = vld [vmem:[#allocation2 + $0x720] sm:$0xf] }
  0x71   :  { %2687 = vmatpush.bf16.msra.mxu3 %v4317_v4  ;;  %v4460_v4 = vld [vmem:[#allocation2 + $0x6f0] sm:$0xf]  ;;  %v4277_v20 = vor.u32 %v5411_v63, %v4276_v62  ;;  %v4436_v62 = vld [vmem:[#allocation2 + $0x6c0] sm:$0xf]  ;;  %v5467_v3 = vld [vmem:[#allocation2 + $0x744] sm:$0xf0] }
  0x72   :  { %2646 = vmatpush.bf16.msra.mxu0 %v4117_v11  ;;  %v5489_v11 = vld [vmem:[#allocation2 + $0x7f4] sm:$0xf0]  ;;  %v5447_v27 = vld [vmem:[#allocation2 + $0x6a4] sm:$0xf0]  ;;  %v4348_v34 = vld [vmem:[#allocation2 + $0x610] sm:$0xf] }
  0x73   :  { %2660 = vmatpush.bf16.msra.mxu1 %v4181_v12  ;;  %v157_v12 = vld [vmem:[%s6316_s0 + $0x40] sm:$0xff]  ;;  %v5463_v29 = vld [vmem:[#allocation2 + $0x724] sm:$0xf0]  ;;  %v5461_v49 = vld [vmem:[#allocation2 + $0x714] sm:$0xf0] }
  0x74   :  { %2674 = vmatpush.bf16.msra.mxu2 %v4245_v13  ;;  %v181_v13 = vld [vmem:[%s6316_s0 + $0x100] sm:$0xff]  ;;  %v5479_v32 = vld [vmem:[#allocation2 + $0x7a4] sm:$0xf0]  ;;  %v5477_v51 = vld [vmem:[#allocation2 + $0x794] sm:$0xf0] }
  0x75   :  { %2688 = vmatpush.bf16.msra.mxu3 %v4309_v18  ;;  %v183_v18 = vld [vmem:[%s6316_s0 + $0x110] sm:$0xff]  ;;  %v6057_v31 = vpack.c.bf16 %v181_v13, %v157_v12  ;;  %v4340_v52 = vld [vmem:[#allocation2 + $0x600] sm:$0xf]  ;;  %v5427_v53 = vld [vmem:[#allocation2 + $0x604] sm:$0xf0] }
  0x76   :  { %2647 = vmatpush.bf16.msra.mxu0 %v4109_v24  ;;  %v184_v24 = vld [vmem:[%s6316_s0 + $0x118] sm:$0xff]  ;;  %v6059_v35 = vpack.c.bf16 %v183_v18, %v159_v16  ;;  %v4428_v12 = vld [vmem:[#allocation2 + $0x6b0] sm:$0xf] }
  0x77   :  { %2661 = vmatpush.bf16.msra.mxu1 %v4173_v25  ;;  %v4461_v25 = vor.u32 %v5457_v5, %v4460_v4  ;;  %v4564_v4 = vld [vmem:[#allocation2 + $0x7c0] sm:$0xf]  ;;  %v5483_v5 = vld [vmem:[#allocation2 + $0x7c4] sm:$0xf0]  ;;  %v5465_v16 = vld [vmem:[#allocation2 + $0x734] sm:$0xf0] }
  0x78   :  { %2675 = vmatpush.bf16.msra.mxu2 %v4237_v26  ;;  %v4525_v26 = vor.u32 %v5473_v7, %v4524_v6  ;;  %v4437_v7 = vor.u32 %v5451_v0, %v4436_v62  ;;  %v4565_v13 = vor.u32 %v5483_v5, %v4564_v4  ;;  %v4556_v18 = vld [vmem:[#allocation2 + $0x7b0] sm:$0xf]  ;;  %v4532_v62 = vld [vmem:[#allocation2 + $0x780] sm:$0xf]  ;;  %v5521_v5 = vld [vmem:[#allocation2 + $0x8f4] sm:$0xf0] }
  0x79   :  { %2689 = vmatpush.bf16.msra.mxu3 %v4301_v30  ;;  %v4589_v30 = vor.u32 %v5489_v11, %v4588_v8  ;;  %v5433_v11 = vld [vmem:[#allocation2 + $0x634] sm:$0xf0]  ;;  %v4652_v0 = vld [vmem:[#allocation2 + $0x870] sm:$0xf] }
  0x7a   :  { %2648 = vmatpush.bf16.msra.mxu0 %v4101_v36  ;;  %v6061_v36 = vpack.c.bf16 %v182_v22, %v158_v19  ;;  %v5481_v19 = vld [vmem:[#allocation2 + $0x7b4] sm:$0xf0]  ;;  %v4716_v4 = vld [vmem:[#allocation2 + $0x8f0] sm:$0xf] }
  0x7b   :  { %2662 = vmatpush.bf16.msra.mxu1 %v4165_v38  ;;  %v5487_v38 = vld [vmem:[#allocation2 + $0x7e4] sm:$0xf0] }
  0x7c   :  { %2676 = vmatpush.bf16.msra.mxu2 %v4229_v40  ;;  %v6063_v40 = vpack.c.bf16 %v184_v24, %v160_v23  ;;  %v4581_v50 = vor.u32 %v5487_v38, %v4580_v37  ;;  %v4356_v23 = vld [vmem:[#allocation2 + $0x620] sm:$0xf]  ;;  %v5431_v24 = vld [vmem:[#allocation2 + $0x624] sm:$0xf0]  ;;  %v5429_v37 = vld [vmem:[#allocation2 + $0x614] sm:$0xf0] }
  0x7d   :  { %2690 = vmatpush.bf16.msra.mxu3 %v4293_v46  ;;  %v4380_v46 = vld [vmem:[#allocation2 + $0x650] sm:$0xf]  ;;  %v4357_v33 = vor.u32 %v5431_v24, %v4356_v23  ;;  %v164_v23 = vld [vmem:[%s6316_s0 + $0x78] sm:$0xff] }
  0x7e   :  { %2649 = vmatpush.bf16.msra.mxu0 %v4093_v54  ;;  %v4572_v54 = vld [vmem:[#allocation2 + $0x7d0] sm:$0xf]  ;;  %v4381_v56 = vor.u32 %v5437_v48, %v4380_v46  ;;  %v188_v24 = vld [vmem:[%s6316_s0 + $0x138] sm:$0xff] }
  0x7f   :  { %2663 = vmatpush.bf16.msra.mxu1 %v4157_v60  ;;  %v4372_v60 = vld [vmem:[#allocation2 + $0x640] sm:$0xf]  ;;  %v4573_v63 = vor.u32 %v5485_v55, %v4572_v54  ;;  %v4476_v46 = vld [vmem:[#allocation2 + $0x710] sm:$0xf]  ;;  %v4349_v54 = vor.u32 %v5429_v37, %v4348_v34  ;;  %v5535_v37 = vld [vmem:[#allocation2 + $0x964] sm:$0xf0] }
  0x80   :  { %2677 = vmatpush.bf16.msra.mxu2 %v4221_v61  ;;  %v5435_v61 = vld [vmem:[#allocation2 + $0x644] sm:$0xf0]  ;;  %v4404_v55 = vld [vmem:[#allocation2 + $0x680] sm:$0xf] }
  0x81   :  { %2691 = vmatpush.bf16.msra.mxu3 %v4285_v2  ;;  %v4500_v2 = vld [vmem:[#allocation2 + $0x740] sm:$0xf]  ;;  %v4373_v6 = vor.u32 %v5435_v61, %v4372_v60  ;;  %v4477_v61 = vor.u32 %v5461_v49, %v4476_v46  ;;  %v6099_v46 = vpack.c.bf16 %v188_v24, %v164_v23  ;;  %v5545_v23 = vld [vmem:[#allocation2 + $0x9b4] sm:$0xf0] }
  0x82   :  { %2650 = vmatpush.bf16.msra.mxu0 %v4085_v9  ;;  %v4501_v8 = vor.u32 %v5467_v3, %v4500_v2  ;;  %v4364_v9 = vld [vmem:[#allocation2 + $0x630] sm:$0xf]  ;;  %v5505_v3 = vld [vmem:[#allocation2 + $0x874] sm:$0xf0]  ;;  %v4772_v34 = vld [vmem:[#allocation2 + $0x960] sm:$0xf] }
  0x83   :  { %2664 = vmatpush.bf16.msra.mxu1 %v4149_v14  ;;  %v5449_v14 = vld [vmem:[#allocation2 + $0x6b4] sm:$0xf0] }
  0x84   :  { %2678 = vmatpush.bf16.msra.mxu2 %v4213_v15  ;;  %v4492_v15 = vld [vmem:[#allocation2 + $0x730] sm:$0xf] }
  0x85   :  { %2692 = vmatpush.bf16.msra.mxu3 %v4277_v20  ;;  %2651 = vmatmul.bf16.vlgmr.msra.gmra.mxu0 %v6057_v31  ;;  %v4365_v20 = vor.u32 %v5433_v11, %v4364_v9  ;;  %v4493_v22 = vor.u32 %v5465_v16, %v4492_v15  ;;  %v4341_v9 = vor.u32 %v5427_v53, %v4340_v52  ;;  %v5553_v11 = vld [vmem:[#allocation2 + $0x9f4] sm:$0xf0]  ;;  %v163_v16 = vld [vmem:[%s6316_s0 + $0x70] sm:$0xff] }
  0x86   :  { %2699 = vmatpush.bf16.msrb.mxu0 %v4397_v21  ;;  %2665 = vmatmul.bf16.vlgmr.msra.gmra.mxu1 %v6061_v36  ;;  %v4429_v21 = vor.u32 %v5449_v14, %v4428_v12  ;;  %v161_v12 = vld [vmem:[%s6316_s0 + $0x60] sm:$0xff]  ;;  %v5501_v52 = vld [vmem:[#allocation2 + $0x854] sm:$0xf0]  ;;  %v4700_v53 = vld [vmem:[#allocation2 + $0x8d0] sm:$0xf] }
  0x87   :  { %2713 = vmatpush.bf16.msrb.mxu1 %v4461_v25  ;;  %2679 = vmatmul.bf16.vlgmr.msra.gmra.mxu2 %v6059_v35  ;;  %v4420_v25 = vld [vmem:[#allocation2 + $0x6a0] sm:$0xf] }
  0x88   :  { %2727 = vmatpush.bf16.msrb.mxu2 %v4525_v26  ;;  %2693 = vmatmul.bf16.vlgmr.msra.gmra.mxu3 %v6063_v40  ;;  %v4557_v26 = vor.u32 %v5481_v19, %v4556_v18  ;;  %v4421_v38 = vor.u32 %v5447_v27, %v4420_v25  ;;  %v187_v18 = vld [vmem:[%s6316_s0 + $0x130] sm:$0xff]  ;;  %v162_v19 = vld [vmem:[%s6316_s0 + $0x68] sm:$0xff]  ;;  %v4717_v25 = vor.u32 %v5521_v5, %v4716_v4  ;;  %v4644_v27 = vld [vmem:[#allocation2 + $0x860] sm:$0xf] }
  0x89   :  { %2741 = vmatpush.bf16.msrb.mxu3 %v4589_v30  ;;  %v4548_v30 = vld [vmem:[#allocation2 + $0x7a0] sm:$0xf]  ;;  %v5515_v5 = vld [vmem:[#allocation2 + $0x8c4] sm:$0xf0] }
  0x8a   :  { %2700 = vmatpush.bf16.msrb.mxu0 %v4389_v41  ;;  %v4485_v41 = vor.u32 %v5463_v29, %v4484_v28  ;;  %v4549_v48 = vor.u32 %v5479_v32, %v4548_v30  ;;  %v5503_v28 = vld [vmem:[#allocation2 + $0x864] sm:$0xf0]  ;;  %v4708_v29 = vld [vmem:[#allocation2 + $0x8e0] sm:$0xf] }
  0x8b   :  { %2714 = vmatpush.bf16.msrb.mxu1 %v4453_v42  ;;  %v4412_v42 = vld [vmem:[#allocation2 + $0x690] sm:$0xf] }
  0x8c   :  { %2728 = vmatpush.bf16.msrb.mxu2 %v4517_v45  ;;  %v5445_v45 = vld [vmem:[#allocation2 + $0x694] sm:$0xf0] }
  0x8d   :  { %2742 = vmatpush.bf16.msrb.mxu3 %v4581_v50  ;;  %v4540_v50 = vld [vmem:[#allocation2 + $0x790] sm:$0xf]  ;;  %v4413_v60 = vor.u32 %v5445_v45, %v4412_v42  ;;  %v4836_v42 = vld [vmem:[#allocation2 + $0x9e0] sm:$0xf]  ;;  %v5551_v45 = vld [vmem:[#allocation2 + $0x9e4] sm:$0xf0] }
  0x8e   :  { %2701 = vmatpush.bf16.msrb.mxu0 %v4381_v56  ;;  %v5443_v56 = vld [vmem:[#allocation2 + $0x684] sm:$0xf0]  ;;  %v4541_v2 = vor.u32 %v5477_v51, %v4540_v50  ;;  %v4773_v50 = vor.u32 %v5535_v37, %v4772_v34  ;;  %v4636_v51 = vld [vmem:[#allocation2 + $0x850] sm:$0xf]  ;;  %v4740_v34 = vld [vmem:[#allocation2 + $0x920] sm:$0xf] }
  0x8f   :  { %2715 = vmatpush.bf16.msrb.mxu1 %v4445_v57  ;;  %v4468_v57 = vld [vmem:[#allocation2 + $0x700] sm:$0xf]  ;;  %v4405_v14 = vor.u32 %v5443_v56, %v4404_v55  ;;  %v5517_v55 = vld [vmem:[#allocation2 + $0x8d4] sm:$0xf0]  ;;  %v4764_v56 = vld [vmem:[#allocation2 + $0x950] sm:$0xf] }
  0x90   :  { %2729 = vmatpush.bf16.msrb.mxu2 %v4509_v59  ;;  %v5459_v59 = vld [vmem:[#allocation2 + $0x704] sm:$0xf0] }
  0x91   :  { %2743 = vmatpush.bf16.msrb.mxu3 %v4573_v63  ;;  %v5475_v63 = vld [vmem:[#allocation2 + $0x784] sm:$0xf0]  ;;  %v4469_v15 = vor.u32 %v5459_v59, %v4468_v57  ;;  %v5533_v57 = vld [vmem:[#allocation2 + $0x954] sm:$0xf0]  ;;  %v4828_v59 = vld [vmem:[#allocation2 + $0x9d0] sm:$0xf] }
  0x92   :  { %2702 = vmatpush.bf16.msrb.mxu0 %v4373_v6  ;;  %v4780_v6 = vld [vmem:[#allocation2 + $0x970] sm:$0xf]  ;;  %v5527_v37 = vld [vmem:[#allocation2 + $0x924] sm:$0xf0] }
  0x93   :  { %2716 = vmatpush.bf16.msrb.mxu1 %v4437_v7  ;;  %v5537_v7 = vld [vmem:[#allocation2 + $0x974] sm:$0xf0] }
  0x94   :  { %2730 = vmatpush.bf16.msrb.mxu2 %v4501_v8  ;;  %v4844_v8 = vld [vmem:[#allocation2 + $0x9f0] sm:$0xf] }
  0x95   :  { %2744 = vmatpush.bf16.msrb.mxu3 %v4565_v13  ;;  %v185_v13 = vld [vmem:[%s6316_s0 + $0x120] sm:$0xff]  ;;  %v4845_v30 = vor.u32 %v5553_v11, %v4844_v8 }
  0x96   :  { %2703 = vmatpush.bf16.msrb.mxu0 %v4365_v20  ;;  %v4533_v20 = vor.u32 %v5475_v63, %v4532_v62  ;;  %v6093_v32 = vpack.c.bf16 %v185_v13, %v161_v12  ;;  %v4701_v62 = vor.u32 %v5517_v55, %v4700_v53  ;;  %v4765_v63 = vor.u32 %v5533_v57, %v4764_v56  ;;  %v4820_v8 = vld [vmem:[#allocation2 + $0x9c0] sm:$0xf]  ;;  %v4668_v53 = vld [vmem:[#allocation2 + $0x890] sm:$0xf]  ;;  %v5525_v57 = vld [vmem:[#allocation2 + $0x914] sm:$0xf0] }
  0x97   :  { %2717 = vmatpush.bf16.msrb.mxu1 %v4429_v21  ;;  %v4653_v21 = vor.u32 %v5505_v3, %v4652_v0  ;;  %v4628_v0 = vld [vmem:[#allocation2 + $0x840] sm:$0xf]  ;;  %v4732_v56 = vld [vmem:[#allocation2 + $0x910] sm:$0xf] }
  0x98   :  { %2731 = vmatpush.bf16.msrb.mxu2 %v4493_v22  ;;  %v186_v22 = vld [vmem:[%s6316_s0 + $0x128] sm:$0xff]  ;;  %v4692_v3 = vld [vmem:[#allocation2 + $0x8c0] sm:$0xf] }
  0x99   :  { %2745 = vmatpush.bf16.msrb.mxu3 %v4557_v26  ;;  %v4781_v26 = vor.u32 %v5537_v7, %v4780_v6  ;;  %v4756_v6 = vld [vmem:[#allocation2 + $0x940] sm:$0xf]  ;;  %v5531_v7 = vld [vmem:[#allocation2 + $0x944] sm:$0xf0]  ;;  %v4693_v12 = vor.u32 %v5515_v5, %v4692_v3 }
  0x9a   :  { %2704 = vmatpush.bf16.msrb.mxu0 %v4357_v33  ;;  %v5519_v33 = vld [vmem:[#allocation2 + $0x8e4] sm:$0xf0]  ;;  %v4757_v13 = vor.u32 %v5531_v7, %v4756_v6  ;;  %v4724_v3 = vld [vmem:[#allocation2 + $0x900] sm:$0xf]  ;;  %v4733_v6 = vor.u32 %v5525_v57, %v4732_v56 }
  0x9b   :  { %2718 = vmatpush.bf16.msrb.mxu1 %v4421_v38  ;;  %v6095_v38 = vpack.c.bf16 %v187_v18, %v163_v16  ;;  %v4709_v49 = vor.u32 %v5519_v33, %v4708_v29  ;;  %v4684_v16 = vld [vmem:[#allocation2 + $0x8b0] sm:$0xf]  ;;  %v4676_v29 = vld [vmem:[#allocation2 + $0x8a0] sm:$0xf]  ;;  %v5511_v33 = vld [vmem:[#allocation2 + $0x8a4] sm:$0xf0] }
  0x9c   :  { %2732 = vmatpush.bf16.msrb.mxu2 %v4485_v41  ;;  %v6097_v41 = vpack.c.bf16 %v186_v22, %v162_v19  ;;  %v5513_v19 = vld [vmem:[#allocation2 + $0x8b4] sm:$0xf0]  ;;  %v4812_v22 = vld [vmem:[#allocation2 + $0x9b0] sm:$0xf]  ;;  %v4788_v7 = vld [vmem:[#allocation2 + $0x980] sm:$0xf] }
  0x9d   :  { %2746 = vmatpush.bf16.msrb.mxu3 %v4549_v48  ;;  %v4645_v48 = vor.u32 %v5503_v28, %v4644_v27  ;;  %v4612_v27 = vld [vmem:[#allocation2 + $0x820] sm:$0xf]  ;;  %v5495_v28 = vld [vmem:[#allocation2 + $0x824] sm:$0xf0] }
  0x9e   :  { %2705 = vmatpush.bf16.msrb.mxu0 %v4349_v54  ;;  %v4837_v54 = vor.u32 %v5551_v45, %v4836_v42  ;;  %v4804_v42 = vld [vmem:[#allocation2 + $0x9a0] sm:$0xf]  ;;  %v5543_v45 = vld [vmem:[#allocation2 + $0x9a4] sm:$0xf0] }
  0x9f   :  { %2719 = vmatpush.bf16.msrb.mxu1 %v4413_v60  ;;  %v5549_v60 = vld [vmem:[#allocation2 + $0x9d4] sm:$0xf0]  ;;  %v4805_v55 = vor.u32 %v5543_v45, %v4804_v42  ;;  %v4900_v45 = vld [vmem:[#allocation2 + $0xa60] sm:$0xf] }
  0xa0   :  { %2733 = vmatpush.bf16.msrb.mxu2 %v4477_v61  ;;  %v4637_v61 = vor.u32 %v5501_v52, %v4636_v51  ;;  %v4829_v4 = vor.u32 %v5549_v60, %v4828_v59  ;;  %v4741_v51 = vor.u32 %v5527_v37, %v4740_v34  ;;  %v5493_v52 = vld [vmem:[#allocation2 + $0x814] sm:$0xf0]  ;;  %v4796_v59 = vld [vmem:[#allocation2 + $0x990] sm:$0xf]  ;;  %v5092_v57 = vld [vmem:[#allocation2 + $0xbe0] sm:$0xf] }
  0xa1   :  { %2747 = vmatpush.bf16.msrb.mxu3 %v4541_v2  ;;  %v5499_v2 = vld [vmem:[#allocation2 + $0x844] sm:$0xf0]  ;;  %v5541_v60 = vld [vmem:[#allocation2 + $0x994] sm:$0xf0] }
  0xa2   :  { %2706 = vmatpush.bf16.msrb.mxu0 %v4341_v9  ;;  %v5547_v9 = vld [vmem:[#allocation2 + $0x9c4] sm:$0xf0]  ;;  %v4629_v11 = vor.u32 %v5499_v2, %v4628_v0  ;;  %v4660_v0 = vld [vmem:[#allocation2 + $0x880] sm:$0xf]  ;;  %v192_v34 = vld [vmem:[%s6316_s0 + $0x158] sm:$0xff] }
  0xa3   :  { %2720 = vmatpush.bf16.msrb.mxu1 %v4405_v14  ;;  %v4620_v14 = vld [vmem:[#allocation2 + $0x830] sm:$0xf]  ;;  %v4821_v18 = vor.u32 %v5547_v9, %v4820_v8  ;;  %v5507_v2 = vld [vmem:[#allocation2 + $0x884] sm:$0xf0] }
  0xa4   :  { %2734 = vmatpush.bf16.msrb.mxu2 %v4469_v15  ;;  %v5497_v15 = vld [vmem:[#allocation2 + $0x834] sm:$0xf0]  ;;  %v5539_v8 = vld [vmem:[#allocation2 + $0x984] sm:$0xf0]  ;;  %v4908_v9 = vld [vmem:[#allocation2 + $0xa70] sm:$0xf] }
  0xa5   :  { %2748 = vmatpush.bf16.msrb.mxu3 %v4533_v20  ;;  %2707 = vmatmul.bf16.vlgmr.msrb.gmra.mxu0 %v6093_v32  ;;  %v4748_v20 = vld [vmem:[#allocation2 + $0x930] sm:$0xf]  ;;  %v4621_v24 = vor.u32 %v5497_v15, %v4620_v14  ;;  %v5585_v14 = vld [vmem:[#allocation2 + $0xaf4] sm:$0xf0] }
  0xa6   :  { %2755 = vmatpush.bf16.msra.mxu0 %v4653_v21  ;;  %2721 = vmatmul.bf16.vlgmr.msrb.gmra.mxu1 %v6097_v41  ;;  %v5529_v21 = vld [vmem:[#allocation2 + $0x934] sm:$0xf0]  ;;  %v5036_v15 = vld [vmem:[#allocation2 + $0xb70] sm:$0xf] }
  0xa7   :  { %2769 = vmatpush.bf16.msra.mxu1 %v4717_v25  ;;  %2735 = vmatmul.bf16.vlgmr.msrb.gmra.mxu2 %v6095_v38  ;;  %v4685_v25 = vor.u32 %v5513_v19, %v4684_v16  ;;  %v5601_v16 = vld [vmem:[#allocation2 + $0xb74] sm:$0xf0] }
  0xa8   :  { %2783 = vmatpush.bf16.msra.mxu2 %v4781_v26  ;;  %2749 = vmatmul.bf16.vlgmr.msrb.gmra.mxu3 %v6099_v46  ;;  %v4749_v26 = vor.u32 %v5529_v21, %v4748_v20  ;;  %v5617_v20 = vld [vmem:[#allocation2 + $0xbf4] sm:$0xf0]  ;;  %v165_v21 = vld [vmem:[%s6316_s0 + $0x80] sm:$0xff]  ;;  %v5037_v42 = vor.u32 %v5601_v16, %v5036_v15  ;;  %v5563_v15 = vld [vmem:[#allocation2 + $0xa44] sm:$0xf0] }
  0xa9   :  { %2797 = vmatpush.bf16.msra.mxu3 %v4845_v30  ;;  %v4813_v30 = vor.u32 %v5545_v23, %v4812_v22  ;;  %v189_v22 = vld [vmem:[%s6316_s0 + $0x140] sm:$0xff]  ;;  %v4661_v23 = vor.u32 %v5507_v2, %v4660_v0  ;;  %v4892_v0 = vld [vmem:[#allocation2 + $0xa50] sm:$0xf]  ;;  %v5565_v2 = vld [vmem:[#allocation2 + $0xa54] sm:$0xf0] }
  0xaa   :  { %2756 = vmatpush.bf16.msra.mxu0 %v4645_v48  ;;  %v4613_v48 = vor.u32 %v5495_v28, %v4612_v27  ;;  %v166_v27 = vld [vmem:[%s6316_s0 + $0x88] sm:$0xff]  ;;  %v4789_v28 = vor.u32 %v5539_v8, %v4788_v7  ;;  %v5597_v7 = vld [vmem:[#allocation2 + $0xb54] sm:$0xf0]  ;;  %v5084_v8 = vld [vmem:[#allocation2 + $0xbd0] sm:$0xf] }
  0xab   :  { %2770 = vmatpush.bf16.msra.mxu1 %v4709_v49  ;;  %v4604_v49 = vld [vmem:[#allocation2 + $0x810] sm:$0xf]  ;;  %v4948_v16 = vld [vmem:[#allocation2 + $0xac0] sm:$0xf] }
  0xac   :  { %2784 = vmatpush.bf16.msra.mxu2 %v4773_v50  ;;  %v4677_v50 = vor.u32 %v5511_v33, %v4676_v29  ;;  %v168_v33 = vld [vmem:[%s6316_s0 + $0x98] sm:$0xff] }
  0xad   :  { %2798 = vmatpush.bf16.msra.mxu3 %v4837_v54  ;;  %v5509_v54 = vld [vmem:[#allocation2 + $0x894] sm:$0xf0] }
  0xae   :  { %2757 = vmatpush.bf16.msra.mxu0 %v4637_v61  ;;  %v4596_v61 = vld [vmem:[#allocation2 + $0x800] sm:$0xf]  ;;  %v4669_v5 = vor.u32 %v5509_v54, %v4668_v53  ;;  %v5599_v54 = vld [vmem:[#allocation2 + $0xb64] sm:$0xf0] }
  0xaf   :  { %2771 = vmatpush.bf16.msra.mxu1 %v4701_v62  ;;  %v5491_v62 = vld [vmem:[#allocation2 + $0x804] sm:$0xf0]  ;;  %v5028_v53 = vld [vmem:[#allocation2 + $0xb60] sm:$0xf] }
  0xb0   :  { %2785 = vmatpush.bf16.msra.mxu2 %v4765_v63  ;;  %v4605_v63 = vor.u32 %v5493_v52, %v4604_v49  ;;  %v4597_v19 = vor.u32 %v5491_v62, %v4596_v61  ;;  %v4964_v49 = vld [vmem:[#allocation2 + $0xae0] sm:$0xf]  ;;  %v5583_v52 = vld [vmem:[#allocation2 + $0xae4] sm:$0xf0] }
  0xb1   :  { %2799 = vmatpush.bf16.msra.mxu3 %v4829_v4  ;;  %v5523_v4 = vld [vmem:[#allocation2 + $0x904] sm:$0xf0]  ;;  %v4965_v62 = vor.u32 %v5583_v52, %v4964_v49  ;;  %v4868_v52 = vld [vmem:[#allocation2 + $0xa20] sm:$0xf] }
  0xb2   :  { %2758 = vmatpush.bf16.msra.mxu0 %v4629_v11  ;;  %v4797_v11 = vor.u32 %v5541_v60, %v4796_v59  ;;  %v5615_v59 = vld [vmem:[#allocation2 + $0xbe4] sm:$0xf0]  ;;  %v6135_v60 = vpack.c.bf16 %v192_v34, %v168_v33  ;;  %v5577_v33 = vld [vmem:[#allocation2 + $0xab4] sm:$0xf0]  ;;  %v5004_v34 = vld [vmem:[#allocation2 + $0xb30] sm:$0xf] }
  0xb3   :  { %2772 = vmatpush.bf16.msra.mxu1 %v4693_v12  ;;  %v5569_v12 = vld [vmem:[#allocation2 + $0xa74] sm:$0xf0] }
  0xb4   :  { %2786 = vmatpush.bf16.msra.mxu2 %v4757_v13  ;;  %v4972_v13 = vld [vmem:[#allocation2 + $0xaf0] sm:$0xf]  ;;  %v4909_v29 = vor.u32 %v5569_v12, %v4908_v9  ;;  %v5613_v9 = vld [vmem:[#allocation2 + $0xbd4] sm:$0xf0] }
  0xb5   :  { %2800 = vmatpush.bf16.msra.mxu3 %v4821_v18  ;;  %v5100_v18 = vld [vmem:[#allocation2 + $0xbf0] sm:$0xf]  ;;  %v4973_v37 = vor.u32 %v5585_v14, %v4972_v13  ;;  %v4884_v14 = vld [vmem:[#allocation2 + $0xa40] sm:$0xf] }
  0xb6   :  { %2759 = vmatpush.bf16.msra.mxu0 %v4621_v24  ;;  %v4725_v24 = vor.u32 %v5523_v4, %v4724_v3  ;;  %v4956_v3 = vld [vmem:[#allocation2 + $0xad0] sm:$0xf]  ;;  %v5093_v4 = vor.u32 %v5615_v59, %v5092_v57  ;;  %v5575_v59 = vld [vmem:[#allocation2 + $0xaa4] sm:$0xf0] }
  0xb7   :  { %2773 = vmatpush.bf16.msra.mxu1 %v4685_v25  ;;  %v167_v25 = vld [vmem:[%s6316_s0 + $0x90] sm:$0xff] }
  0xb8   :  { %2787 = vmatpush.bf16.msra.mxu2 %v4749_v26  ;;  %v191_v26 = vld [vmem:[%s6316_s0 + $0x150] sm:$0xff] }
  0xb9   :  { %2801 = vmatpush.bf16.msra.mxu3 %v4813_v30  ;;  %v190_v30 = vld [vmem:[%s6316_s0 + $0x148] sm:$0xff] }
  0xba   :  { %2760 = vmatpush.bf16.msra.mxu0 %v4613_v48  ;;  %v5567_v48 = vld [vmem:[#allocation2 + $0xa64] sm:$0xf0]  ;;  %v6133_v56 = vpack.c.bf16 %v190_v30, %v166_v27  ;;  %v4876_v27 = vld [vmem:[#allocation2 + $0xa30] sm:$0xf] }
  0xbb   :  { %2774 = vmatpush.bf16.msra.mxu1 %v4677_v50  ;;  %v5101_v50 = vor.u32 %v5617_v20, %v5100_v18  ;;  %v4901_v61 = vor.u32 %v5567_v48, %v4900_v45  ;;  %v5085_v18 = vor.u32 %v5613_v9, %v5084_v8  ;;  %v5012_v20 = vld [vmem:[#allocation2 + $0xb40] sm:$0xf]  ;;  %v5609_v45 = vld [vmem:[#allocation2 + $0xbb4] sm:$0xf0] }
  0xbc   :  { %2788 = vmatpush.bf16.msra.mxu2 %v4741_v51  ;;  %v6129_v51 = vpack.c.bf16 %v189_v22, %v165_v21  ;;  %v5595_v21 = vld [vmem:[#allocation2 + $0xb44] sm:$0xf0]  ;;  %v5076_v22 = vld [vmem:[#allocation2 + $0xbc0] sm:$0xf]  ;;  %v5573_v8 = vld [vmem:[#allocation2 + $0xa94] sm:$0xf0] }
  0xbd   :  { %2802 = vmatpush.bf16.msra.mxu3 %v4805_v55  ;;  %v6131_v55 = vpack.c.bf16 %v191_v26, %v167_v25  ;;  %v5013_v26 = vor.u32 %v5595_v21, %v5012_v20  ;;  %v5571_v20 = vld [vmem:[#allocation2 + $0xa84] sm:$0xf0]  ;;  %v4980_v21 = vld [vmem:[#allocation2 + $0xb00] sm:$0xf] }
  0xbe   :  { %2761 = vmatpush.bf16.msra.mxu0 %v4605_v63  ;;  %v5029_v63 = vor.u32 %v5599_v54, %v5028_v53  ;;  %v5559_v53 = vld [vmem:[#allocation2 + $0xa24] sm:$0xf0]  ;;  %v4932_v54 = vld [vmem:[#allocation2 + $0xaa0] sm:$0xf] }
  0xbf   :  { %2775 = vmatpush.bf16.msra.mxu1 %v4669_v5  ;;  %v5581_v5 = vld [vmem:[#allocation2 + $0xad4] sm:$0xf0] }
  0xc0   :  { %2789 = vmatpush.bf16.msra.mxu2 %v4733_v6  ;;  %v5020_v6 = vld [vmem:[#allocation2 + $0xb50] sm:$0xf]  ;;  %v4957_v12 = vor.u32 %v5581_v5, %v4956_v3 }
  0xc1   :  { %2803 = vmatpush.bf16.msra.mxu3 %v4797_v11  ;;  %v4893_v11 = vor.u32 %v5565_v2, %v4892_v0  ;;  %v5021_v13 = vor.u32 %v5597_v7, %v5020_v6  ;;  %v5607_v0 = vld [vmem:[#allocation2 + $0xba4] sm:$0xf0]  ;;  %v4869_v2 = vor.u32 %v5559_v53, %v4868_v52  ;;  %v4860_v3 = vld [vmem:[#allocation2 + $0xa10] sm:$0xf]  ;;  %v5557_v6 = vld [vmem:[#allocation2 + $0xa14] sm:$0xf0] }
  0xc2   :  { %2762 = vmatpush.bf16.msra.mxu0 %v4597_v19  ;;  %v5579_v19 = vld [vmem:[#allocation2 + $0xac4] sm:$0xf0]  ;;  %v4924_v7 = vld [vmem:[#allocation2 + $0xa90] sm:$0xf] }
  0xc3   :  { %2776 = vmatpush.bf16.msra.mxu1 %v4661_v23  ;;  %v5611_v23 = vld [vmem:[#allocation2 + $0xbc4] sm:$0xf0]  ;;  %v4949_v25 = vor.u32 %v5579_v19, %v4948_v16  ;;  %v4916_v19 = vld [vmem:[#allocation2 + $0xa80] sm:$0xf] }
  0xc4   :  { %2790 = vmatpush.bf16.msra.mxu2 %v4725_v24  ;;  %v4885_v24 = vor.u32 %v5563_v15, %v4884_v14  ;;  %v5077_v30 = vor.u32 %v5611_v23, %v5076_v22  ;;  %v5605_v14 = vld [vmem:[#allocation2 + $0xb94] sm:$0xf0]  ;;  %v4852_v15 = vld [vmem:[#allocation2 + $0xa00] sm:$0xf]  ;;  %v5555_v16 = vld [vmem:[#allocation2 + $0xa04] sm:$0xf0]  ;;  %v4925_v23 = vor.u32 %v5573_v8, %v4924_v7  ;;  %v4917_v52 = vor.u32 %v5571_v20, %v4916_v19 }
  0xc5   :  { %2804 = vmatpush.bf16.msra.mxu3 %v4789_v28  ;;  %2763 = vmatmul.bf16.vlgmr.msra.gmra.mxu0 %v6129_v51  ;;  %v5561_v28 = vld [vmem:[#allocation2 + $0xa34] sm:$0xf0]  ;;  %v5587_v22 = vld [vmem:[#allocation2 + $0xb04] sm:$0xf0]  ;;  %v5262_v7 = vld [vmem:[#allocation2 + $0xe4] sm:$0xf] }
  0xc6   :  { %2811 = vmatpush.bf16.msrb.mxu0 %v4909_v29  ;;  %2777 = vmatmul.bf16.vlgmr.msra.gmra.mxu1 %v6133_v56  ;;  %v4940_v29 = vld [vmem:[#allocation2 + $0xab0] sm:$0xf]  ;;  %v4877_v48 = vor.u32 %v5561_v28, %v4876_v27  ;;  %v5248_v27 = vld [vmem:[#allocation2 + $0x74] sm:$0xf]  ;;  %v4981_v53 = vor.u32 %v5587_v22, %v4980_v21 }
  0xc7   :  { %2825 = vmatpush.bf16.msrb.mxu1 %v4973_v37  ;;  %2791 = vmatmul.bf16.vlgmr.msra.gmra.mxu2 %v6131_v55  ;;  %v5593_v37 = vld [vmem:[#allocation2 + $0xb34] sm:$0xf0]  ;;  %v4941_v49 = vor.u32 %v5577_v33, %v4940_v29  ;;  %v3630_v29 = vld [vmem:[#allocation2 + $0x78] sm:$0xf0] }
  0xc8   :  { %2839 = vmatpush.bf16.msrb.mxu2 %v5037_v42  ;;  %2805 = vmatmul.bf16.vlgmr.msra.gmra.mxu3 %v6135_v60  ;;  %v5068_v42 = vld [vmem:[#allocation2 + $0xbb0] sm:$0xf]  ;;  %v3694_v33 = vld [vmem:[#allocation2 + $0xf8] sm:$0xf0] }
  0xc9   :  { %2853 = vmatpush.bf16.msrb.mxu3 %v5101_v50  ;;  %v5005_v50 = vor.u32 %v5593_v37, %v5004_v34  ;;  %v5069_v57 = vor.u32 %v5609_v45, %v5068_v42  ;;  %v5280_v34 = vld [vmem:[#allocation2 + $0x174] sm:$0xf]  ;;  %v3758_v37 = vld [vmem:[#allocation2 + $0x178] sm:$0xf0]  ;;  %v4853_v45 = vor.u32 %v5555_v16, %v4852_v15  ;;  %v5294_v16 = vld [vmem:[#allocation2 + $0x1e4] sm:$0xf] }
  0xca   :  { %2812 = vmatpush.bf16.msrb.mxu0 %v4901_v61  ;;  %v4996_v61 = vld [vmem:[#allocation2 + $0xb20] sm:$0xf]  ;;  %v5296_v42 = vld [vmem:[#allocation2 + $0x1f4] sm:$0xf] }
  0xcb   :  { %2826 = vmatpush.bf16.msrb.mxu1 %v4965_v62  ;;  %v5591_v62 = vld [vmem:[#allocation2 + $0xb24] sm:$0xf0] }
  0xcc   :  { %2840 = vmatpush.bf16.msrb.mxu2 %v5029_v63  ;;  %v5060_v63 = vld [vmem:[#allocation2 + $0xba0] sm:$0xf]  ;;  %v4997_v5 = vor.u32 %v5591_v62, %v4996_v61  ;;  %v3633_v62 = vor.u32 %v5248_v27, %v3630_v29  ;;  %v3678_v27 = vld [vmem:[#allocation2 + $0xd8] sm:$0xf0] }
  0xcd   :  { %2854 = vmatpush.bf16.msrb.mxu3 %v5093_v4  ;;  %v4933_v4 = vor.u32 %v5575_v59, %v4932_v54  ;;  %v5061_v9 = vor.u32 %v5607_v0, %v5060_v63  ;;  %v171_v54 = vld [vmem:[%s6316_s0 + $0xb0] sm:$0xff]  ;;  %v170_v59 = vld [vmem:[%s6316_s0 + $0xa8] sm:$0xff]  ;;  %v172_v0 = vld [vmem:[%s6316_s0 + $0xb8] sm:$0xff] }
  0xce   :  { %2813 = vmatpush.bf16.msrb.mxu0 %v4893_v11  ;;  %v4988_v11 = vld [vmem:[#allocation2 + $0xb10] sm:$0xf]  ;;  %v194_v63 = vld [vmem:[%s6316_s0 + $0x168] sm:$0xff]  ;;  %v3742_v29 = vld [vmem:[#allocation2 + $0x158] sm:$0xf0] }
  0xcf   :  { %2827 = vmatpush.bf16.msrb.mxu1 %v4957_v12  ;;  %v5589_v12 = vld [vmem:[#allocation2 + $0xb14] sm:$0xf0]  ;;  %v6169_v15 = vpack.c.bf16 %v194_v63, %v170_v59  ;;  %v3798_v59 = vld [vmem:[#allocation2 + $0x1c8] sm:$0xf0] }
  0xd0   :  { %2841 = vmatpush.bf16.msrb.mxu2 %v5021_v13  ;;  %v5052_v13 = vld [vmem:[#allocation2 + $0xb90] sm:$0xf] }
  0xd1   :  { %2855 = vmatpush.bf16.msrb.mxu3 %v5085_v18  ;;  %v4861_v18 = vor.u32 %v5557_v6, %v4860_v3  ;;  %v5053_v28 = vor.u32 %v5605_v14, %v5052_v13  ;;  %v3622_v6 = vld [vmem:[#allocation2 + $0x68] sm:$0xf0] }
  0xd2   :  { %2814 = vmatpush.bf16.msrb.mxu0 %v4885_v24  ;;  %v4989_v24 = vor.u32 %v5589_v12, %v4988_v11  ;;  %v3686_v11 = vld [vmem:[#allocation2 + $0xe8] sm:$0xf0]  ;;  %v5278_v12 = vld [vmem:[#allocation2 + $0x164] sm:$0xf] }
  0xd3   :  { %2828 = vmatpush.bf16.msrb.mxu1 %v4949_v25  ;;  %v5044_v25 = vld [vmem:[#allocation2 + $0xb80] sm:$0xf]  ;;  %v3750_v13 = vld [vmem:[#allocation2 + $0x168] sm:$0xf0]  ;;  %v3689_v21 = vor.u32 %v5262_v7, %v3686_v11  ;;  %v3726_v7 = vld [vmem:[#allocation2 + $0x138] sm:$0xf0] }
  0xd4   :  { %2842 = vmatpush.bf16.msrb.mxu2 %v5013_v26  ;;  %v5603_v26 = vld [vmem:[#allocation2 + $0xb84] sm:$0xf0]  ;;  %v3753_v22 = vor.u32 %v5278_v12, %v3750_v13  ;;  %v3790_v11 = vld [vmem:[#allocation2 + $0x1b8] sm:$0xf0] }
  0xd5   :  { %2856 = vmatpush.bf16.msrb.mxu3 %v5077_v30  ;;  %v5264_v30 = vld [vmem:[#allocation2 + $0xf4] sm:$0xf]  ;;  %v5045_v61 = vor.u32 %v5603_v26, %v5044_v25 }
  0xd6   :  { %2815 = vmatpush.bf16.msrb.mxu0 %v4877_v48  ;;  %v3822_v48 = vld [vmem:[#allocation2 + $0x1f8] sm:$0xf0]  ;;  %v3697_v3 = vor.u32 %v5264_v30, %v3694_v33  ;;  %v5260_v25 = vld [vmem:[#allocation2 + $0xd4] sm:$0xf] }
  0xd7   :  { %2829 = vmatpush.bf16.msrb.mxu1 %v4941_v49  ;;  %v169_v49 = vld [vmem:[%s6316_s0 + $0xa0] sm:$0xff]  ;;  %v3825_v8 = vor.u32 %v5296_v42, %v3822_v48  ;;  %v5292_v30 = vld [vmem:[#allocation2 + $0x1d4] sm:$0xf]  ;;  %v3806_v33 = vld [vmem:[#allocation2 + $0x1d8] sm:$0xf0] }
  0xd8   :  { %2843 = vmatpush.bf16.msrb.mxu2 %v5005_v50  ;;  %v193_v50 = vld [vmem:[%s6316_s0 + $0x160] sm:$0xff]  ;;  %v3606_v48 = vld [vmem:[#allocation2 + $0x48] sm:$0xf0] }
  0xd9   :  { %2857 = vmatpush.bf16.msrb.mxu3 %v5069_v57  ;;  %v195_v57 = vld [vmem:[%s6316_s0 + $0x170] sm:$0xff] }
  0xda   :  { %2816 = vmatpush.bf16.msrb.mxu0 %v4869_v2  ;;  %v196_v2 = vld [vmem:[%s6316_s0 + $0x178] sm:$0xff]  ;;  %v6167_v14 = vpack.c.bf16 %v195_v57, %v171_v54  ;;  %v3734_v54 = vld [vmem:[#allocation2 + $0x148] sm:$0xf0]  ;;  %v5290_v57 = vld [vmem:[#allocation2 + $0x1c4] sm:$0xf] }
  0xdb   :  { %2830 = vmatpush.bf16.msrb.mxu1 %v4933_v4  ;;  %v3761_v4 = vor.u32 %v5280_v34, %v3758_v37  ;;  %v6171_v19 = vpack.c.bf16 %v196_v2, %v172_v0  ;;  %v3681_v37 = vor.u32 %v5260_v25, %v3678_v27  ;;  %v5240_v0 = vld [vmem:[#allocation2 + $0x34] sm:$0xf]  ;;  %v3598_v2 = vld [vmem:[#allocation2 + $0x38] sm:$0xf0]  ;;  %v3718_v25 = vld [vmem:[#allocation2 + $0x128] sm:$0xf0] }
  0xdc   :  { %2844 = vmatpush.bf16.msrb.mxu2 %v4997_v5  ;;  %v5246_v5 = vld [vmem:[#allocation2 + $0x64] sm:$0xf]  ;;  %v3601_v12 = vor.u32 %v5240_v0, %v3598_v2  ;;  %v3782_v27 = vld [vmem:[#allocation2 + $0x1a8] sm:$0xf0] }
  0xdd   :  { %2858 = vmatpush.bf16.msrb.mxu3 %v5061_v9  ;;  %v6165_v9 = vpack.c.bf16 %v193_v50, %v169_v49  ;;  %v3625_v20 = vor.u32 %v5246_v5, %v3622_v6  ;;  %v5258_v49 = vld [vmem:[#allocation2 + $0xc4] sm:$0xf]  ;;  %v3809_v50 = vor.u32 %v5292_v30, %v3806_v33  ;;  %v3662_v5 = vld [vmem:[#allocation2 + $0xb8] sm:$0xf0]  ;;  %v5272_v6 = vld [vmem:[#allocation2 + $0x134] sm:$0xf] }
  0xde   :  { %2817 = vmatpush.bf16.msrb.mxu0 %v4861_v18  ;;  %v3814_v18 = vld [vmem:[#allocation2 + $0x1e8] sm:$0xf0]  ;;  %v5236_v33 = vld [vmem:[#allocation2 + $0x14] sm:$0xf]  ;;  %v5266_v0 = vld [vmem:[#allocation2 + $0x104] sm:$0xf] }
  0xdf   :  { %2831 = vmatpush.bf16.msrb.mxu1 %v4925_v23  ;;  %v5244_v23 = vld [vmem:[#allocation2 + $0x54] sm:$0xf]  ;;  %v3817_v26 = vor.u32 %v5294_v16, %v3814_v18  ;;  %v3729_v16 = vor.u32 %v5272_v6, %v3726_v7  ;;  %v5238_v18 = vld [vmem:[#allocation2 + $0x24] sm:$0xf]  ;;  %v3886_v7 = vld [vmem:[#allocation2 + $0x278] sm:$0xf0] }
  0xe0   :  { %2845 = vmatpush.bf16.msrb.mxu2 %v4989_v24  ;;  %v3614_v24 = vld [vmem:[#allocation2 + $0x58] sm:$0xf0]  ;;  %v5312_v6 = vld [vmem:[#allocation2 + $0x274] sm:$0xf] }
  0xe1   :  { %2859 = vmatpush.bf16.msrb.mxu3 %v5053_v28  ;;  %v5276_v28 = vld [vmem:[#allocation2 + $0x154] sm:$0xf]  ;;  %v3617_v34 = vor.u32 %v5244_v23, %v3614_v24  ;;  %v3654_v23 = vld [vmem:[#allocation2 + $0xa8] sm:$0xf0]  ;;  %v5270_v24 = vld [vmem:[#allocation2 + $0x124] sm:$0xf] }
  0xe2   :  { %2818 = vmatpush.bf16.msrb.mxu0 %v4853_v45  ;;  %v3745_v42 = vor.u32 %v5276_v28, %v3742_v29  ;;  %v5242_v45 = vld [vmem:[#allocation2 + $0x44] sm:$0xf]  ;;  %v3721_v30 = vor.u32 %v5270_v24, %v3718_v25  ;;  %v3889_v24 = vor.u32 %v5312_v6, %v3886_v7  ;;  %v3862_v6 = vld [vmem:[#allocation2 + $0x248] sm:$0xf0] }
  0xe3   :  { %2832 = vmatpush.bf16.msrb.mxu1 %v4917_v52  ;;  %v3670_v52 = vld [vmem:[#allocation2 + $0xc8] sm:$0xf0]  ;;  %v5322_v7 = vld [vmem:[#allocation2 + $0x2c4] sm:$0xf] }
  0xe4   :  { %2846 = vmatpush.bf16.msrb.mxu2 %v4981_v53  ;;  %v5274_v53 = vld [vmem:[#allocation2 + $0x144] sm:$0xf] }
  0xe5   :  { %2860 = vmatpush.bf16.msrb.mxu3 %v5045_v61  ;;  %2819 = vmatmul.bf16.vlgmr.msrb.gmra.mxu0 %v6165_v9  ;;  %v3609_v61 = vor.u32 %v5242_v45, %v3606_v48  ;;  %v3737_v63 = vor.u32 %v5274_v53, %v3734_v54  ;;  %v3646_v45 = vld [vmem:[#allocation2 + $0x98] sm:$0xf0]  ;;  %v5268_v48 = vld [vmem:[#allocation2 + $0x114] sm:$0xf]  ;;  %v5234_v54 = vld [vmem:[#allocation2 + $0x4] sm:$0xf] }
  0xe6   :  { %2867 = vmatpush.bf16.msra.mxu0 %v3633_v62  ;;  %2833 = vmatmul.bf16.vlgmr.msrb.gmra.mxu1 %v6169_v15  ;;  %v3673_v62 = vor.u32 %v5258_v49, %v3670_v52  ;;  %v3710_v49 = vld [vmem:[#allocation2 + $0x118] sm:$0xf0] }
  0xe7   :  { %2881 = vmatpush.bf16.msra.mxu1 %v3697_v3  ;;  %2847 = vmatmul.bf16.vlgmr.msrb.gmra.mxu2 %v6167_v14  ;;  %v5256_v3 = vld [vmem:[#allocation2 + $0xb4] sm:$0xf]  ;;  %v3774_v52 = vld [vmem:[#allocation2 + $0x198] sm:$0xf0] }
  0xe8   :  { %2895 = vmatpush.bf16.msra.mxu2 %v3761_v4  ;;  %2861 = vmatmul.bf16.vlgmr.msrb.gmra.mxu3 %v6171_v19  ;;  %v3801_v4 = vor.u32 %v5290_v57, %v3798_v59  ;;  %v3665_v13 = vor.u32 %v5256_v3, %v3662_v5  ;;  %v3574_v57 = vld [vmem:[#allocation2 + $0x8] sm:$0xf0] }
  0xe9   :  { %2909 = vmatpush.bf16.msra.mxu3 %v3825_v8  ;;  %v5288_v8 = vld [vmem:[#allocation2 + $0x1b4] sm:$0xf]  ;;  %v3702_v3 = vld [vmem:[#allocation2 + $0x108] sm:$0xf0] }
  0xea   :  { %2868 = vmatpush.bf16.msra.mxu0 %v3625_v20  ;;  %v3590_v20 = vld [vmem:[#allocation2 + $0x28] sm:$0xf0] }
  0xeb   :  { %2882 = vmatpush.bf16.msra.mxu1 %v3689_v21  ;;  %v5254_v21 = vld [vmem:[#allocation2 + $0xa4] sm:$0xf]  ;;  %v3593_v28 = vor.u32 %v5238_v18, %v3590_v20  ;;  %v3766_v5 = vld [vmem:[#allocation2 + $0x188] sm:$0xf0]  ;;  %v3705_v20 = vor.u32 %v5266_v0, %v3702_v3  ;;  %v4062_v0 = vld [vmem:[#allocation2 + $0x3d8] sm:$0xf0] }
  0xec   :  { %2896 = vmatpush.bf16.msra.mxu2 %v3753_v22  ;;  %v3793_v22 = vor.u32 %v5288_v8, %v3790_v11  ;;  %v3657_v29 = vor.u32 %v5254_v21, %v3654_v23  ;;  %v5328_v8 = vld [vmem:[#allocation2 + $0x2f4] sm:$0xf]  ;;  %v3577_v11 = vor.u32 %v5234_v54, %v3574_v57 }
  0xed   :  { %2910 = vmatpush.bf16.msra.mxu3 %v3817_v26  ;;  %v5286_v26 = vld [vmem:[#allocation2 + $0x1a4] sm:$0xf]  ;;  %v5360_v21 = vld [vmem:[#allocation2 + $0x3f4] sm:$0xf] }
  0xee   :  { %2869 = vmatpush.bf16.msra.mxu0 %v3617_v34  ;;  %v3582_v34 = vld [vmem:[#allocation2 + $0x18] sm:$0xf0]  ;;  %v5324_v54 = vld [vmem:[#allocation2 + $0x2d4] sm:$0xf] }
  0xef   :  { %2883 = vmatpush.bf16.msra.mxu1 %v3681_v37  ;;  %v5252_v37 = vld [vmem:[#allocation2 + $0x94] sm:$0xf]  ;;  %v3585_v53 = vor.u32 %v5236_v33, %v3582_v34  ;;  %v3942_v33 = vld [vmem:[#allocation2 + $0x2e8] sm:$0xf0]  ;;  %v5342_v34 = vld [vmem:[#allocation2 + $0x364] sm:$0xf] }
  0xf0   :  { %2897 = vmatpush.bf16.msra.mxu2 %v3745_v42  ;;  %v3785_v42 = vor.u32 %v5286_v26, %v3782_v27  ;;  %v3649_v59 = vor.u32 %v5252_v37, %v3646_v45  ;;  %v5310_v27 = vld [vmem:[#allocation2 + $0x264] sm:$0xf]  ;;  %v4006_v37 = vld [vmem:[#allocation2 + $0x368] sm:$0xf0] }
  0xf1   :  { %2911 = vmatpush.bf16.msra.mxu3 %v3809_v50  ;;  %v5284_v50 = vld [vmem:[#allocation2 + $0x194] sm:$0xf]  ;;  %v4070_v45 = vld [vmem:[#allocation2 + $0x3e8] sm:$0xf0] }
  0xf2   :  { %2870 = vmatpush.bf16.msra.mxu0 %v3609_v61  ;;  %v3713_v61 = vor.u32 %v5268_v48, %v3710_v49  ;;  %v3777_v2 = vor.u32 %v5284_v50, %v3774_v52  ;;  %v4009_v50 = vor.u32 %v5342_v34, %v4006_v37  ;;  %v5308_v52 = vld [vmem:[#allocation2 + $0x254] sm:$0xf]  ;;  %v3846_v34 = vld [vmem:[#allocation2 + $0x228] sm:$0xf0]  ;;  %v5318_v37 = vld [vmem:[#allocation2 + $0x2a4] sm:$0xf] }
  0xf3   :  { %2884 = vmatpush.bf16.msra.mxu1 %v3673_v62  ;;  %v5250_v62 = vld [vmem:[#allocation2 + $0x84] sm:$0xf] }
  0xf4   :  { %2898 = vmatpush.bf16.msra.mxu2 %v3737_v63  ;;  %v3638_v63 = vld [vmem:[#allocation2 + $0x88] sm:$0xf0] }
  0xf5   :  { %2912 = vmatpush.bf16.msra.mxu3 %v3801_v4  ;;  %v5282_v4 = vld [vmem:[#allocation2 + $0x184] sm:$0xf]  ;;  %v3641_v18 = vor.u32 %v5250_v62, %v3638_v63  ;;  %v3998_v62 = vld [vmem:[#allocation2 + $0x358] sm:$0xf0]  ;;  %v5356_v63 = vld [vmem:[#allocation2 + $0x3d4] sm:$0xf] }
  0xf6   :  { %2871 = vmatpush.bf16.msra.mxu0 %v3601_v12  ;;  %v3950_v12 = vld [vmem:[#allocation2 + $0x2f8] sm:$0xf0]  ;;  %v3769_v23 = vor.u32 %v5282_v4, %v3766_v5  ;;  %v5306_v5 = vld [vmem:[#allocation2 + $0x244] sm:$0xf] }
  0xf7   :  { %2885 = vmatpush.bf16.msra.mxu1 %v3665_v13  ;;  %v5344_v13 = vld [vmem:[#allocation2 + $0x374] sm:$0xf]  ;;  %v3953_v25 = vor.u32 %v5328_v8, %v3950_v12  ;;  %v4065_v8 = vor.u32 %v5356_v63, %v4062_v0  ;;  %v3990_v12 = vld [vmem:[#allocation2 + $0x348] sm:$0xf0]  ;;  %v3902_v0 = vld [vmem:[#allocation2 + $0x298] sm:$0xf0] }
  0xf8   :  { %2899 = vmatpush.bf16.msra.mxu2 %v3729_v16  ;;  %v4014_v16 = vld [vmem:[#allocation2 + $0x378] sm:$0xf0] }
  0xf9   :  { %2913 = vmatpush.bf16.msra.mxu3 %v3793_v22  ;;  %v4078_v22 = vld [vmem:[#allocation2 + $0x3f8] sm:$0xf0]  ;;  %v4017_v26 = vor.u32 %v5344_v13, %v4014_v16  ;;  %v5354_v13 = vld [vmem:[#allocation2 + $0x3c4] sm:$0xf] }
  0xfa   :  { %2872 = vmatpush.bf16.msra.mxu0 %v3593_v28  ;;  %v3878_v28 = vld [vmem:[#allocation2 + $0x268] sm:$0xf0] }
  0xfb   :  { %2886 = vmatpush.bf16.msra.mxu1 %v3657_v29  ;;  %v5326_v29 = vld [vmem:[#allocation2 + $0x2e4] sm:$0xf]  ;;  %v3881_v48 = vor.u32 %v5310_v27, %v3878_v28  ;;  %v4046_v27 = vld [vmem:[#allocation2 + $0x3b8] sm:$0xf0] }
  0xfc   :  { %2900 = vmatpush.bf16.msra.mxu2 %v3721_v30  ;;  %v4081_v30 = vor.u32 %v5360_v21, %v4078_v22  ;;  %v3945_v49 = vor.u32 %v5326_v29, %v3942_v33  ;;  %v5320_v21 = vld [vmem:[#allocation2 + $0x2b4] sm:$0xf]  ;;  %v5302_v33 = vld [vmem:[#allocation2 + $0x224] sm:$0xf] }
  0xfd   :  { %2914 = vmatpush.bf16.msra.mxu3 %v3785_v42  ;;  %v5358_v42 = vld [vmem:[#allocation2 + $0x3e4] sm:$0xf] }
  0xfe   :  { %2873 = vmatpush.bf16.msra.mxu0 %v3585_v53  ;;  %v3870_v53 = vld [vmem:[#allocation2 + $0x258] sm:$0xf0]  ;;  %v4073_v57 = vor.u32 %v5358_v42, %v4070_v45  ;;  %v3910_v45 = vld [vmem:[#allocation2 + $0x2a8] sm:$0xf0] }
  0xff   :  { %2887 = vmatpush.bf16.msra.mxu1 %v3649_v59  ;;  %v3934_v59 = vld [vmem:[#allocation2 + $0x2d8] sm:$0xf0] }
 0x100   :  { %2901 = vmatpush.bf16.msra.mxu2 %v3713_v61  ;;  %v5340_v61 = vld [vmem:[#allocation2 + $0x354] sm:$0xf]  ;;  %v3937_v3 = vor.u32 %v5324_v54, %v3934_v59  ;;  %v3913_v54 = vor.u32 %v5318_v37, %v3910_v45  ;;  %v5374_v45 = vld [vmem:[#allocation2 + $0x464] sm:$0xf] }
 0x101   :  { %2915 = vmatpush.bf16.msra.mxu3 %v3777_v2  ;;  %v3873_v2 = vor.u32 %v5308_v52, %v3870_v53  ;;  %v4001_v4 = vor.u32 %v5340_v61, %v3998_v62  ;;  %v4038_v52 = vld [vmem:[#allocation2 + $0x3a8] sm:$0xf0]  ;;  %v3849_v53 = vor.u32 %v5302_v33, %v3846_v34  ;;  %v5300_v59 = vld [vmem:[#allocation2 + $0x214] sm:$0xf]  ;;  %v3838_v61 = vld [vmem:[#allocation2 + $0x218] sm:$0xf0] }
 0x102   :  { %2874 = vmatpush.bf16.msra.mxu0 %v3577_v11  ;;  %v5338_v11 = vld [vmem:[#allocation2 + $0x344] sm:$0xf]  ;;  %v5316_v62 = vld [vmem:[#allocation2 + $0x294] sm:$0xf] }
 0x103   :  { %2888 = vmatpush.bf16.msra.mxu1 %v3641_v18  ;;  %v5304_v18 = vld [vmem:[#allocation2 + $0x234] sm:$0xf] }
 0x104   :  { %2902 = vmatpush.bf16.msra.mxu2 %v3705_v20  ;;  %v3854_v20 = vld [vmem:[#allocation2 + $0x238] sm:$0xf0] }
 0x105   :  { %2916 = vmatpush.bf16.msra.mxu3 %v3769_v23  ;;  %2875 = vmatmul.bf16.vlgmr.msra.gmra.mxu0 %v5970_v58  ;;  %v3926_v58 = vld [vmem:[#allocation2 + $0x2c8] sm:$0xf0]  ;;  %v3918_v23 = vld [vmem:[#allocation2 + $0x2b8] sm:$0xf0]  ;;  %v3857_v28 = vor.u32 %v5304_v18, %v3854_v20  ;;  %v5376_v20 = vld [vmem:[#allocation2 + $0x474] sm:$0xf] }
 0x106   :  { %2923 = vmatpush.bf16.msrb.mxu0 %v3889_v24  ;;  %2889 = vmatmul.bf16.vlgmr.msra.gmra.mxu1 %v5988_v10  ;;  %v3865_v10 = vor.u32 %v5306_v5, %v3862_v6  ;;  %v3929_v16 = vor.u32 %v5322_v7, %v3926_v58  ;;  %v5336_v24 = vld [vmem:[#allocation2 + $0x334] sm:$0xf]  ;;  %v3921_v29 = vor.u32 %v5320_v21, %v3918_v23  ;;  %v4030_v5 = vld [vmem:[#allocation2 + $0x398] sm:$0xf0]  ;;  %v5298_v7 = vld [vmem:[#allocation2 + $0x204] sm:$0xf] }
 0x107   :  { %2937 = vmatpush.bf16.msrb.mxu1 %v3953_v25  ;;  %2903 = vmatmul.bf16.vlgmr.msra.gmra.mxu2 %v5975_v1  ;;  %v4054_v1 = vld [vmem:[#allocation2 + $0x3c8] sm:$0xf0]  ;;  %v3982_v25 = vld [vmem:[#allocation2 + $0x338] sm:$0xf0]  ;;  %v3841_v6 = vor.u32 %v5300_v59, %v3838_v61  ;;  %v3905_v58 = vor.u32 %v5316_v62, %v3902_v0  ;;  %v5372_v0 = vld [vmem:[#allocation2 + $0x454] sm:$0xf] }
 0x108   :  { %2951 = vmatpush.bf16.msrb.mxu2 %v4017_v26  ;;  %2917 = vmatmul.bf16.vlgmr.msra.gmra.mxu3 %v5993_v17  ;;  %v3993_v17 = vor.u32 %v5338_v11, %v3990_v12  ;;  %v4057_v22 = vor.u32 %v5354_v13, %v4054_v1  ;;  %v5352_v26 = vld [vmem:[#allocation2 + $0x3b4] sm:$0xf]  ;;  %v5314_v12 = vld [vmem:[#allocation2 + $0x284] sm:$0xf]  ;;  %v3894_v13 = vld [vmem:[#allocation2 + $0x288] sm:$0xf0] }
 0x109   :  { %2965 = vmatpush.bf16.msrb.mxu3 %v4081_v30  ;;  %v3985_v30 = vor.u32 %v5336_v24, %v3982_v25  ;;  %v4049_v42 = vor.u32 %v5352_v26, %v4046_v27  ;;  %v5330_v1 = vld [vmem:[#allocation2 + $0x304] sm:$0xf]  ;;  %v4022_v18 = vld [vmem:[#allocation2 + $0x388] sm:$0xf0]  ;;  %v4142_v21 = vld [vmem:[#allocation2 + $0x478] sm:$0xf0]  ;;  %v3897_v27 = vor.u32 %v5314_v12, %v3894_v13 }
 0x10a   :  { %2924 = vmatpush.bf16.msrb.mxu0 %v3881_v48  ;;  %v5334_v48 = vld [vmem:[#allocation2 + $0x324] sm:$0xf]  ;;  %v4206_v24 = vld [vmem:[#allocation2 + $0x4f8] sm:$0xf0]  ;;  %v5408_v25 = vld [vmem:[#allocation2 + $0x574] sm:$0xf]  ;;  %v4145_v34 = vor.u32 %v5376_v20, %v4142_v21 }
 0x10b   :  { %2938 = vmatpush.bf16.msrb.mxu1 %v3945_v49  ;;  %v3974_v49 = vld [vmem:[#allocation2 + $0x328] sm:$0xf0]  ;;  %v4270_v26 = vld [vmem:[#allocation2 + $0x578] sm:$0xf0]  ;;  %v5418_v20 = vld [vmem:[#allocation2 + $0x5c4] sm:$0xf] }
 0x10c   :  { %2952 = vmatpush.bf16.msrb.mxu2 %v4009_v50  ;;  %v5350_v50 = vld [vmem:[#allocation2 + $0x3a4] sm:$0xf]  ;;  %v4326_v59 = vld [vmem:[#allocation2 + $0x5e8] sm:$0xf0] }
 0x10d   :  { %2966 = vmatpush.bf16.msrb.mxu3 %v4073_v57  ;;  %v3977_v57 = vor.u32 %v5334_v48, %v3974_v49  ;;  %v4041_v63 = vor.u32 %v5350_v50, %v4038_v52  ;;  %v4134_v48 = vld [vmem:[#allocation2 + $0x468] sm:$0xf0]  ;;  %v5390_v49 = vld [vmem:[#allocation2 + $0x4e4] sm:$0xf] }
 0x10e   :  { %2925 = vmatpush.bf16.msrb.mxu0 %v3873_v2  ;;  %v5332_v2 = vld [vmem:[#allocation2 + $0x314] sm:$0xf]  ;;  %v4198_v52 = vld [vmem:[#allocation2 + $0x4e8] sm:$0xf0]  ;;  %v4137_v61 = vor.u32 %v5374_v45, %v4134_v48  ;;  %v5366_v45 = vld [vmem:[#allocation2 + $0x424] sm:$0xf] }
 0x10f   :  { %2939 = vmatpush.bf16.msrb.mxu1 %v3937_v3  ;;  %v3966_v3 = vld [vmem:[#allocation2 + $0x318] sm:$0xf0]  ;;  %v4201_v62 = vor.u32 %v5390_v49, %v4198_v52  ;;  %v4102_v48 = vld [vmem:[#allocation2 + $0x428] sm:$0xf0]  ;;  %v5382_v49 = vld [vmem:[#allocation2 + $0x4a4] sm:$0xf] }
 0x110   :  { %2953 = vmatpush.bf16.msrb.mxu2 %v4001_v4  ;;  %v5348_v4 = vld [vmem:[#allocation2 + $0x394] sm:$0xf]  ;;  %v3969_v11 = vor.u32 %v5332_v2, %v3966_v3  ;;  %v4126_v2 = vld [vmem:[#allocation2 + $0x458] sm:$0xf0]  ;;  %v4166_v52 = vld [vmem:[#allocation2 + $0x4a8] sm:$0xf0] }
 0x111   :  { %2967 = vmatpush.bf16.msrb.mxu3 %v4065_v8  ;;  %v3830_v8 = vld [vmem:[#allocation2 + $0x208] sm:$0xf0]  ;;  %v5388_v3 = vld [vmem:[#allocation2 + $0x4d4] sm:$0xf] }
 0x112   :  { %2926 = vmatpush.bf16.msrb.mxu0 %v3865_v10  ;;  %v4033_v10 = vor.u32 %v5348_v4, %v4030_v5  ;;  %v3833_v23 = vor.u32 %v5298_v7, %v3830_v8  ;;  %v4190_v5 = vld [vmem:[#allocation2 + $0x4d8] sm:$0xf0]  ;;  %v5420_v8 = vld [vmem:[#allocation2 + $0x5d4] sm:$0xf] }
 0x113   :  { %2940 = vmatpush.bf16.msrb.mxu1 %v3929_v16  ;;  %v3958_v16 = vld [vmem:[#allocation2 + $0x308] sm:$0xf0]  ;;  %v4254_v7 = vld [vmem:[#allocation2 + $0x558] sm:$0xf0]  ;;  %v4193_v12 = vor.u32 %v5388_v3, %v4190_v5  ;;  %v5380_v3 = vld [vmem:[#allocation2 + $0x494] sm:$0xf] }
 0x114   :  { %2954 = vmatpush.bf16.msrb.mxu2 %v3993_v17  ;;  %v5346_v17 = vld [vmem:[#allocation2 + $0x384] sm:$0xf]  ;;  %v4158_v5 = vld [vmem:[#allocation2 + $0x498] sm:$0xf0] }
 0x115   :  { %2968 = vmatpush.bf16.msrb.mxu3 %v4057_v22  ;;  %v5392_v22 = vld [vmem:[#allocation2 + $0x4f4] sm:$0xf]  ;;  %v4025_v33 = vor.u32 %v5346_v17, %v4022_v18  ;;  %v4182_v17 = vld [vmem:[#allocation2 + $0x4c8] sm:$0xf0]  ;;  %v5402_v18 = vld [vmem:[#allocation2 + $0x544] sm:$0xf] }
 0x116   :  { %2927 = vmatpush.bf16.msrb.mxu0 %v3857_v28  ;;  %v3961_v28 = vor.u32 %v5330_v1, %v3958_v16  ;;  %v4209_v37 = vor.u32 %v5392_v22, %v4206_v24  ;;  %v5370_v1 = vld [vmem:[#allocation2 + $0x444] sm:$0xf]  ;;  %v4110_v24 = vld [vmem:[#allocation2 + $0x438] sm:$0xf0] }
 0x117   :  { %2941 = vmatpush.bf16.msrb.mxu1 %v3921_v29  ;;  %v5424_v29 = vld [vmem:[#allocation2 + $0x5f4] sm:$0xf] }
 0x118   :  { %2955 = vmatpush.bf16.msrb.mxu2 %v3985_v30  ;;  %v4334_v30 = vld [vmem:[#allocation2 + $0x5f8] sm:$0xf0] }
 0x119   :  { %2969 = vmatpush.bf16.msrb.mxu3 %v4049_v42  ;;  %v4273_v42 = vor.u32 %v5408_v25, %v4270_v26  ;;  %v4337_v50 = vor.u32 %v5424_v29, %v4334_v30  ;;  %v5384_v25 = vld [vmem:[#allocation2 + $0x4b4] sm:$0xf]  ;;  %v4238_v29 = vld [vmem:[#allocation2 + $0x538] sm:$0xf0] }
 0x11a   :  { %2928 = vmatpush.bf16.msrb.mxu0 %v3849_v53  ;;  %v5406_v53 = vld [vmem:[#allocation2 + $0x564] sm:$0xf]  ;;  %v5416_v30 = vld [vmem:[#allocation2 + $0x5b4] sm:$0xf] }
 0x11b   :  { %2942 = vmatpush.bf16.msrb.mxu1 %v3913_v54  ;;  %v4262_v54 = vld [vmem:[#allocation2 + $0x568] sm:$0xf0] }
 0x11c   :  { %2956 = vmatpush.bf16.msrb.mxu2 %v3977_v57  ;;  %v5422_v57 = vld [vmem:[#allocation2 + $0x5e4] sm:$0xf] }
 0x11d   :  { %2970 = vmatpush.bf16.msrb.mxu3 %v4041_v63  ;;  %v4265_v63 = vor.u32 %v5406_v53, %v4262_v54  ;;  %v4329_v4 = vor.u32 %v5422_v57, %v4326_v59  ;;  %v5398_v53 = vld [vmem:[#allocation2 + $0x524] sm:$0xf]  ;;  %v4230_v54 = vld [vmem:[#allocation2 + $0x528] sm:$0xf0] }
 0x11e   :  { %2929 = vmatpush.bf16.msrb.mxu0 %v3841_v6  ;;  %v5404_v6 = vld [vmem:[#allocation2 + $0x554] sm:$0xf]  ;;  %v5414_v57 = vld [vmem:[#allocation2 + $0x5a4] sm:$0xf]  ;;  %v4294_v59 = vld [vmem:[#allocation2 + $0x5a8] sm:$0xf0] }
 0x11f   :  { %2943 = vmatpush.bf16.msrb.mxu1 %v3905_v58  ;;  %v4318_v58 = vld [vmem:[#allocation2 + $0x5d8] sm:$0xf0]  ;;  %v4257_v13 = vor.u32 %v5404_v6, %v4254_v7  ;;  %v5396_v6 = vld [vmem:[#allocation2 + $0x514] sm:$0xf] }
 0x120   :  { %2957 = vmatpush.bf16.msrb.mxu2 %v3969_v11  ;;  %v4129_v11 = vor.u32 %v5372_v0, %v4126_v2  ;;  %v4321_v16 = vor.u32 %v5420_v8, %v4318_v58  ;;  %v5364_v0 = vld [vmem:[#allocation2 + $0x414] sm:$0xf]  ;;  %v4094_v2 = vld [vmem:[#allocation2 + $0x418] sm:$0xf0] }
 0x121   :  { %2971 = vmatpush.bf16.msrb.mxu3 %v4033_v10  ;;  %v5386_v10 = vld [vmem:[#allocation2 + $0x4c4] sm:$0xf]  ;;  %v4222_v7 = vld [vmem:[#allocation2 + $0x518] sm:$0xf0]  ;;  %v5412_v8 = vld [vmem:[#allocation2 + $0x594] sm:$0xf] }
 0x122   :  { %2930 = vmatpush.bf16.msrb.mxu0 %v3833_v23  ;;  %v5368_v23 = vld [vmem:[#allocation2 + $0x434] sm:$0xf]  ;;  %v4286_v58 = vld [vmem:[#allocation2 + $0x598] sm:$0xf0] }
 0x123   :  { %2944 = vmatpush.bf16.msrb.mxu1 %v3897_v27  ;;  %v4174_v27 = vld [vmem:[#allocation2 + $0x4b8] sm:$0xf0] }
 0x124   :  { %2958 = vmatpush.bf16.msrb.mxu2 %v3961_v28  ;;  %v5400_v28 = vld [vmem:[#allocation2 + $0x534] sm:$0xf] }
 0x125   :  { %2972 = vmatpush.bf16.msrb.mxu3 %v4025_v33  ;;  %2931 = vmatmul.bf16.vlgmr.msrb.gmra.mxu0 %v6021_v39  ;;  %v4118_v39 = vld [vmem:[#allocation2 + $0x448] sm:$0xf0]  ;;  %v4302_v33 = vld [vmem:[#allocation2 + $0x5b8] sm:$0xf0] }
 0x126   :  { %2979 = vmatpush.bf16.msra.mxu0 %v4145_v34  ;;  %2945 = vmatmul.bf16.vlgmr.msrb.gmra.mxu1 %v6025_v44  ;;  %v4310_v44 = vld [vmem:[#allocation2 + $0x5c8] sm:$0xf0]  ;;  %v4121_v21 = vor.u32 %v5370_v1, %v4118_v39  ;;  %v4113_v34 = vor.u32 %v5368_v23, %v4110_v24  ;;  %v4161_v1 = vor.u32 %v5380_v3, %v4158_v5  ;;  %v4462_v24 = vld [vmem:[#allocation2 + $0x6f8] sm:$0xf0]  ;;  %v5436_v3 = vld [vmem:[#allocation2 + $0x654] sm:$0xf] }
 0x127   :  { %2993 = vmatpush.bf16.msra.mxu1 %v4209_v37  ;;  %2959 = vmatmul.bf16.vlgmr.msrb.gmra.mxu2 %v6023_v43  ;;  %v4246_v43 = vld [vmem:[#allocation2 + $0x548] sm:$0xf0]  ;;  %v4313_v26 = vor.u32 %v5418_v20, %v4310_v44  ;;  %v4177_v37 = vor.u32 %v5384_v25, %v4174_v27  ;;  %v4225_v39 = vor.u32 %v5396_v6, %v4222_v7  ;;  %v5410_v20 = vld [vmem:[#allocation2 + $0x584] sm:$0xf]  ;;  %v5472_v25 = vld [vmem:[#allocation2 + $0x774] sm:$0xf]  ;;  %v6189_v6 = vpop.f32.mrf.mxu2 }
 0x128   :  { %3007 = vmatpush.bf16.msra.mxu2 %v4273_v42  ;;  %2973 = vmatmul.bf16.vlgmr.msrb.gmra.mxu3 %v6027_v47  ;;  %v4185_v47 = vor.u32 %v5386_v10, %v4182_v17  ;;  %v4249_v22 = vor.u32 %v5402_v18, %v4246_v43  ;;  %v4241_v42 = vor.u32 %v5400_v28, %v4238_v29  ;;  %v5378_v10 = vld [vmem:[#allocation2 + $0x484] sm:$0xf]  ;;  %v4214_v43 = vld [vmem:[#allocation2 + $0x508] sm:$0xf0]  ;;  %v5488_v29 = vld [vmem:[#allocation2 + $0x7f4] sm:$0xf] }
 0x129   :  { %3021 = vmatpush.bf16.msra.mxu3 %v4337_v50  ;;  %v4305_v50 = vor.u32 %v5416_v30, %v4302_v33  ;;  %v5394_v17 = vld [vmem:[#allocation2 + $0x504] sm:$0xf]  ;;  %v4289_v18 = vor.u32 %v5412_v8, %v4286_v58  ;;  %v4278_v44 = vld [vmem:[#allocation2 + $0x588] sm:$0xf0]  ;;  %v4590_v30 = vld [vmem:[#allocation2 + $0x7f8] sm:$0xf0]  ;;  %v6185_v33 = vpop.f32.mrf.mxu0 }
 0x12a   :  { %2980 = vmatpush.bf16.msra.mxu0 %v4137_v61  ;;  %v4105_v61 = vor.u32 %v5366_v45, %v4102_v48  ;;  %v4217_v28 = vor.u32 %v5394_v17, %v4214_v43  ;;  %v5438_v48 = vld [vmem:[#allocation2 + $0x664] sm:$0xf]  ;;  %v5452_v5 = vld [vmem:[#allocation2 + $0x6d4] sm:$0xf]  ;;  %v4446_v8 = vld [vmem:[#allocation2 + $0x6d8] sm:$0xf0]  ;;  %v6197_v43 = vpop.f32.mrf.mxu3 }
 0x12b   :  { %2994 = vmatpush.bf16.msra.mxu1 %v4201_v62  ;;  %v4169_v62 = vor.u32 %v5382_v49, %v4166_v52  ;;  %v4390_v49 = vld [vmem:[#allocation2 + $0x668] sm:$0xf0]  ;;  %v4593_v52 = vor.u32 %v5488_v29, %v4590_v30  ;;  %v5468_v58 = vld [vmem:[#allocation2 + $0x754] sm:$0xf]  ;;  %v5450_v17 = vld [vmem:[#allocation2 + $0x6c4] sm:$0xf] }
 0x12c   :  { %3008 = vmatpush.bf16.msra.mxu2 %v4265_v63  ;;  %v4233_v63 = vor.u32 %v5398_v53, %v4230_v54  ;;  %v4454_v53 = vld [vmem:[#allocation2 + $0x6e8] sm:$0xf0]  ;;  %v5470_v54 = vld [vmem:[#allocation2 + $0x764] sm:$0xf]  ;;  %v4430_v29 = vld [vmem:[#allocation2 + $0x6b8] sm:$0xf0] }
 0x12d   :  { %3022 = vmatpush.bf16.msra.mxu3 %v4329_v4  ;;  %v4297_v4 = vor.u32 %v5414_v57, %v4294_v59  ;;  %v4518_v57 = vld [vmem:[#allocation2 + $0x768] sm:$0xf0]  ;;  %v5486_v59 = vld [vmem:[#allocation2 + $0x7e4] sm:$0xf]  ;;  %v5464_v30 = vld [vmem:[#allocation2 + $0x734] sm:$0xf] }
 0x12e   :  { %2981 = vmatpush.bf16.msra.mxu0 %v4129_v11  ;;  %v4097_v11 = vor.u32 %v5364_v0, %v4094_v2  ;;  %v4521_v2 = vor.u32 %v5470_v54, %v4518_v57  ;;  %v5446_v54 = vld [vmem:[#allocation2 + $0x6a4] sm:$0xf] }
 0x12f   :  { %2995 = vmatpush.bf16.msra.mxu1 %v4193_v12  ;;  %v5362_v12 = vld [vmem:[#allocation2 + $0x404] sm:$0xf] }
 0x130   :  { %3009 = vmatpush.bf16.msra.mxu2 %v4257_v13  ;;  %v4086_v13 = vld [vmem:[#allocation2 + $0x408] sm:$0xf0] }
 0x131   :  { %3023 = vmatpush.bf16.msra.mxu3 %v4321_v16  ;;  %v4150_v16 = vld [vmem:[#allocation2 + $0x488] sm:$0xf0]  ;;  %v4089_v23 = vor.u32 %v5362_v12, %v4086_v13  ;;  %v5484_v12 = vld [vmem:[#allocation2 + $0x7d4] sm:$0xf]  ;;  %v4574_v13 = vld [vmem:[#allocation2 + $0x7d8] sm:$0xf0] }
 0x132   :  { %2982 = vmatpush.bf16.msra.mxu0 %v4121_v21  ;;  %v5440_v21 = vld [vmem:[#allocation2 + $0x674] sm:$0xf]  ;;  %v4153_v27 = vor.u32 %v5378_v10, %v4150_v16  ;;  %v5434_v16 = vld [vmem:[#allocation2 + $0x644] sm:$0xf] }
 0x133   :  { %2996 = vmatpush.bf16.msra.mxu1 %v4185_v47  ;;  %v4398_v47 = vld [vmem:[#allocation2 + $0x678] sm:$0xf0] }
 0x134   :  { %3010 = vmatpush.bf16.msra.mxu2 %v4249_v22  ;;  %v5456_v22 = vld [vmem:[#allocation2 + $0x6f4] sm:$0xf] }
 0x135   :  { %3024 = vmatpush.bf16.msra.mxu3 %v4313_v26  ;;  %v4526_v26 = vld [vmem:[#allocation2 + $0x778] sm:$0xf0] }
 0x136   :  { %2983 = vmatpush.bf16.msra.mxu0 %v4113_v34  ;;  %v4281_v34 = vor.u32 %v5410_v20, %v4278_v44  ;;  %v4529_v45 = vor.u32 %v5472_v25, %v4526_v26  ;;  %v5466_v20 = vld [vmem:[#allocation2 + $0x744] sm:$0xf]  ;;  %v4502_v44 = vld [vmem:[#allocation2 + $0x748] sm:$0xf0]  ;;  %v4366_v25 = vld [vmem:[#allocation2 + $0x638] sm:$0xf0] }
 0x137   :  { %2997 = vmatpush.bf16.msra.mxu1 %v4177_v37  ;;  %v4401_v37 = vor.u32 %v5440_v21, %v4398_v47  ;;  %v5482_v21 = vld [vmem:[#allocation2 + $0x7c4] sm:$0xf]  ;;  %v5448_v26 = vld [vmem:[#allocation2 + $0x6b4] sm:$0xf] }
 0x138   :  { %3011 = vmatpush.bf16.msra.mxu2 %v4241_v42  ;;  %v4465_v42 = vor.u32 %v5456_v22, %v4462_v24  ;;  %v5432_v24 = vld [vmem:[#allocation2 + $0x634] sm:$0xf] }
 0x139   :  { %3025 = vmatpush.bf16.msra.mxu3 %v4305_v50  ;;  %v5454_v50 = vld [vmem:[#allocation2 + $0x6e4] sm:$0xf] }
 0x13a   :  { %2984 = vmatpush.bf16.msra.mxu0 %v4105_v61  ;;  %v4582_v61 = vld [vmem:[#allocation2 + $0x7e8] sm:$0xf0]  ;;  %v4457_v0 = vor.u32 %v5454_v50, %v4454_v53 }
 0x13b   :  { %2998 = vmatpush.bf16.msra.mxu1 %v4169_v62  ;;  %v6187_v62 = vpop.f32.mrf.mxu1  ;;  %v4585_v7 = vor.u32 %v5486_v59, %v4582_v61  ;;  %v4358_v53 = vld [vmem:[#allocation2 + $0x628] sm:$0xf0]  ;;  %v5462_v61 = vld [vmem:[#allocation2 + $0x724] sm:$0xf] }
 0x13c   :  { %3012 = vmatpush.bf16.msra.mxu2 %v4233_v63  ;;  %v4393_v63 = vor.u32 %v5438_v48, %v4390_v49  ;;  %v4369_v48 = vor.u32 %v5432_v24, %v4366_v25  ;;  %v4433_v49 = vor.u32 %v5448_v26, %v4430_v29  ;;  %v4422_v59 = vld [vmem:[#allocation2 + $0x6a8] sm:$0xf0]  ;;  %v5474_v26 = vld [vmem:[#allocation2 + $0x784] sm:$0xf]  ;;  %v5504_v29 = vld [vmem:[#allocation2 + $0x874] sm:$0xf] }
 0x13d   :  { %3026 = vmatpush.bf16.msra.mxu3 %v4297_v4  ;;  %v4382_v4 = vld [vmem:[#allocation2 + $0x658] sm:$0xf0]  ;;  %v4470_v25 = vld [vmem:[#allocation2 + $0x708] sm:$0xf0] }
 0x13e   :  { %2985 = vmatpush.bf16.msra.mxu0 %v4097_v11  ;;  %v4510_v11 = vld [vmem:[#allocation2 + $0x758] sm:$0xf0] }
 0x13f   :  { %2999 = vmatpush.bf16.msra.mxu1 %v4161_v1  ;;  %v4385_v1 = vor.u32 %v5436_v3, %v4382_v4  ;;  %v4513_v10 = vor.u32 %v5468_v58, %v4510_v11  ;;  %v6203_v3 = vpop.f32.mrf.mxu3  ;;  %v5428_v58 = vld [vmem:[#allocation2 + $0x614] sm:$0xf]  ;;  %v4350_v11 = vld [vmem:[#allocation2 + $0x618] sm:$0xf0] }
 0x140   :  { %3013 = vmatpush.bf16.msra.mxu2 %v4225_v39  ;;  %v4449_v39 = vor.u32 %v5452_v5, %v4446_v8 }
 0x141   :  { %3027 = vmatpush.bf16.msra.mxu3 %v4289_v18  ;;  %v6195_v18 = vpop.f32.mrf.mxu0 }
 0x142   :  { %2986 = vmatpush.bf16.msra.mxu0 %v4089_v23  ;;  %v4505_v23 = vor.u32 %v5466_v20, %v4502_v44  ;;  %v4342_v20 = vld [vmem:[#allocation2 + $0x608] sm:$0xf0] }
 0x143   :  { %3000 = vmatpush.bf16.msra.mxu1 %v4153_v27  ;;  %v6199_v27 = vpop.f32.mrf.mxu1 }
 0x144   :  { %3014 = vmatpush.bf16.msra.mxu2 %v4217_v28 }
 0x145   :  { %3028 = vmatpush.bf16.msra.mxu3 %v4281_v34  ;;  %2987 = vmatmul.bf16.vlgmr.msra.gmra.mxu0 %v6057_v31  ;;  %v4374_v31 = vld [vmem:[#allocation2 + $0x648] sm:$0xf0]  ;;  %v4494_v34 = vld [vmem:[#allocation2 + $0x738] sm:$0xf0] }
 0x146   :  { %3035 = vmatpush.bf16.msrb.mxu0 %v4401_v37  ;;  %3001 = vmatmul.bf16.vlgmr.msra.gmra.mxu1 %v6061_v36  ;;  %v4438_v36 = vld [vmem:[#allocation2 + $0x6c8] sm:$0xf0]  ;;  %v4377_v47 = vor.u32 %v5434_v16, %v4374_v31  ;;  %v5480_v37 = vld [vmem:[#allocation2 + $0x7b4] sm:$0xf]  ;;  %v4497_v50 = vor.u32 %v5464_v30, %v4494_v34  ;;  %v4542_v31 = vld [vmem:[#allocation2 + $0x798] sm:$0xf0] }
 0x147   :  { %3049 = vmatpush.bf16.msrb.mxu1 %v4465_v42  ;;  %3015 = vmatmul.bf16.vlgmr.msra.gmra.mxu2 %v6059_v35  ;;  %v4577_v35 = vor.u32 %v5484_v12, %v4574_v13  ;;  %v4441_v22 = vor.u32 %v5450_v17, %v4438_v36  ;;  %v4558_v42 = vld [vmem:[#allocation2 + $0x7b8] sm:$0xf0]  ;;  %v5444_v12 = vld [vmem:[#allocation2 + $0x694] sm:$0xf]  ;;  %v5426_v36 = vld [vmem:[#allocation2 + $0x604] sm:$0xf] }
 0x148   :  { %3063 = vmatpush.bf16.msrb.mxu2 %v4529_v45  ;;  %3029 = vmatmul.bf16.vlgmr.msra.gmra.mxu3 %v6063_v40  ;;  %v4566_v40 = vld [vmem:[#allocation2 + $0x7c8] sm:$0xf0]  ;;  %v6201_v45 = vpop.f32.mrf.mxu2  ;;  %v4561_v57 = vor.u32 %v5480_v37, %v4558_v42  ;;  %v5476_v16 = vld [vmem:[#allocation2 + $0x794] sm:$0xf]  ;;  %v4654_v30 = vld [vmem:[#allocation2 + $0x878] sm:$0xf0]  ;;  %v4345_v37 = vor.u32 %v5426_v36, %v4342_v20 }
 0x149   :  { %3077 = vmatpush.bf16.msrb.mxu3 %v4593_v52  ;;  %v4569_v28 = vor.u32 %v5482_v21, %v4566_v40  ;;  %v5430_v52 = vld [vmem:[#allocation2 + $0x624] sm:$0xf]  ;;  %v6205_v4 = vpop.f32.mrf.mxu0  ;;  %v4545_v24 = vor.u32 %v5476_v16, %v4542_v31  ;;  %v5520_v34 = vld [vmem:[#allocation2 + $0x8f4] sm:$0xf]  ;;  %v4718_v42 = vld [vmem:[#allocation2 + $0x8f8] sm:$0xf0] }
 0x14a   :  { %3036 = vmatpush.bf16.msrb.mxu0 %v4393_v63  ;;  %v4486_v63 = vld [vmem:[#allocation2 + $0x728] sm:$0xf0]  ;;  %v4361_v5 = vor.u32 %v5430_v52, %v4358_v53  ;;  %v5442_v40 = vld [vmem:[#allocation2 + $0x684] sm:$0xf]  ;;  %v5552_v53 = vld [vmem:[#allocation2 + $0x9f4] sm:$0xf] }
 0x14b   :  { %3050 = vmatpush.bf16.msrb.mxu1 %v4457_v0  ;;  %v5478_v0 = vld [vmem:[#allocation2 + $0x7a4] sm:$0xf]  ;;  %v4489_v8 = vor.u32 %v5462_v61, %v4486_v63  ;;  %v6207_v17 = vpop.f32.mrf.mxu1  ;;  %v6215_v61 = vpop.f32.mrf.mxu3 }
 0x14c   :  { %3064 = vmatpush.bf16.msrb.mxu2 %v4521_v2  ;;  %v4550_v2 = vld [vmem:[#allocation2 + $0x7a8] sm:$0xf0] }
 0x14d   :  { %3078 = vmatpush.bf16.msrb.mxu3 %v4585_v7  ;;  %v4425_v7 = vor.u32 %v5446_v54, %v4422_v59  ;;  %v4553_v13 = vor.u32 %v5478_v0, %v4550_v2  ;;  %v4846_v54 = vld [vmem:[#allocation2 + $0x9f8] sm:$0xf0]  ;;  %v4657_v0 = vor.u32 %v5504_v29, %v4654_v30  ;;  %v4721_v2 = vor.u32 %v5520_v34, %v4718_v42  ;;  %v5498_v42 = vld [vmem:[#allocation2 + $0x844] sm:$0xf] }
 0x14e   :  { %3037 = vmatpush.bf16.msrb.mxu0 %v4385_v1  ;;  %v4414_v1 = vld [vmem:[#allocation2 + $0x698] sm:$0xf0] }
 0x14f   :  { %3051 = vmatpush.bf16.msrb.mxu1 %v4449_v39  ;;  %v5460_v39 = vld [vmem:[#allocation2 + $0x714] sm:$0xf]  ;;  %v4417_v44 = vor.u32 %v5444_v12, %v4414_v1  ;;  %v4710_v12 = vld [vmem:[#allocation2 + $0x8e8] sm:$0xf0]  ;;  %v4830_v29 = vld [vmem:[#allocation2 + $0x9d8] sm:$0xf0] }
 0x150   :  { %3065 = vmatpush.bf16.msrb.mxu2 %v4513_v10  ;;  %v4478_v10 = vld [vmem:[#allocation2 + $0x718] sm:$0xf0]  ;;  %v4774_v1 = vld [vmem:[#allocation2 + $0x968] sm:$0xf0] }
 0x151   :  { %3079 = vmatpush.bf16.msrb.mxu3 %v4577_v35  ;;  %v4353_v35 = vor.u32 %v5428_v58, %v4350_v11  ;;  %v4481_v21 = vor.u32 %v5460_v39, %v4478_v10  ;;  %v6213_v59 = vpop.f32.mrf.mxu0  ;;  %v5518_v58 = vld [vmem:[#allocation2 + $0x8e4] sm:$0xf]  ;;  %v4849_v11 = vor.u32 %v5552_v53, %v4846_v54  ;;  %v4838_v10 = vld [vmem:[#allocation2 + $0x9e8] sm:$0xf0] }
 0x152   :  { %3038 = vmatpush.bf16.msrb.mxu0 %v4377_v47  ;;  %v4406_v47 = vld [vmem:[#allocation2 + $0x688] sm:$0xf0]  ;;  %v5550_v39 = vld [vmem:[#allocation2 + $0x9e4] sm:$0xf]  ;;  %v4713_v36 = vor.u32 %v5518_v58, %v4710_v12  ;;  %v4622_v58 = vld [vmem:[#allocation2 + $0x838] sm:$0xf0] }
 0x153   :  { %3052 = vmatpush.bf16.msrb.mxu1 %v4441_v22  ;;  %v5458_v22 = vld [vmem:[#allocation2 + $0x704] sm:$0xf]  ;;  %v6218_v31 = vpop.f32.mrf.mxu1  ;;  %v4758_v54 = vld [vmem:[#allocation2 + $0x948] sm:$0xf0] }
 0x154   :  { %3066 = vmatpush.bf16.msrb.mxu2 %v4505_v23  ;;  %v6209_v23 = vpop.f32.mrf.mxu2  ;;  %v4473_v52 = vor.u32 %v5458_v22, %v4470_v25  ;;  %v4841_v22 = vor.u32 %v5550_v39, %v4838_v10  ;;  %v5532_v25 = vld [vmem:[#allocation2 + $0x954] sm:$0xf]  ;;  %v5530_v53 = vld [vmem:[#allocation2 + $0x944] sm:$0xf]  ;;  %v4750_v10 = vld [vmem:[#allocation2 + $0x938] sm:$0xf0] }
 0x155   :  { %3080 = vmatpush.bf16.msrb.mxu3 %v4569_v28  ;;  %v4534_v28 = vld [vmem:[#allocation2 + $0x788] sm:$0xf0]  ;;  %v5528_v39 = vld [vmem:[#allocation2 + $0x934] sm:$0xf] }
 0x156   :  { %3039 = vmatpush.bf16.msrb.mxu0 %v4369_v48  ;;  %v5536_v48 = vld [vmem:[#allocation2 + $0x974] sm:$0xf]  ;;  %v4537_v63 = vor.u32 %v5474_v26, %v4534_v28  ;;  %v4766_v26 = vld [vmem:[#allocation2 + $0x958] sm:$0xf0] }
 0x157   :  { %3053 = vmatpush.bf16.msrb.mxu1 %v4433_v49  ;;  %v4782_v49 = vld [vmem:[#allocation2 + $0x978] sm:$0xf0]  ;;  %v5548_v28 = vld [vmem:[#allocation2 + $0x9d4] sm:$0xf] }
 0x158   :  { %3067 = vmatpush.bf16.msrb.mxu2 %v4497_v50  ;;  %v4409_v50 = vor.u32 %v5442_v40, %v4406_v47  ;;  %v5516_v40 = vld [vmem:[#allocation2 + $0x8d4] sm:$0xf] }
 0x159   :  { %3081 = vmatpush.bf16.msrb.mxu3 %v4561_v57  ;;  %v6211_v57 = vld [vmem:[#allocation4] sm:$0x3]  ;;  %v6225_v30 = vpop.f32.mrf.mxu0 }
 0x15a   :  { %3040 = vmatpush.bf16.msrb.mxu0 %v4361_v5  ;;  %v4785_v5 = vor.u32 %v5536_v48, %v4782_v49  ;;  %v607_v16 = vperm.slane %v6211_v57, 0  ;;  %v4630_v48 = vld [vmem:[#allocation2 + $0x848] sm:$0xf0]  ;;  %v5514_v49 = vld [vmem:[#allocation2 + $0x8c4] sm:$0xf] }
 0x15b   :  { %3054 = vmatpush.bf16.msrb.mxu1 %v4425_v7  ;;  %v5502_v7 = vld [vmem:[#allocation2 + $0x864] sm:$0xf] }
 0x15c   :  { %3068 = vmatpush.bf16.msrb.mxu2 %v4489_v8  ;;  %v4646_v8 = vld [vmem:[#allocation2 + $0x868] sm:$0xf0]  ;;  %v6220_v47 = vpop.f32.mrf.mxu2 }
 0x15d   :  { %3082 = vmatpush.bf16.msrb.mxu3 %v4553_v13  ;;  %v5534_v13 = vld [vmem:[#allocation2 + $0x964] sm:$0xf] }
 0x15e   :  { %3041 = vmatpush.bf16.msrb.mxu0 %v4353_v35  ;;  %v4649_v35 = vor.u32 %v5502_v7, %v4646_v8  ;;  %v4777_v20 = vor.u32 %v5534_v13, %v4774_v1  ;;  %v4761_v8 = vor.u32 %v5530_v53, %v4758_v54 }
 0x15f   :  { %3055 = vmatpush.bf16.msrb.mxu1 %v4417_v44  ;;  %v5500_v44 = vld [vmem:[#allocation2 + $0x854] sm:$0xf] }
 0x160   :  { %3069 = vmatpush.bf16.msrb.mxu2 %v4481_v21  ;;  %v4638_v21 = vld [vmem:[#allocation2 + $0x858] sm:$0xf0] }
 0x161   :  { %3083 = vmatpush.bf16.msrb.mxu3 %v4545_v24  ;;  %v4702_v24 = vld [vmem:[#allocation2 + $0x8d8] sm:$0xf0]  ;;  %v4641_v34 = vor.u32 %v5500_v44, %v4638_v21  ;;  %v4753_v21 = vor.u32 %v5528_v39, %v4750_v10  ;;  %v4662_v39 = vld [vmem:[#allocation2 + $0x888] sm:$0xf0]  ;;  %v5522_v10 = vld [vmem:[#allocation2 + $0x904] sm:$0xf] }
 0x162   :  { %3042 = vmatpush.bf16.msrb.mxu0 %v4345_v37  ;;  %v4705_v37 = vor.u32 %v5516_v40, %v4702_v24  ;;  %v5494_v40 = vld [vmem:[#allocation2 + $0x824] sm:$0xf] }
 0x163   :  { %3056 = vmatpush.bf16.msrb.mxu1 %v4409_v50  ;;  %v2541_v50 = vadd.f32 %v6185_v33, %v607_v16  ;;  %v5496_v33 = vld [vmem:[#allocation2 + $0x834] sm:$0xf] }
 0x164   :  { %3070 = vmatpush.bf16.msrb.mxu2 %v4473_v52  ;;  %v4694_v52 = vld [vmem:[#allocation2 + $0x8c8] sm:$0xf0]  ;;  %v6235_v13 = vpop.f32.mrf.mxu2 }
 0x165   :  { %3084 = vmatpush.bf16.msrb.mxu3 %v4537_v63  ;;  %3043 = vmatmul.bf16.vlgmr.msrb.gmra.mxu0 %v6093_v32  ;;  %v4769_v32 = vor.u32 %v5532_v25, %v4766_v26  ;;  %v5546_v63 = vld [vmem:[#allocation2 + $0x9c4] sm:$0xf]  ;;  %v4697_v7 = vor.u32 %v5514_v49, %v4694_v52  ;;  %v2555_v12 = vadd.f32 %v6187_v62, %v2541_v50  ;;  %v6239_v25 = vpop.f32.mrf.mxu0  ;;  %v5508_v52 = vld [vmem:[#allocation2 + $0x894] sm:$0xf] }
 0x166   :  { %3091 = vmatpush.bf16.msra.mxu0 %v4657_v0  ;;  %3057 = vmatmul.bf16.vlgmr.msrb.gmra.mxu1 %v6097_v41  ;;  %v4833_v41 = vor.u32 %v5548_v28, %v4830_v29  ;;  %v4822_v0 = vld [vmem:[#allocation2 + $0x9c8] sm:$0xf0]  ;;  %v5510_v62 = vld [vmem:[#allocation2 + $0x8a4] sm:$0xf] }
 0x167   :  { %3105 = vmatpush.bf16.msra.mxu1 %v4721_v2  ;;  %3071 = vmatmul.bf16.vlgmr.msrb.gmra.mxu2 %v6095_v38  ;;  %v6229_v38 = vpop.f32.mrf.mxu3  ;;  %v6232_v2 = vpop.f32.mrf.mxu1  ;;  %v4825_v1 = vor.u32 %v5546_v63, %v4822_v0  ;;  %v2569_v24 = vadd.f32 %v6189_v6, %v2555_v12  ;;  %v5526_v29 = vld [vmem:[#allocation2 + $0x924] sm:$0xf]  ;;  %v5492_v6 = vld [vmem:[#allocation2 + $0x814] sm:$0xf]  ;;  %v4670_v63 = vld [vmem:[#allocation2 + $0x898] sm:$0xf0] }
 0x168   :  { %3119 = vmatpush.bf16.msra.mxu2 %v4785_v5  ;;  %3085 = vmatmul.bf16.vlgmr.msrb.gmra.mxu3 %v6099_v46  ;;  %v2543_v46 = vadd.f32 %v6195_v18, %v607_v16  ;;  %v4633_v5 = vor.u32 %v5498_v42, %v4630_v48  ;;  %v4686_v18 = vld [vmem:[#allocation2 + $0x8b8] sm:$0xf0]  ;;  %v4806_v42 = vld [vmem:[#allocation2 + $0x9a8] sm:$0xf0]  ;;  %v5524_v0 = vld [vmem:[#allocation2 + $0x914] sm:$0xf] }
 0x169   :  { %3133 = vmatpush.bf16.msra.mxu3 %v4849_v11  ;;  %v5512_v11 = vld [vmem:[#allocation2 + $0x8b4] sm:$0xf]  ;;  %v2583_v53 = vadd.f32 %v6197_v43, %v2569_v24  ;;  %v4598_v12 = vld [vmem:[#allocation2 + $0x808] sm:$0xf0]  ;;  %v4673_v43 = vor.u32 %v5508_v52, %v4670_v63  ;;  %v5582_v63 = vld [vmem:[#allocation2 + $0xae4] sm:$0xf] }
 0x16a   :  { %3092 = vmatpush.bf16.msra.mxu0 %v4649_v35  ;;  %v2557_v16 = vadd.f32 %v6199_v27, %v2543_v46  ;;  %v5544_v35 = vld [vmem:[#allocation2 + $0x9b4] sm:$0xf]  ;;  %v4689_v44 = vor.u32 %v5512_v11, %v4686_v18  ;;  %v4678_v27 = vld [vmem:[#allocation2 + $0x8a8] sm:$0xf0]  ;;  %v5490_v11 = vld [vmem:[#allocation2 + $0x804] sm:$0xf] }
 0x16b   :  { %3106 = vmatpush.bf16.msra.mxu1 %v4713_v36  ;;  %v4814_v36 = vld [vmem:[#allocation2 + $0x9b8] sm:$0xf0]  ;;  %v4681_v49 = vor.u32 %v5510_v62, %v4678_v27  ;;  %v5506_v18 = vld [vmem:[#allocation2 + $0x884] sm:$0xf]  ;;  %v5584_v62 = vld [vmem:[#allocation2 + $0xaf4] sm:$0xf] }
 0x16c   :  { %3120 = vmatpush.bf16.msra.mxu2 %v4777_v20  ;;  %v4625_v20 = vor.u32 %v5496_v33, %v4622_v58  ;;  %v4817_v28 = vor.u32 %v5544_v35, %v4814_v36  ;;  %v6248_v33 = vpop.f32.mrf.mxu2  ;;  %v4726_v36 = vld [vmem:[#allocation2 + $0x908] sm:$0xf0]  ;;  %v4974_v27 = vld [vmem:[#allocation2 + $0xaf8] sm:$0xf0] }
 0x16d   :  { %3134 = vmatpush.bf16.msra.mxu3 %v4841_v22  ;;  %v4614_v22 = vld [vmem:[#allocation2 + $0x828] sm:$0xf0]  ;;  %v6251_v35 = vpop.f32.mrf.mxu0 }
 0x16e   :  { %3093 = vmatpush.bf16.msra.mxu0 %v4641_v34  ;;  %v4742_v34 = vld [vmem:[#allocation2 + $0x928] sm:$0xf0]  ;;  %v4617_v48 = vor.u32 %v5494_v40, %v4614_v22  ;;  %v5568_v40 = vld [vmem:[#allocation2 + $0xa74] sm:$0xf]  ;;  %v4910_v22 = vld [vmem:[#allocation2 + $0xa78] sm:$0xf0] }
 0x16f   :  { %3107 = vmatpush.bf16.msra.mxu1 %v4705_v37  ;;  %v6241_v26 = vpop.f32.mrf.mxu3  ;;  %v2571_v37 = vadd.f32 %v6201_v45, %v2557_v16  ;;  %v4745_v50 = vor.u32 %v5526_v29, %v4742_v34  ;;  %v6245_v54 = vpop.f32.mrf.mxu1  ;;  %v4734_v45 = vld [vmem:[#allocation2 + $0x918] sm:$0xf0]  ;;  %v2597_v16 = vadd.f32 %v6205_v4, %v2583_v53  ;;  %v5600_v29 = vld [vmem:[#allocation2 + $0xb74] sm:$0xf]  ;;  %v4665_v4 = vor.u32 %v5506_v18, %v4662_v39  ;;  %v5566_v53 = vld [vmem:[#allocation2 + $0xa64] sm:$0xf] }
 0x170   :  { %3121 = vmatpush.bf16.msra.mxu2 %v4769_v32  ;;  %v5542_v32 = vld [vmem:[#allocation2 + $0x9a4] sm:$0xf]  ;;  %v5038_v34 = vld [vmem:[#allocation2 + $0xb78] sm:$0xf0]  ;;  %v5564_v18 = vld [vmem:[#allocation2 + $0xa54] sm:$0xf] }
 0x171   :  { %3135 = vmatpush.bf16.msra.mxu3 %v4833_v41  ;;  %v4606_v41 = vld [vmem:[#allocation2 + $0x818] sm:$0xf0]  ;;  %v4809_v46 = vor.u32 %v5542_v32, %v4806_v42  ;;  %v5616_v32 = vld [vmem:[#allocation2 + $0xbf4] sm:$0xf]  ;;  %v5041_v52 = vor.u32 %v5600_v29, %v5038_v34  ;;  %v5562_v29 = vld [vmem:[#allocation2 + $0xa44] sm:$0xf] }
 0x172   :  { %3094 = vmatpush.bf16.msra.mxu0 %v4633_v5  ;;  %v2585_v5 = vadd.f32 %v6203_v3, %v2571_v37  ;;  %v4609_v58 = vor.u32 %v5492_v6, %v4606_v41  ;;  %v4729_v37 = vor.u32 %v5522_v10, %v4726_v36  ;;  %v5102_v42 = vld [vmem:[#allocation2 + $0xbf8] sm:$0xf0]  ;;  %v4977_v41 = vor.u32 %v5584_v62, %v4974_v27  ;;  %v5580_v10 = vld [vmem:[#allocation2 + $0xad4] sm:$0xf]  ;;  %v5578_v34 = vld [vmem:[#allocation2 + $0xac4] sm:$0xf] }
 0x173   :  { %3108 = vmatpush.bf16.msra.mxu1 %v4697_v7  ;;  %v5540_v7 = vld [vmem:[#allocation2 + $0x994] sm:$0xf]  ;;  %v4894_v39 = vld [vmem:[#allocation2 + $0xa58] sm:$0xf0] }
 0x174   :  { %3122 = vmatpush.bf16.msra.mxu2 %v4761_v8  ;;  %v4798_v8 = vld [vmem:[#allocation2 + $0x998] sm:$0xf0]  ;;  %v4897_v62 = vor.u32 %v5564_v18, %v4894_v39  ;;  %v5574_v18 = vld [vmem:[#allocation2 + $0xaa4] sm:$0xf] }
 0x175   :  { %3136 = vmatpush.bf16.msra.mxu3 %v4825_v1  ;;  %v4737_v1 = vor.u32 %v5524_v0, %v4734_v45  ;;  %v4801_v3 = vor.u32 %v5540_v7, %v4798_v8  ;;  %v6260_v0 = vpop.f32.mrf.mxu2  ;;  %v5105_v45 = vor.u32 %v5616_v32, %v5102_v42  ;;  %v5598_v7 = vld [vmem:[#allocation2 + $0xb64] sm:$0xf]  ;;  %v5030_v8 = vld [vmem:[#allocation2 + $0xb68] sm:$0xf0]  ;;  %v4958_v36 = vld [vmem:[#allocation2 + $0xad8] sm:$0xf0] }
 0x176   :  { %3095 = vmatpush.bf16.msra.mxu0 %v4625_v20  ;;  %v5538_v20 = vld [vmem:[#allocation2 + $0x984] sm:$0xf]  ;;  %v5078_v42 = vld [vmem:[#allocation2 + $0xbc8] sm:$0xf0] }
 0x177   :  { %3109 = vmatpush.bf16.msra.mxu1 %v4689_v44  ;;  %v4790_v44 = vld [vmem:[#allocation2 + $0x988] sm:$0xf0]  ;;  %v6254_v24 = vpop.f32.mrf.mxu3  ;;  %v5610_v32 = vld [vmem:[#allocation2 + $0xbc4] sm:$0xf] }
 0x178   :  { %3123 = vmatpush.bf16.msra.mxu2 %v4753_v21  ;;  %v2599_v21 = vadd.f32 %v6213_v59, %v2585_v5  ;;  %v4793_v59 = vor.u32 %v5538_v20, %v4790_v44  ;;  %v4966_v5 = vld [vmem:[#allocation2 + $0xae8] sm:$0xf0]  ;;  %v5022_v20 = vld [vmem:[#allocation2 + $0xb58] sm:$0xf0] }
 0x179   :  { %3137 = vmatpush.bf16.msra.mxu3 %v4817_v28  ;;  %v4601_v28 = vor.u32 %v5490_v11, %v4598_v12  ;;  %v5094_v11 = vld [vmem:[#allocation2 + $0xbe8] sm:$0xf0] }
 0x17a   :  { %3096 = vmatpush.bf16.msra.mxu0 %v4617_v48  ;;  %v2611_v48 = vadd.f32 %v6207_v17, %v2597_v16  ;;  %v2613_v6 = vadd.f32 %v6218_v31, %v2599_v21  ;;  %v6264_v16 = vpop.f32.mrf.mxu0  ;;  %v5612_v21 = vld [vmem:[#allocation2 + $0xbd4] sm:$0xf] }
 0x17b   :  { %3110 = vmatpush.bf16.msra.mxu1 %v4681_v49  ;;  %v6257_v49 = vpop.f32.mrf.mxu1 }
 0x17c   :  { %3124 = vmatpush.bf16.msra.mxu2 %v4745_v50  ;;  %v4913_v50 = vor.u32 %v5568_v40, %v4910_v22  ;;  %v2627_v17 = vadd.f32 %v6220_v47, %v2613_v6  ;;  %v2625_v31 = vadd.f32 %v6209_v23, %v2611_v48  ;;  %v5596_v23 = vld [vmem:[#allocation2 + $0xb54] sm:$0xf]  ;;  %v5086_v40 = vld [vmem:[#allocation2 + $0xbd8] sm:$0xf0] }
 0x17d   :  { %3138 = vmatpush.bf16.msra.mxu3 %v4809_v46  ;;  %v4902_v46 = vld [vmem:[#allocation2 + $0xa68] sm:$0xf0]  ;;  %v5025_v27 = vor.u32 %v5596_v23, %v5022_v20  ;;  %v6278_v48 = vpop.f32.mrf.mxu2  ;;  %v5606_v23 = vld [vmem:[#allocation2 + $0xba4] sm:$0xf] }
 0x17e   :  { %3097 = vmatpush.bf16.msra.mxu0 %v4609_v58  ;;  %v5614_v58 = vld [vmem:[#allocation2 + $0xbe4] sm:$0xf]  ;;  %v4905_v12 = vor.u32 %v5566_v53, %v4902_v46  ;;  %v2641_v44 = vadd.f32 %v6229_v38, %v2627_v17  ;;  %v2639_v22 = vadd.f32 %v6215_v61, %v2625_v31  ;;  %v4886_v38 = vld [vmem:[#allocation2 + $0xa48] sm:$0xf0]  ;;  %v5608_v17 = vld [vmem:[#allocation2 + $0xbb4] sm:$0xf] }
 0x17f   :  { %3111 = vmatpush.bf16.msra.mxu1 %v4673_v43  ;;  %v4969_v43 = vor.u32 %v5582_v63, %v4966_v5  ;;  %v5097_v47 = vor.u32 %v5614_v58, %v5094_v11  ;;  %v4950_v61 = vld [vmem:[#allocation2 + $0xac8] sm:$0xf0]  ;;  %v5081_v63 = vor.u32 %v5610_v32, %v5078_v42  ;;  %v5592_v5 = vld [vmem:[#allocation2 + $0xb34] sm:$0xf] }
 0x180   :  { %3125 = vmatpush.bf16.msra.mxu2 %v4737_v1  ;;  %v5033_v1 = vor.u32 %v5598_v7, %v5030_v8  ;;  %v5006_v7 = vld [vmem:[#allocation2 + $0xb38] sm:$0xf0]  ;;  %v5062_v20 = vld [vmem:[#allocation2 + $0xba8] sm:$0xf0] }
 0x181   :  { %3139 = vmatpush.bf16.msra.mxu3 %v4801_v3  ;;  %v6266_v3 = vpop.f32.mrf.mxu3 }
 0x182   :  { %3098 = vmatpush.bf16.msra.mxu0 %v4601_v28  ;;  %v4961_v28 = vor.u32 %v5580_v10, %v4958_v36  ;;  %v6282_v46 = vpop.f32.mrf.mxu0  ;;  %v4998_v36 = vld [vmem:[#allocation2 + $0xb28] sm:$0xf0] }
 0x183   :  { %3112 = vmatpush.bf16.msra.mxu1 %v4665_v4  ;;  %v5089_v4 = vor.u32 %v5612_v21, %v5086_v40 }
 0x184   :  { %3126 = vmatpush.bf16.msra.mxu2 %v4729_v37  ;;  %v5594_v37 = vld [vmem:[#allocation2 + $0xb44] sm:$0xf] }
 0x185   :  { %3140 = vmatpush.bf16.msra.mxu3 %v4793_v59  ;;  %3099 = vmatmul.bf16.vlgmr.msra.gmra.mxu0 %v6129_v51  ;;  %v2655_v51 = vadd.f32 %v6239_v25, %v2641_v44  ;;  %v4889_v25 = vor.u32 %v5562_v29, %v4886_v38  ;;  %v6292_v21 = vpop.f32.mrf.mxu2  ;;  %v5572_v29 = vld [vmem:[#allocation2 + $0xa94] sm:$0xf]  ;;  %v5065_v38 = vor.u32 %v5606_v23, %v5062_v20 }
 0x186   :  { %3147 = vmatpush.bf16.msrb.mxu0 %v4913_v50  ;;  %3113 = vmatmul.bf16.vlgmr.msra.gmra.mxu1 %v6133_v56  ;;  %v6276_v56 = vpop.f32.mrf.mxu1  ;;  %v4953_v50 = vor.u32 %v5578_v34, %v4950_v61  ;;  %v5588_v34 = vld [vmem:[#allocation2 + $0xb14] sm:$0xf]  ;;  %v5054_v61 = vld [vmem:[#allocation2 + $0xb98] sm:$0xf0] }
 0x187   :  { %3161 = vmatpush.bf16.msrb.mxu1 %v4977_v41  ;;  %3127 = vmatmul.bf16.vlgmr.msra.gmra.mxu2 %v6131_v55  ;;  %v2653_v55 = vadd.f32 %v6225_v30, %v2639_v22  ;;  %v2669_v59 = vadd.f32 %v6245_v54, %v2655_v51  ;;  %v5560_v30 = vld [vmem:[#allocation2 + $0xa34] sm:$0xf]  ;;  %v4878_v41 = vld [vmem:[#allocation2 + $0xa38] sm:$0xf0] }
 0x188   :  { %3175 = vmatpush.bf16.msrb.mxu2 %v5041_v52  ;;  %3141 = vmatmul.bf16.vlgmr.msra.gmra.mxu3 %v6135_v60  ;;  %v5014_v60 = vld [vmem:[#allocation2 + $0xb48] sm:$0xf0]  ;;  %v5576_v52 = vld [vmem:[#allocation2 + $0xab4] sm:$0xf]  ;;  %v5070_v54 = vld [vmem:[#allocation2 + $0xbb8] sm:$0xf0]  ;;  %v4881_v31 = vor.u32 %v5560_v30, %v4878_v41 }
 0x189   :  { %3189 = vmatpush.bf16.msrb.mxu3 %v5105_v45  ;;  %v5017_v6 = vor.u32 %v5594_v37, %v5014_v60  ;;  %v2667_v53 = vadd.f32 %v6232_v2, %v2653_v55  ;;  %v4942_v45 = vld [vmem:[#allocation2 + $0xab8] sm:$0xf0]  ;;  %v2683_v8 = vadd.f32 %v6248_v33, %v2669_v59  ;;  %v6286_v11 = vpop.f32.mrf.mxu3  ;;  %v5073_v10 = vor.u32 %v5608_v17, %v5070_v54  ;;  %v4934_v33 = vld [vmem:[#allocation2 + $0xaa8] sm:$0xf0]  ;;  %v5554_v59 = vld [vmem:[#allocation2 + $0xa04] sm:$0xf] }
 0x18a   :  { %3148 = vmatpush.bf16.msrb.mxu0 %v4905_v12  ;;  %v4945_v2 = vor.u32 %v5576_v52, %v4942_v45  ;;  %v5009_v12 = vor.u32 %v5592_v5, %v5006_v7  ;;  %v4990_v55 = vld [vmem:[#allocation2 + $0xb18] sm:$0xf0]  ;;  %v2766_v37 = vpop.f32.mrf.mxu0  ;;  %v4918_v41 = vld [vmem:[#allocation2 + $0xa88] sm:$0xf0]  ;;  %v5586_v52 = vld [vmem:[#allocation2 + $0xb04] sm:$0xf] }
 0x18b   :  { %3162 = vmatpush.bf16.msrb.mxu1 %v4969_v43  ;;  %v2681_v58 = vadd.f32 %v6235_v13, %v2667_v53  ;;  %v5558_v43 = vld [vmem:[#allocation2 + $0xa24] sm:$0xf]  ;;  %v2697_v13 = vadd.f32 %v6254_v24, %v2683_v8  ;;  %v4926_v24 = vld [vmem:[#allocation2 + $0xa98] sm:$0xf0]  ;;  %v5046_v5 = vld [vmem:[#allocation2 + $0xb88] sm:$0xf0] }
 0x18c   :  { %3176 = vmatpush.bf16.msrb.mxu2 %v5033_v1  ;;  %v4870_v1 = vld [vmem:[#allocation2 + $0xa28] sm:$0xf0]  ;;  %v4929_v42 = vor.u32 %v5572_v29, %v4926_v24  ;;  %v5602_v45 = vld [vmem:[#allocation2 + $0xb84] sm:$0xf] }
 0x18d   :  { %3190 = vmatpush.bf16.msrb.mxu3 %v5097_v47  ;;  %v5590_v47 = vld [vmem:[#allocation2 + $0xb24] sm:$0xf]  ;;  %v2695_v44 = vadd.f32 %v6241_v26, %v2681_v58  ;;  %v4873_v40 = vor.u32 %v5558_v43, %v4870_v1  ;;  %v2711_v22 = vadd.f32 %v6264_v16, %v2697_v13  ;;  %v2794_v58 = vpop.f32.mrf.mxu2 }
 0x18e   :  { %3149 = vmatpush.bf16.msrb.mxu0 %v4897_v62  ;;  %v6288_v39 = vpop.f32.mrf.mxu1  ;;  %v4937_v62 = vor.u32 %v5574_v18, %v4934_v33  ;;  %v5001_v51 = vor.u32 %v5590_v47, %v4998_v36  ;;  %v5623_v33 = vld [vmem:[#allocation6 + $0x28] sm:$0xff] }
 0x18f   :  { %3163 = vmatpush.bf16.msrb.mxu1 %v4961_v28  ;;  %v5556_v28 = vld [vmem:[#allocation2 + $0xa14] sm:$0xf]  ;;  %v2709_v26 = vadd.f32 %v6251_v35, %v2695_v44  ;;  %v2725_v32 = vadd.f32 %v6276_v56, %v2711_v22  ;;  %v4982_v35 = vld [vmem:[#allocation2 + $0xb08] sm:$0xf0] }
 0x190   :  { %3177 = vmatpush.bf16.msrb.mxu2 %v5025_v27  ;;  %v4862_v27 = vld [vmem:[#allocation2 + $0xa18] sm:$0xf0]  ;;  %v4985_v54 = vor.u32 %v5586_v52, %v4982_v35 }
 0x191   :  { %3191 = vmatpush.bf16.msrb.mxu3 %v5089_v4  ;;  %v5604_v4 = vld [vmem:[#allocation2 + $0xb94] sm:$0xf]  ;;  %v2806_v60 = vpop.f32.mrf.mxu3  ;;  %v4865_v16 = vor.u32 %v5556_v28, %v4862_v27  ;;  %v2723_v53 = vadd.f32 %v6257_v49, %v2709_v26 }
 0x192   :  { %3150 = vmatpush.bf16.msrb.mxu0 %v4889_v25  ;;  %v4993_v25 = vor.u32 %v5588_v34, %v4990_v55  ;;  %v5057_v30 = vor.u32 %v5604_v4, %v5054_v61  ;;  %v2820_v49 = vpop.f32.mrf.mxu0  ;;  %v5618_v34 = vld [vmem:[#allocation6] sm:$0xff] }
 0x193   :  { %3164 = vmatpush.bf16.msrb.mxu1 %v4953_v50  ;;  %v4854_v50 = vld [vmem:[#allocation2 + $0xa08] sm:$0xf0]  ;;  %v2737_v8 = vadd.f32 %v6260_v0, %v2723_v53  ;;  %v5624_v0 = vld [vmem:[#allocation6 + $0x30] sm:$0xff] }
 0x194   :  { %3178 = vmatpush.bf16.msrb.mxu2 %v5017_v6  ;;  %v5570_v6 = vld [vmem:[#allocation2 + $0xa84] sm:$0xf]  ;;  %v4857_v56 = vor.u32 %v5554_v59, %v4854_v50 }
 0x195   :  { %3192 = vmatpush.bf16.msrb.mxu3 %v5081_v63  ;;  %v2739_v63 = vadd.f32 %v6278_v48, %v2725_v32  ;;  %v4921_v17 = vor.u32 %v5570_v6, %v4918_v41  ;;  %v2751_v48 = vadd.f32 %v6266_v3, %v2737_v8  ;;  %v2848_v3 = vpop.f32.mrf.mxu2  ;;  %v608_v41 = vperm.slane %v6211_v57, 1 }
 0x196   :  { %3151 = vmatpush.bf16.msrb.mxu0 %v4881_v31  ;;  %v2780_v7 = vpop.f32.mrf.mxu1  ;;  %v5049_v31 = vor.u32 %v5602_v45, %v5046_v5 }
 0x197   :  { %3165 = vmatpush.bf16.msrb.mxu1 %v4945_v2  ;;  %v5625_v2 = vld [vmem:[#allocation6 + $0x38] sm:$0xff]  ;;  %v2765_v18 = vadd.f32 %v6282_v46, %v2751_v48 }
 0x198   :  { %3179 = vmatpush.bf16.msrb.mxu2 %v5009_v12  ;;  %v2753_v12 = vadd.f32 %v6286_v11, %v2739_v63 }
 0x199   :  { %3193 = vmatpush.bf16.msrb.mxu3 %v5073_v10  ;;  %v2808_v1 = vpop.f32.mrf.mxu3  ;;  %v2779_v47 = vadd.f32 %v6288_v39, %v2765_v18  ;;  %v5632_v18 = vld [vmem:[#allocation6 + $0x70] sm:$0xff] }
 0x19a   :  { %3152 = vmatpush.bf16.msrb.mxu0 %v4873_v40  ;;  %v2767_v43 = vadd.f32 %v2766_v37, %v2753_v12  ;;  %v2822_v23 = vpop.f32.mrf.mxu0 }
 0x19b   :  { %3166 = vmatpush.bf16.msrb.mxu1 %v4937_v62  ;;  %v2793_v13 = vadd.f32 %v6292_v21, %v2779_v47  ;;  %v5619_v21 = vld [vmem:[#allocation6 + $0x8] sm:$0xff] }
 0x19c   :  { %3180 = vmatpush.bf16.msrb.mxu2 %v5001_v51  ;;  %v2781_v11 = vadd.f32 %v2780_v7, %v2767_v43  ;;  %v5620_v51 = vld [vmem:[#allocation6 + $0x10] sm:$0xff] }
 0x19d   :  { %3194 = vmatpush.bf16.msrb.mxu3 %v5065_v38  ;;  %v2807_v44 = vadd.f32 %v2806_v60, %v2793_v13 }
 0x19e   :  { %3153 = vmatpush.bf16.msrb.mxu0 %v4865_v16  ;;  %v2834_v10 = vpop.f32.mrf.mxu1  ;;  %v2795_v36 = vadd.f32 %v2794_v58, %v2781_v11 }
 0x19f   :  { %3167 = vmatpush.bf16.msrb.mxu1 %v4929_v42  ;;  %v2821_v22 = vadd.f32 %v2820_v49, %v2807_v44 }
 0x1a0   :  { %3181 = vmatpush.bf16.msrb.mxu2 %v4993_v25  ;;  %v2809_v20 = vadd.f32 %v2808_v1, %v2795_v36  ;;  %v5633_v1 = vld [vmem:[#allocation6 + $0x78] sm:$0xff] }
 0x1a1   :  { %3195 = vmatpush.bf16.msrb.mxu3 %v5057_v30  ;;  %v2862_v46 = vpop.f32.mrf.mxu3  ;;  %v2835_v28 = vadd.f32 %v2834_v10, %v2821_v22 }
 0x1a2   :  { %3154 = vmatpush.bf16.msrb.mxu0 %v4857_v56  ;;  %v2876_v61 = vpop.f32.mrf.mxu0 }
 0x1a3   :  { %3168 = vmatpush.bf16.msrb.mxu1 %v4921_v17  ;;  %v2849_v29 = vadd.f32 %v2848_v3, %v2835_v28  ;;  %v2877_v53 = vadd.f32 %v2876_v61, %v608_v41 }
 0x1a4   :  { %3182 = vmatpush.bf16.msrb.mxu2 %v4985_v54 }
 0x1a5   :  { %3196 = vmatpush.bf16.msrb.mxu3 %v5049_v31  ;;  %3155 = vmatmul.bf16.vlgmr.msrb.gmra.mxu0 %v6165_v9  ;;  %v5622_v9 = vld [vmem:[#allocation6 + $0x20] sm:$0xff]  ;;  %v2863_v24 = vadd.f32 %v2862_v46, %v2849_v29 }
 0x1a6   :  { %3341 = vmatpush.bf16.msra.mxu0 %v5625_v2  ;;  %3169 = vmatmul.bf16.vlgmr.msrb.gmra.mxu1 %v6169_v15  ;;  %v2823_v15 = vadd.f32 %v2822_v23, %v2809_v20  ;;  %v2836_v40 = vpop.f32.mrf.mxu1  ;;  %v5631_v20 = vld [vmem:[#allocation6 + $0x68] sm:$0xff] }
 0x1a7   :  { %3183 = vmatmul.bf16.vlgmr.msrb.gmra.mxu2 %v6167_v14  ;;  %v5621_v14 = vld [vmem:[#allocation6 + $0x18] sm:$0xff]  ;;  %v3203_v26 = vmax.f32 %v2863_v24, 0.0  ;;  %3355 = vmatpush.bf16.msra.mxu1 %v5633_v1  ;;  %v5628_v24 = vld [vmem:[#allocation6 + $0x50] sm:$0xff] }
 0x1a8   :  { %3197 = vmatmul.bf16.vlgmr.msrb.gmra.mxu3 %v6171_v19  ;;  %v2850_v19 = vpop.f32.mrf.mxu2  ;;  %v2837_v62 = vadd.f32 %v2836_v40, %v2823_v15  ;;  %v5630_v40 = vld [vmem:[#allocation6 + $0x60] sm:$0xff] }
 0x1a9   :  { %v2864_v27 = vpop.f32.mrf.mxu3 }
 0x1aa   :  { %3342 = vmatpush.bf16.msra.mxu0 %v5624_v0  ;;  %v2851_v39 = vadd.f32 %v2850_v19, %v2837_v62  ;;  %v2878_v32 = vpop.f32.mrf.mxu0 }
 0x1ab   :  { %v2879_v7 = vadd.f32 %v2878_v32, %v608_v41  ;;  %3356 = vmatpush.bf16.msra.mxu1 %v5632_v18 }
 0x1ac   :  { %v2865_v38 = vadd.f32 %v2864_v27, %v2851_v39  ;;  %v5629_v39 = vld [vmem:[#allocation6 + $0x58] sm:$0xff] }
 0x1ae   :  { %3343 = vmatpush.bf16.msra.mxu0 %v5623_v33  ;;  %v3205_v55 = vmax.f32 %v2865_v38, 0.0  ;;  %v2890_v37 = vpop.f32.mrf.mxu1 }
 0x1af   :  { %v2891_v45 = vadd.f32 %v2890_v37, %v2877_v53  ;;  %3357 = vmatpush.bf16.msra.mxu1 %v5631_v20  ;;  %v5627_v37 = vld [vmem:[#allocation6 + $0x48] sm:$0xff] }
 0x1b0   :  { %v3207_v4 = vpack.c.bf16 %v3205_v55, %v3203_v26  ;;  %v2904_v60 = vpop.f32.mrf.mxu2 }
 0x1b1   :  { %v2918_v16 = vpop.f32.mrf.mxu3  ;;  %v2905_v17 = vadd.f32 %v2904_v60, %v2891_v45 }
 0x1b2   :  { %3344 = vmatpush.bf16.msra.mxu0 %v5622_v9  ;;  %v2932_v50 = vpop.f32.mrf.mxu0 }
 0x1b3   :  { %v2919_v31 = vadd.f32 %v2918_v16, %v2905_v17  ;;  %3358 = vmatpush.bf16.msra.mxu1 %v5630_v40 }
 0x1b5   :  { %v2933_v48 = vadd.f32 %v2932_v50, %v2919_v31 }
 0x1b6   :  { %3345 = vmatpush.bf16.msra.mxu0 %v5621_v14  ;;  %v2892_v42 = vpop.f32.mrf.mxu1 }
 0x1b7   :  { %v2893_v58 = vadd.f32 %v2892_v42, %v2879_v7  ;;  %3359 = vmatpush.bf16.msra.mxu1 %v5629_v39  ;;  %v5647_v39 = vld [vmem:[#allocation12 + $0x28] sm:$0xff] }
 0x1b8   :  { %v2906_v25 = vpop.f32.mrf.mxu2 }
 0x1b9   :  { %v2920_v59 = vpop.f32.mrf.mxu3  ;;  %v2907_v12 = vadd.f32 %v2906_v25, %v2893_v58  ;;  %v5626_v25 = vld [vmem:[#allocation6 + $0x40] sm:$0xff] }
 0x1ba   :  { %3346 = vmatpush.bf16.msra.mxu0 %v5620_v51  ;;  %v2934_v35 = vpop.f32.mrf.mxu0 }
 0x1bb   :  { %v2921_v57 = vadd.f32 %v2920_v59, %v2907_v12  ;;  %3360 = vmatpush.bf16.msra.mxu1 %v5628_v24 }
 0x1bd   :  { %v2935_v11 = vadd.f32 %v2934_v35, %v2921_v57 }
 0x1be   :  { %3347 = vmatpush.bf16.msra.mxu0 %v5619_v21  ;;  %v2946_v6 = vpop.f32.mrf.mxu1 }
 0x1bf   :  { %v2947_v10 = vadd.f32 %v2946_v6, %v2933_v48  ;;  %3361 = vmatpush.bf16.msra.mxu1 %v5627_v37  ;;  %v5641_v48 = vld [vmem:[#allocation9 + $0x38] sm:$0xff] }
 0x1c0   :  { %v2960_v30 = vpop.f32.mrf.mxu2  ;;  %3440 = vmatpush.bf16.msra.mxu2 %v5641_v48 }
 0x1c1   :  { %v2974_v52 = vpop.f32.mrf.mxu3  ;;  %v2961_v33 = vadd.f32 %v2960_v30, %v2947_v10 }
 0x1c2   :  { %3348 = vmatpush.bf16.msra.mxu0 %v5618_v34  ;;  %v2988_v8 = vpop.f32.mrf.mxu0 }
 0x1c3   :  { %v2975_v46 = vadd.f32 %v2974_v52, %v2961_v33  ;;  %3362 = vmatpush.bf16.msra.mxu1 %v5626_v25  ;;  %v5639_v33 = vld [vmem:[#allocation9 + $0x28] sm:$0xff] }
 0x1c4   :  { %v5643_v25 = vld [vmem:[#allocation12 + $0x8] sm:$0xff] }
 0x1c5   :  { %3349 = vmatmul.bf16.vlgmr.msra.gmra.mxu0 %v3207_v4  ;;  %v2989_v44 = vadd.f32 %v2988_v8, %v2975_v46 }
 0x1c6   :  { %v2948_v63 = vpop.f32.mrf.mxu1 }
 0x1c7   :  { %v2949_v13 = vadd.f32 %v2948_v63, %v2935_v11 }
 0x1c8   :  { %v2962_v5 = vpop.f32.mrf.mxu2 }
 0x1c9   :  { %v2976_v56 = vpop.f32.mrf.mxu3  ;;  %v2963_v9 = vadd.f32 %v2962_v5, %v2949_v13 }
 0x1ca   :  { %v2990_v43 = vpop.f32.mrf.mxu0 }
 0x1cb   :  { %v2977_v14 = vadd.f32 %v2976_v56, %v2963_v9  ;;  %v5638_v9 = vld [vmem:[#allocation9 + $0x20] sm:$0xff] }
 0x1cd   :  { %v2991_v62 = vadd.f32 %v2990_v43, %v2977_v14  ;;  %v5637_v14 = vld [vmem:[#allocation9 + $0x18] sm:$0xff] }
 0x1ce   :  { %v3002_v54 = vpop.f32.mrf.mxu1 }
 0x1cf   :  { %v3003_v19 = vadd.f32 %v3002_v54, %v2989_v44 }
 0x1d0   :  { %v3016_v2 = vpop.f32.mrf.mxu2 }
 0x1d1   :  { %v3030_v49 = vpop.f32.mrf.mxu3  ;;  %v3017_v28 = vadd.f32 %v3016_v2, %v3003_v19  ;;  %v5635_v19 = vld [vmem:[#allocation9 + $0x8] sm:$0xff] }
 0x1d3   :  { %v3031_v21 = vadd.f32 %v3030_v49, %v3017_v28  ;;  %v5648_v28 = vld [vmem:[#allocation12 + $0x30] sm:$0xff] }
 0x1d6   :  { %v3004_v0 = vpop.f32.mrf.mxu1 }
 0x1d7   :  { %v3005_v29 = vadd.f32 %v3004_v0, %v2991_v62  ;;  %v5640_v0 = vld [vmem:[#allocation9 + $0x30] sm:$0xff]  ;;  %v5634_v62 = vld [vmem:[#allocation9] sm:$0xff] }
 0x1d8   :  { %v3018_v3 = vpop.f32.mrf.mxu2  ;;  %3441 = vmatpush.bf16.msra.mxu2 %v5640_v0 }
 0x1d9   :  { %v3032_v47 = vpop.f32.mrf.mxu3  ;;  %v3019_v38 = vadd.f32 %v3018_v3, %v3005_v29 }
 0x1db   :  { %v3033_v61 = vadd.f32 %v3032_v47, %v3019_v38  ;;  %v5662_v38 = vld [vmem:[#allocation7] ss:$0 sm:$0xff] }
 0x1dc   :  { %3442 = vmatpush.bf16.msra.mxu2 %v5639_v33 }
 0x1e0   :  { %3443 = vmatpush.bf16.msra.mxu2 %v5638_v9 }
 0x1e2   :  { %v3044_v36 = vpop.f32.mrf.mxu0 }
 0x1e3   :  { %v3058_v23 = vpop.f32.mrf.mxu1  ;;  %v3045_v55 = vadd.f32 %v3044_v36, %v3031_v21 }
 0x1e4   :  { %3444 = vmatpush.bf16.msra.mxu2 %v5637_v14 }
 0x1e5   :  { %v3059_v16 = vadd.f32 %v3058_v23, %v3045_v55 }
 0x1ea   :  { %v3072_v15 = vpop.f32.mrf.mxu2  ;;  %v3046_v51 = vpop.f32.mrf.mxu0 }
 0x1eb   :  { %v3086_v22 = vpop.f32.mrf.mxu3  ;;  %v3060_v27 = vpop.f32.mrf.mxu1  ;;  %v3047_v32 = vadd.f32 %v3046_v51, %v3033_v61  ;;  %v3073_v42 = vadd.f32 %v3072_v15, %v3059_v16  ;;  %v5649_v51 = vld [vmem:[#allocation12 + $0x38] sm:$0xff] }
 0x1ec   :  { %3525 = vmatpush.bf16.msra.mxu3 %v5649_v51 }
 0x1ed   :  { %v3061_v50 = vadd.f32 %v3060_v27, %v3047_v32  ;;  %v3087_v30 = vadd.f32 %v3086_v22, %v3073_v42  ;;  %v5636_v22 = vld [vmem:[#allocation9 + $0x10] sm:$0xff]  ;;  %v5646_v27 = vld [vmem:[#allocation12 + $0x20] sm:$0xff]  ;;  %v5645_v32 = vld [vmem:[#allocation12 + $0x18] sm:$0xff] }
 0x1ee   :  { %3445 = vmatpush.bf16.msra.mxu2 %v5636_v22  ;;  %v5644_v42 = vld [vmem:[#allocation12 + $0x10] sm:$0xff] }
 0x1f0   :  { %3526 = vmatpush.bf16.msra.mxu3 %v5648_v28 }
 0x1f2   :  { %v3074_v34 = vpop.f32.mrf.mxu2  ;;  %3446 = vmatpush.bf16.msra.mxu2 %v5635_v19 }
 0x1f3   :  { %v3088_v26 = vpop.f32.mrf.mxu3  ;;  %v3075_v41 = vadd.f32 %v3074_v34, %v3061_v50 }
 0x1f4   :  { %3527 = vmatpush.bf16.msra.mxu3 %v5647_v39 }
 0x1f5   :  { %v3089_v63 = vadd.f32 %v3088_v26, %v3075_v41 }
 0x1f6   :  { %3447 = vmatpush.bf16.msra.mxu2 %v5634_v62 }
 0x1f8   :  { %3528 = vmatpush.bf16.msra.mxu3 %v5646_v27 }
 0x1fc   :  { %3529 = vmatpush.bf16.msra.mxu3 %v5645_v32 }
 0x200   :  { %3530 = vmatpush.bf16.msra.mxu3 %v5644_v42 }
 0x202   :  { %v3100_v4 = vpop.f32.mrf.mxu0 }
 0x203   :  { %v3114_v60 = vpop.f32.mrf.mxu1  ;;  %v3101_v35 = vadd.f32 %v3100_v4, %v3087_v30 }
 0x204   :  { %3531 = vmatpush.bf16.msra.mxu3 %v5643_v25 }
 0x205   :  { %v3115_v45 = vadd.f32 %v3114_v60, %v3101_v35 }
 0x20a   :  { %v3128_v59 = vpop.f32.mrf.mxu2  ;;  %v3102_v52 = vpop.f32.mrf.mxu0 }
 0x20b   :  { %v3142_v6 = vpop.f32.mrf.mxu3  ;;  %v3116_v53 = vpop.f32.mrf.mxu1  ;;  %v3103_v5 = vadd.f32 %v3102_v52, %v3089_v63  ;;  %v3129_v56 = vadd.f32 %v3128_v59, %v3115_v45  ;;  %v5642_v59 = vld [vmem:[#allocation12] sm:$0xff] }
 0x20c   :  { %3532 = vmatpush.bf16.msra.mxu3 %v5642_v59  ;;  %v5664_v45 = vld [vmem:[#allocation13] ss:$0 sm:$0xff] }
 0x20d   :  { %v3117_v54 = vadd.f32 %v3116_v53, %v3103_v5  ;;  %v3143_v31 = vadd.f32 %v3142_v6, %v3129_v56  ;;  %v5663_v6 = vld [vmem:[#allocation10] ss:$0 sm:$0xff] }
 0x212   :  { %v3130_v7 = vpop.f32.mrf.mxu2 }
 0x213   :  { %v3144_v8 = vpop.f32.mrf.mxu3  ;;  %v3131_v2 = vadd.f32 %v3130_v7, %v3117_v54 }
 0x215   :  { %v3145_v43 = vadd.f32 %v3144_v8, %v3131_v2 }
 0x222   :  { %v3156_v17 = vpop.f32.mrf.mxu0 }
 0x223   :  { %v3170_v58 = vpop.f32.mrf.mxu1  ;;  %v3157_v12 = vadd.f32 %v3156_v17, %v3143_v31 }
 0x225   :  { %v3171_v18 = vadd.f32 %v3170_v58, %v3157_v12 }
 0x22a   :  { %v3184_v49 = vpop.f32.mrf.mxu2  ;;  %v3158_v57 = vpop.f32.mrf.mxu0 }
 0x22b   :  { %v3198_v1 = vpop.f32.mrf.mxu3  ;;  %v3159_v10 = vadd.f32 %v3158_v57, %v3145_v43  ;;  %v3185_v11 = vadd.f32 %v3184_v49, %v3171_v18  ;;  %v3172_v3 = vpop.f32.mrf.mxu1 }
 0x22d   :  { %v3173_v47 = vadd.f32 %v3172_v3, %v3159_v10  ;;  %v3199_v13 = vadd.f32 %v3198_v1, %v3185_v11 }
 0x22f   :  { %v3204_v44 = vmax.f32 %v3199_v13, 0.0 }
 0x232   :  { %v3186_v36 = vpop.f32.mrf.mxu2 }
 0x233   :  { %v3187_v23 = vadd.f32 %v3186_v36, %v3173_v47  ;;  %v3200_v46 = vpop.f32.mrf.mxu3 }
 0x235   :  { %v3201_v20 = vadd.f32 %v3200_v46, %v3187_v23 }
 0x237   :  { %v3206_v15 = vmax.f32 %v3201_v20, 0.0 }
 0x239   :  { %v3208_v40 = vpack.c.bf16 %v3206_v15, %v3204_v44 }
 0x23b   :  { %3363 = vmatmul.bf16.vlgmr.msra.gmra.mxu1 %v3208_v40 }
 0x242   :  { %v3350_v29 = vpop.f32.mrf.mxu0 }
 0x243   :  { %v3351_v34 = vadd.f32 %v5662_v38, %v3350_v29 }
 0x24a   :  { %v3352_v24 = vpop.f32.mrf.mxu0 }
 0x24b   :  { %v3353_v55 = vadd.f32 %v5662_v38, %v3352_v24 }
 0x2b8   :  { %v3364_v21 = vpop.f32.mrf.mxu1 }
 0x2b9   :  { %v3365_v26 = vadd.f32 %v3364_v21, %v3351_v34 }
 0x2bb   :  { %v3369_v37 = vmax.f32 %v3365_v26, 0.0 }
 0x2c0   :  { %v3366_v4 = vpop.f32.mrf.mxu1 }
 0x2c1   :  { %v3367_v61 = vadd.f32 %v3366_v4, %v3353_v55 }
 0x2c3   :  { %v3370_v60 = vmax.f32 %v3367_v61, 0.0 }
 0x2c5   :  { %v3371_v16 = vpack.c.bf16 %v3370_v60, %v3369_v37 }
 0x2c7   :  { %3448 = vmatmul.bf16.vlgmr.msra.gmra.mxu2 %v3371_v16 }
 0x34a   :  { %v3449_v50 = vpop.f32.mrf.mxu2 }
 0x34b   :  { %v3450_v30 = vadd.f32 %v5663_v6, %v3449_v50 }
 0x34d   :  { %v3454_v35 = vmax.f32 %v3450_v30, 0.0 }
 0x352   :  { %v3451_v41 = vpop.f32.mrf.mxu2 }
 0x353   :  { %v3452_v52 = vadd.f32 %v5663_v6, %v3451_v41 }
 0x355   :  { %v3455_v53 = vmax.f32 %v3452_v52, 0.0 }
 0x357   :  { %v3456_v63 = vpack.c.bf16 %v3455_v53, %v3454_v35 }
 0x359   :  { %3533 = vmatmul.bf16.vlgmr.msra.gmra.mxu3 %v3456_v63 }
 0x3dc   :  { %v3534_v5 = vpop.f32.mrf.mxu3 }
 0x3dd   :  { %v3535_v7 = vadd.f32 %v5664_v45, %v3534_v5 }
 0x3df   :  { %3539 = vmax.xlane.f32.xlu0 %v3535_v7 }
 0x3e4   :  { %v3536_v56 = vpop.f32.mrf.mxu3 }
 0x3e5   :  { %v3537_v8 = vadd.f32 %v5664_v45, %v3536_v56 }
 0x3e7   :  { %3541 = vmax.xlane.f32.xlu0 %v3537_v8 }
 0x452   :  { %v3540_v17 = vpop.xlane.xlu0 %3539 }
 0x453   :  { %v3543_v54 = vsub.f32 %v3535_v7, %v3540_v17 }
 0x455   :  { %v3545_v58 = vmul.f32 1.442695, %v3543_v54 }
 0x457   :  { %5665 = vpow2.f32 %v3545_v58 }
 0x45a   :  { %v3542_v31 = vpop.xlane.xlu0 %3541 }
 0x45b   :  { %v3544_v2 = vsub.f32 %v3537_v8, %v3542_v31 }
 0x45d   :  { %v5666_v12 = vpop.eup %5665  ;;  %v3547_v49 = vmul.f32 1.442695, %v3544_v2 }
 0x45e   :  { %3549 = vadd.xlane.f32.xlu1 %v5666_v12 }
 0x45f   :  { %5667 = vpow2.f32 %v3547_v49 }
 0x465   :  { %v5668_v48 = vpop.eup %5667 }
 0x466   :  { %3551 = vadd.xlane.f32.xlu1 %v5668_v48 }
 0x4d1   :  { %v3550_v43 = vpop.xlane.xlu1 %3549 }
 0x4d2   :  { %5669 = vlog2.f32 %v3550_v43 }
 0x4d8   :  { %v5670_v1 = vpop.eup %5669 }
 0x4d9   :  { %v3554_v57 = vmul.f32 0.6931472, %v5670_v1  ;;  %v3552_v0 = vpop.xlane.xlu1 %3551 }
 0x4da   :  { %5671 = vlog2.f32 %v3552_v0 }
 0x4db   :  { %v3557_v18 = vsub.f32 %v3543_v54, %v3554_v57 }
 0x4dd   :  { %3559 = vst [vmem:[%s6325_s9] sm:$0xff] %v3557_v18 }
 0x4e0   :  { %v5672_v10 = vpop.eup %5671 }
 0x4e1   :  { %v3556_v11 = vmul.f32 0.6931472, %v5672_v10 }
 0x4e3   :  { %v3558_v3 = vsub.f32 %v3544_v2, %v3556_v11 }
 0x4e5   :  { %3560 = vst [vmem:[%s6325_s9 + $0x8] sm:$0xff] %v3558_v3 }
 0x4e6   :  { %3565 = vsyncpa [#allocation3], 1 }
 0x4e7   :  { %3566 = vsyncpa [#allocation5], 1 }
 0x4e8   :  { %3567 = vsyncpa [#allocation8], 1 }
 0x4e9   :  { %3568 = vsyncpa [#allocation11], 1 }
 0x4ea   :  { %3569 = vsyncpa [#allocation14], 1 }

</bundles_post_ra>
